<compile_context>
chip_gen: v7x
topology: tpu7x:2x2x1
jax: 0.10.0
libtpu: 0.0.40
codegen_flags: <defaults>
</compile_context>

<pallas_src>
import functools

import jax
import jax.numpy as jnp
from jax.experimental import pallas as pl
from jax.experimental.pallas import tpu as pltpu


# ---------------------------------------------------------------------------
# helpers
# ---------------------------------------------------------------------------
def _round_up(x, m):
    return ((x + m - 1) // m) * m


def _pick_tile(dim, candidates):
    for c in candidates:
        if dim % c == 0:
            return c
    return dim


def _pad_gate_cols(w, H, Hp):
    """Pad last axis from 3H to 3Hp, padding each r/z/n gate block separately."""
    if H == Hp:
        return w
    parts = [w[..., g * H:(g + 1) * H] for g in range(3)]
    pad = [(0, 0)] * (w.ndim - 1) + [(0, Hp - H)]
    return jnp.concatenate([jnp.pad(p, pad) for p in parts], axis=-1)


# ---------------------------------------------------------------------------
# Pallas kernels
# ---------------------------------------------------------------------------
def _matmul_bias_kernel(a_ref, b_ref, bias_ref, o_ref, acc_ref):
    """Tiled (tm,tk)@(tk,tn) with f32 VMEM accumulator; bias added + stored on
    the last contraction step (output block is resident across k)."""
    @pl.when(pl.program_id(2) == 0)
    def _():
        acc_ref[...] = jnp.zeros_like(acc_ref)

    acc_ref[...] += jnp.dot(a_ref[...], b_ref[...],
                            preferred_element_type=jnp.float32)

    @pl.when(pl.program_id(2) == pl.num_programs(2) - 1)
    def _():
        o_ref[...] = (acc_ref[...] + bias_ref[...]).astype(o_ref.dtype)


def _gru_scan_kernel(gi_ref, gctx_ref, h0_ref, whh_ref, bhh_ref, y_ref, h_scr):
    """GRU recurrence. Grid axis 0 = time blocks (sequential). gi already holds
    x@W_ih + b_ih for every timestep; only h@W_hh stays on the serial path.
    gctx is a per-batch gate offset (decoder context term), zeros otherwise."""
    @pl.when(pl.program_id(0) == 0)
    def _():
        h_scr[...] = h0_ref[...]

    Hp = h_scr.shape[-1]
    Tb = gi_ref.shape[0]

    def step(i, carry):
        h = h_scr[...]                                       # f32 (Bp, Hp)
        gh = jnp.dot(h.astype(whh_ref.dtype), whh_ref[...],
                     preferred_element_type=jnp.float32) + bhh_ref[...]
        gi = gi_ref[i] + gctx_ref[...]                       # (Bp, 3Hp)

        # PyTorch GRU gate order r, z, n; slices are lane-aligned (Hp % 128 == 0).
        r = jax.nn.sigmoid(gi[:, :Hp] + gh[:, :Hp])
        z = jax.nn.sigmoid(gi[:, Hp:2 * Hp] + gh[:, Hp:2 * Hp])
        n = jnp.tanh(gi[:, 2 * Hp:] + r * gh[:, 2 * Hp:])
        h_new = (1.0 - z) * n + z * h

        h_scr[...] = h_new
        y_ref[i] = h_new
        return carry

    jax.lax.fori_loop(0, Tb, step, 0, unroll=True)


# ---------------------------------------------------------------------------
# pallas_call wrappers
# ---------------------------------------------------------------------------
def matmul_bias(a, b, bias=None):
    """(M,K) @ (K,N) + bias(1,N) -> (M,N) f32. MXU operands in bf16, f32 accum.
    Pads M/K/N to tile multiples internally and slices the result back."""
    M, K = a.shape
    K2, N = b.shape
    assert K == K2, (K, K2)

    Kp = _round_up(K, 128)
    Np = _round_up(N, 128)
    tm = min(128, _round_up(M, 16))
    Mp = _round_up(M, tm)
    tn = _pick_tile(Np, (512, 256, 128))
    tk = _pick_tile(Kp, (512, 256, 128))

    a_p = jnp.pad(a.astype(jnp.bfloat16), ((0, Mp - M), (0, Kp - K)))
    b_p = jnp.pad(b.astype(jnp.bfloat16), ((0, Kp - K), (0, Np - N)))
    if bias is None:
        bias_p = jnp.zeros((1, Np), jnp.float32)
    else:
        bias_p = jnp.pad(bias.astype(jnp.float32).reshape(1, N),
                         ((0, 0), (0, Np - N)))

    out = pl.pallas_call(
        _matmul_bias_kernel,
        out_shape=jax.ShapeDtypeStruct((Mp, Np), jnp.float32),
        grid_spec=pltpu.PrefetchScalarGridSpec(
            num_scalar_prefetch=0,
            grid=(Mp // tm, Np // tn, Kp // tk),
            in_specs=[
                pl.BlockSpec((tm, tk), lambda i, j, k: (i, k)),
                pl.BlockSpec((tk, tn), lambda i, j, k: (k, j)),
                pl.BlockSpec((1, tn), lambda i, j, k: (0, j)),
            ],
            out_specs=pl.BlockSpec((tm, tn), lambda i, j, k: (i, j)),
            scratch_shapes=[pltpu.VMEM((tm, tn), jnp.float32)],
        ),
        compiler_params=pltpu.CompilerParams(
            dimension_semantics=("parallel", "parallel", "arbitrary")),
    )(a_p, b_p, bias_p)
    return out[:M, :N]


def gru_recurrence(gi, gctx, h0, whh_p, bhh_p):
    """gi: (T, Bp, 3Hp) f32 precomputed input gates (incl. b_ih),
    gctx: (Bp, 3Hp) f32 extra gate term, h0: (Bp, Hp) f32,
    whh_p: (Hp, 3Hp) bf16, bhh_p: (1, 3Hp) f32. Returns y: (T, Bp, Hp) f32."""
    T, Bp, G3 = gi.shape
    Hp = h0.shape[-1]
    Tb = min(16, T)
    Tp = _round_up(T, Tb)
    if Tp != T:
        gi = jnp.pad(gi, ((0, Tp - T), (0, 0), (0, 0)))

    y = pl.pallas_call(
        _gru_scan_kernel,
        out_shape=jax.ShapeDtypeStruct((Tp, Bp, Hp), jnp.float32),
        grid_spec=pltpu.PrefetchScalarGridSpec(
            num_scalar_prefetch=0,
            grid=(Tp // Tb,),
            in_specs=[
                pl.BlockSpec((Tb, Bp, G3), lambda t: (t, 0, 0)),   # gi block
                pl.BlockSpec((Bp, G3), lambda t: (0, 0)),          # gctx
                pl.BlockSpec((Bp, Hp), lambda t: (0, 0)),          # h0
                pl.BlockSpec((Hp, G3), lambda t: (0, 0)),          # W_hh^T (bf16)
                pl.BlockSpec((1, G3), lambda t: (0, 0)),           # b_hh
            ],
            out_specs=pl.BlockSpec((Tb, Bp, Hp), lambda t: (t, 0, 0)),
            scratch_shapes=[pltpu.VMEM((Bp, Hp), jnp.float32)],
        ),
        compiler_params=pltpu.CompilerParams(
            dimension_semantics=("arbitrary",)),
    )(gi, gctx, h0, whh_p, bhh_p)
    return y[:T]


def gru_layer(x_pad, h0_pad, wi, wh, bi, bh, H, Hp, gctx=None):
    """One GRU layer. x_pad: (T, Bp, I) f32. wi: (I0, 3H), wh: (H, 3H),
    bi/bh: (1, 3H) in torch layout (already transposed for x @ W)."""
    T, Bp, I = x_pad.shape

    wi_p = _pad_gate_cols(wi, H, Hp)                      # (I0, 3Hp)
    if wi_p.shape[0] < I:                                 # zero rows for padded feats
        wi_p = jnp.pad(wi_p, ((0, I - wi_p.shape[0]), (0, 0)))
    wh_p = jnp.pad(_pad_gate_cols(wh, H, Hp), ((0, Hp - H), (0, 0)))   # (Hp, 3Hp)
    bi_p = _pad_gate_cols(bi, H, Hp)
    bh_p = _pad_gate_cols(bh, H, Hp)

    # Hoisted input-gate matmul over all (T*Bp) rows at once.
    gi = matmul_bias(x_pad.reshape(T * Bp, I), wi_p, bi_p).reshape(T, Bp, 3 * Hp)
    if gctx is None:
        gctx = jnp.zeros((Bp, 3 * Hp), jnp.float32)

    y = gru_recurrence(gi, gctx, h0_pad, wh_p.astype(jnp.bfloat16), bh_p)
    return y, y[T - 1]


# ---------------------------------------------------------------------------
# EncoderDecoder forward
# ---------------------------------------------------------------------------
def make_params(key, vocab_size, embed_size, num_hiddens, num_layers):
    def uni(k, shape, fan):
        bound = 1.0 / jnp.sqrt(fan)
        return jax.random.uniform(k, shape, jnp.float32, -bound, bound)

    keys = iter(jax.random.split(key, 64))
    p = {
        "enc_emb": jax.random.normal(next(keys), (vocab_size, embed_size), jnp.float32) * 0.1,
        "dec_emb": jax.random.normal(next(keys), (vocab_size, embed_size), jnp.float32) * 0.1,
        "enc_gru": [],
        "dec_gru": [],
    }
    H = num_hiddens
    for l in range(num_layers):
        I = embed_size if l == 0 else H
        p["enc_gru"].append((uni(next(keys), (I, 3 * H), H),
                             uni(next(keys), (H, 3 * H), H),
                             uni(next(keys), (1, 3 * H), H),
                             uni(next(keys), (1, 3 * H), H)))
    for l in range(num_layers):
        I = (embed_size + H) if l == 0 else H
        p["dec_gru"].append((uni(next(keys), (I, 3 * H), H),
                             uni(next(keys), (H, 3 * H), H),
                             uni(next(keys), (1, 3 * H), H),
                             uni(next(keys), (1, 3 * H), H)))
    p["w_out"] = uni(next(keys), (H, vocab_size), H)
    p["b_out"] = uni(next(keys), (1, vocab_size), H)
    return p


def encoder_forward(params, enc_X, H, Hp, Bp, num_layers):
    # enc_X: (B, T) int32; enc_valid_len is unused by this encoder (d2l semantics).
    B, T = enc_X.shape
    emb = jnp.take(params["enc_emb"], enc_X, axis=0)          # (B, T, E)  (JAX glue)
    x = jnp.transpose(emb, (1, 0, 2)).astype(jnp.float32)     # (T, B, E)
    x = jnp.pad(x, ((0, 0), (0, Bp - B), (0, 0)))             # (T, Bp, E)
    states = []
    for l in range(num_layers):
        h0 = jnp.zeros((Bp, Hp), jnp.float32)
        x, hT = gru_layer(x, h0, *params["enc_gru"][l], H=H, Hp=Hp)
        states.append(hT)
    return x, jnp.stack(states)                               # (T,Bp,Hp), (L,Bp,Hp)


def decoder_forward(params, dec_X, state_pad, E, H, Hp, Bp, num_layers):
    B, T = dec_X.shape
    emb = jnp.take(params["dec_emb"], dec_X, axis=0)          # (B, T, E)
    x = jnp.transpose(emb, (1, 0, 2)).astype(jnp.float32)     # (T, B, E)
    x = jnp.pad(x, ((0, 0), (0, Bp - B), (0, 0)))             # (T, Bp, E)

    # Decoder context (constant over time): fold ctx @ W_ctx into the gates once,
    # instead of broadcasting + concatenating (T, B, H) per timestep.
    ctx = state_pad[-1]                                       # (Bp, Hp)
    wi0, wh0, bi0, bh0 = params["dec_gru"][0]                 # wi0: (E+H, 3H)
    w_x, w_ctx = wi0[:E], wi0[E:]
    w_ctx_p = jnp.pad(_pad_gate_cols(w_ctx, H, Hp), ((0, Hp - H), (0, 0)))
    gctx = matmul_bias(ctx, w_ctx_p)                          # (Bp, 3Hp)

    new_states = []
    x, hT = gru_layer(x, state_pad[0], w_x, wh0, bi0, bh0, H=H, Hp=Hp, gctx=gctx)
    new_states.append(hT)
    for l in range(1, num_layers):
        x, hT = gru_layer(x, state_pad[l], *params["dec_gru"][l], H=H, Hp=Hp)
        new_states.append(hT)

    # Output projection as a lane-dense tiled matmul over (T*Bp, Hp).
    V = params["w_out"].shape[-1]
    w_out_p = jnp.pad(params["w_out"], ((0, Hp - H), (0, 0)))  # (Hp, V)
    logits = matmul_bias(x.reshape(T * Bp, Hp), w_out_p, params["b_out"])
    logits = logits.reshape(T, Bp, V)[:, :B]                   # (T, B, V)
    return jnp.transpose(logits, (1, 0, 2)), jnp.stack(new_states)


@functools.partial(jax.jit, static_argnames=("embed_size", "num_hiddens", "num_layers"))
def encoder_decoder_forward(params, enc_X, dec_X, enc_valid_len, *,
                            embed_size, num_hiddens, num_layers):
    del enc_valid_len  # unused by this (d2l Seq2Seq) encoder, kept for API parity
    B = enc_X.shape[0]
    Hp = _round_up(num_hiddens, 128)      # lane-aligned gates
    Bp = _round_up(B, 16)                 # sublane-aligned batch (bf16-safe)

    _, enc_state = encoder_forward(params, enc_X, num_hiddens, Hp, Bp, num_layers)
    out, dec_state = decoder_forward(params, dec_X, enc_state, embed_size,
                                     num_hiddens, Hp, Bp, num_layers)
    return out, dec_state[:, :B, :num_hiddens]


# ---------------------------------------------------------------------------
# Pure-JAX reference (f32, unpadded) for a self-check
# ---------------------------------------------------------------------------
def _ref_gru_layer(x, h0, wi, wh, bi, bh):
    H = h0.shape[-1]

    def step(h, xt):
        gi = xt @ wi + bi
        gh = h @ wh + bh
        r = jax.nn.sigmoid(gi[:, :H] + gh[:, :H])
        z = jax.nn.sigmoid(gi[:, H:2 * H] + gh[:, H:2 * H])
        n = jnp.tanh(gi[:, 2 * H:] + r * gh[:, 2 * H:])
        h_new = (1.0 - z) * n + z * h
        return h_new, h_new

    hT, ys = jax.lax.scan(step, h0, x)
    return ys, hT


def _ref_forward(params, enc_X, dec_X, num_hiddens, num_layers):
    B = enc_X.shape[0]
    x = jnp.transpose(jnp.take(params["enc_emb"], enc_X, axis=0), (1, 0, 2))
    states = []
    for l in range(num_layers):
        x, hT = _ref_gru_layer(x, jnp.zeros((B, num_hiddens)), *params["enc_gru"][l])
        states.append(hT)
    state = jnp.stack(states)
    T = dec_X.shape[1]
    x = jnp.transpose(jnp.take(params["dec_emb"], dec_X, axis=0), (1, 0, 2))
    ctx = jnp.broadcast_to(state[-1][None], (T, B, num_hiddens))
    x = jnp.concatenate([x, ctx], axis=-1)
    new_states = []
    for l in range(num_layers):
        x, hT = _ref_gru_layer(x, state[l], *params["dec_gru"][l])
        new_states.append(hT)
    out = x @ params["w_out"] + params["b_out"]
    return jnp.transpose(out, (1, 0, 2)), jnp.stack(new_states)


# ---------------------------------------------------------------------------
if __name__ == "__main__":
    VOCAB, EMBED, HIDDEN, LAYERS = 32, 16, 32, 2
    B, T = 4, 8

    key = jax.random.PRNGKey(0)
    kp, ke, kd = jax.random.split(key, 3)
    params = make_params(kp, VOCAB, EMBED, HIDDEN, LAYERS)

    enc_X = jax.random.randint(ke, (B, T), 0, VOCAB, dtype=jnp.int32)
    dec_X = jax.random.randint(kd, (B, T), 0, VOCAB, dtype=jnp.int32)
    enc_valid_len = jnp.full((B,), T, dtype=jnp.int32)  # unused by this encoder

    out, state = encoder_decoder_forward(params, enc_X, dec_X, enc_valid_len,
                                         embed_size=EMBED, num_hiddens=HIDDEN,
                                         num_layers=LAYERS)
    out = jax.block_until_ready(out)
    state = jax.block_until_ready(state)

    assert out.shape == (B, T, VOCAB), out.shape
    assert state.shape == (LAYERS, B, HIDDEN), state.shape

    ref_out, ref_state = _ref_forward(params, enc_X, dec_X, HIDDEN, LAYERS)
    # bf16 MXU operands (f32 accumulation) -> slightly looser tolerance than pure f32.
    assert jnp.allclose(out, ref_out, atol=2e-2, rtol=2e-2)
    assert jnp.allclose(state, ref_state, atol=2e-2, rtol=2e-2)

    print("KERNEL_OK")
</pallas_src>

<mosaic_0001>
module attributes {stable_mosaic.version = 11 : i64} {
  func.func @_matmul_bias_kernel(%arg0: i32, %arg1: i32, %arg2: i32, %arg3: memref<128x128xbf16, #tpu.memory_space<vmem>>, %arg4: memref<128x128xbf16, #tpu.memory_space<vmem>>, %arg5: memref<1x128xf32, #tpu.memory_space<vmem>>, %arg6: memref<128x128xf32, #tpu.memory_space<vmem>>, %arg7: memref<128x128xf32, #tpu.memory_space<vmem>>) attributes {dimension_semantics = [#tpu.dimension_semantics<parallel>, #tpu.dimension_semantics<parallel>, #tpu.dimension_semantics<arbitrary>], iteration_bounds = array<i64: 1, 3, 1>, scalar_prefetch = 0 : i64, scratch_operands = 1 : i64, tpu.core_type = #tpu.core_type<tc>, window_params = [{transform_indices = @transform_0, window_bounds = array<i64: 128, 128>}, {transform_indices = @transform_1, window_bounds = array<i64: 128, 128>}, {transform_indices = @transform_2, window_bounds = array<i64: 1, 128>}, {transform_indices = @transform_3, window_bounds = array<i64: 128, 128>}]} {
    %c0_i32 = arith.constant 0 : i32
    %0 = arith.cmpi eq, %arg2, %c0_i32 : i32
    %1 = arith.extui %0 : i1 to i32
    %c0_i32_0 = arith.constant 0 : i32
    %2 = arith.cmpi ne, %1, %c0_i32_0 : i32
    scf.if %2 {
      %cst_10 = arith.constant 0.000000e+00 : f32
      %12 = vector.broadcast %cst_10 : f32 to vector<128x128xf32>
      %c0_11 = arith.constant 0 : index
      %c0_12 = arith.constant 0 : index
      %13 = vector.load %arg7[%c0_11, %c0_12] : memref<128x128xf32, #tpu.memory_space<vmem>>, vector<128x128xf32>
      tpu.vector_store %arg7[%c0_11, %c0_12], %12 {strides = array<i32>} : memref<128x128xf32, #tpu.memory_space<vmem>>, vector<128x128xf32>,
    } else {
    }
    %c0 = arith.constant 0 : index
    %c0_1 = arith.constant 0 : index
    %3 = vector.load %arg7[%c0, %c0_1] : memref<128x128xf32, #tpu.memory_space<vmem>>, vector<128x128xf32>
    %c0_2 = arith.constant 0 : index
    %c0_3 = arith.constant 0 : index
    %4 = vector.load %arg3[%c0_2, %c0_3] : memref<128x128xbf16, #tpu.memory_space<vmem>>, vector<128x128xbf16>
    %c0_4 = arith.constant 0 : index
    %c0_5 = arith.constant 0 : index
    %5 = vector.load %arg4[%c0_4, %c0_5] : memref<128x128xbf16, #tpu.memory_space<vmem>>, vector<128x128xbf16>
    %cst = arith.constant dense<0.000000e+00> : vector<128x128xf32>
    %6 = tpu.matmul %4, %5, %cst {dimension_numbers = #tpu.dot_dimension_numbers<[1], [0], [0], [1], [0, 0, 1, 1], [], []>} : vector<128x128xbf16>, vector<128x128xbf16>, vector<128x128xf32> -> vector<128x128xf32>
    %7 = arith.addf %3, %6 : vector<128x128xf32>
    %c0_6 = arith.constant 0 : index
    %c0_7 = arith.constant 0 : index
    %8 = vector.load %arg7[%c0_6, %c0_7] : memref<128x128xf32, #tpu.memory_space<vmem>>, vector<128x128xf32>
    tpu.vector_store %arg7[%c0_6, %c0_7], %7 {strides = array<i32>} : memref<128x128xf32, #tpu.memory_space<vmem>>, vector<128x128xf32>,
    %c0_i32_8 = arith.constant 0 : i32
    %9 = arith.cmpi eq, %arg2, %c0_i32_8 : i32
    %10 = arith.extui %9 : i1 to i32
    %c0_i32_9 = arith.constant 0 : i32
    %11 = arith.cmpi ne, %10, %c0_i32_9 : i32
    scf.if %11 {
      %c0_10 = arith.constant 0 : index
      %c0_11 = arith.constant 0 : index
      %12 = vector.load %arg7[%c0_10, %c0_11] : memref<128x128xf32, #tpu.memory_space<vmem>>, vector<128x128xf32>
      %c0_12 = arith.constant 0 : index
      %c0_13 = arith.constant 0 : index
      %13 = vector.load %arg5[%c0_12, %c0_13] : memref<1x128xf32, #tpu.memory_space<vmem>>, vector<1x128xf32>
      %14 = vector.broadcast %13 : vector<1x128xf32> to vector<128x128xf32>
      %15 = arith.addf %12, %14 : vector<128x128xf32>
      %c0_14 = arith.constant 0 : index
      %c0_15 = arith.constant 0 : index
      %16 = vector.load %arg6[%c0_14, %c0_15] : memref<128x128xf32, #tpu.memory_space<vmem>>, vector<128x128xf32>
      tpu.vector_store %arg6[%c0_14, %c0_15], %15 {strides = array<i32>} : memref<128x128xf32, #tpu.memory_space<vmem>>, vector<128x128xf32>,
    } else {
    }
    return
  }
  func.func @transform_0(%arg0: i32, %arg1: i32, %arg2: i32) -> (i32, i32) {
    %c0_i32 = arith.constant 0 : i32
    return %arg0, %arg2 : i32, i32
  }
  func.func @transform_1(%arg0: i32, %arg1: i32, %arg2: i32) -> (i32, i32) {
    %c0_i32 = arith.constant 0 : i32
    return %arg2, %arg1 : i32, i32
  }
  func.func @transform_2(%arg0: i32, %arg1: i32, %arg2: i32) -> (i32, i32) {
    %c0_i32 = arith.constant 0 : i32
    %c0_i32_0 = arith.constant 0 : i32
    return %c0_i32, %arg1 : i32, i32
  }
  func.func @transform_3(%arg0: i32, %arg1: i32, %arg2: i32) -> (i32, i32) {
    %c0_i32 = arith.constant 0 : i32
    return %arg0, %arg1 : i32, i32
  }
}

module attributes {stable_mosaic.version = 11 : i64} {
  func.func @_matmul_bias_kernel(%arg0: i32, %arg1: i32, %arg2: i32, %arg3: memref<16x128xbf16, #tpu.memory_space<vmem>>, %arg4: memref<128x128xbf16, #tpu.memory_space<vmem>>, %arg5: memref<1x128xf32, #tpu.memory_space<vmem>>, %arg6: memref<16x128xf32, #tpu.memory_space<vmem>>, %arg7: memref<16x128xf32, #tpu.memory_space<vmem>>) attributes {dimension_semantics = [#tpu.dimension_semantics<parallel>, #tpu.dimension_semantics<parallel>, #tpu.dimension_semantics<arbitrary>], iteration_bounds = array<i64: 1, 3, 1>, scalar_prefetch = 0 : i64, scratch_operands = 1 : i64, tpu.core_type = #tpu.core_type<tc>, window_params = [{transform_indices = @transform_0, window_bounds = array<i64: 16, 128>}, {transform_indices = @transform_1, window_bounds = array<i64: 128, 128>}, {transform_indices = @transform_2, window_bounds = array<i64: 1, 128>}, {transform_indices = @transform_3, window_bounds = array<i64: 16, 128>}]} {
    %c0_i32 = arith.constant 0 : i32
    %0 = arith.cmpi eq, %arg2, %c0_i32 : i32
    %1 = arith.extui %0 : i1 to i32
    %c0_i32_0 = arith.constant 0 : i32
    %2 = arith.cmpi ne, %1, %c0_i32_0 : i32
    scf.if %2 {
      %cst_10 = arith.constant 0.000000e+00 : f32
      %12 = vector.broadcast %cst_10 : f32 to vector<16x128xf32>
      %c0_11 = arith.constant 0 : index
      %c0_12 = arith.constant 0 : index
      %13 = vector.load %arg7[%c0_11, %c0_12] : memref<16x128xf32, #tpu.memory_space<vmem>>, vector<16x128xf32>
      tpu.vector_store %arg7[%c0_11, %c0_12], %12 {strides = array<i32>} : memref<16x128xf32, #tpu.memory_space<vmem>>, vector<16x128xf32>,
    } else {
    }
    %c0 = arith.constant 0 : index
    %c0_1 = arith.constant 0 : index
    %3 = vector.load %arg7[%c0, %c0_1] : memref<16x128xf32, #tpu.memory_space<vmem>>, vector<16x128xf32>
    %c0_2 = arith.constant 0 : index
    %c0_3 = arith.constant 0 : index
    %4 = vector.load %arg3[%c0_2, %c0_3] : memref<16x128xbf16, #tpu.memory_space<vmem>>, vector<16x128xbf16>
    %c0_4 = arith.constant 0 : index
    %c0_5 = arith.constant 0 : index
    %5 = vector.load %arg4[%c0_4, %c0_5] : memref<128x128xbf16, #tpu.memory_space<vmem>>, vector<128x128xbf16>
    %cst = arith.constant dense<0.000000e+00> : vector<16x128xf32>
    %6 = tpu.matmul %4, %5, %cst {dimension_numbers = #tpu.dot_dimension_numbers<[1], [0], [0], [1], [0, 0, 1, 1], [], []>} : vector<16x128xbf16>, vector<128x128xbf16>, vector<16x128xf32> -> vector<16x128xf32>
    %7 = arith.addf %3, %6 : vector<16x128xf32>
    %c0_6 = arith.constant 0 : index
    %c0_7 = arith.constant 0 : index
    %8 = vector.load %arg7[%c0_6, %c0_7] : memref<16x128xf32, #tpu.memory_space<vmem>>, vector<16x128xf32>
    tpu.vector_store %arg7[%c0_6, %c0_7], %7 {strides = array<i32>} : memref<16x128xf32, #tpu.memory_space<vmem>>, vector<16x128xf32>,
    %c0_i32_8 = arith.constant 0 : i32
    %9 = arith.cmpi eq, %arg2, %c0_i32_8 : i32
    %10 = arith.extui %9 : i1 to i32
    %c0_i32_9 = arith.constant 0 : i32
    %11 = arith.cmpi ne, %10, %c0_i32_9 : i32
    scf.if %11 {
      %c0_10 = arith.constant 0 : index
      %c0_11 = arith.constant 0 : index
      %12 = vector.load %arg7[%c0_10, %c0_11] : memref<16x128xf32, #tpu.memory_space<vmem>>, vector<16x128xf32>
      %c0_12 = arith.constant 0 : index
      %c0_13 = arith.constant 0 : index
      %13 = vector.load %arg5[%c0_12, %c0_13] : memref<1x128xf32, #tpu.memory_space<vmem>>, vector<1x128xf32>
      %14 = vector.broadcast %13 : vector<1x128xf32> to vector<16x128xf32>
      %15 = arith.addf %12, %14 : vector<16x128xf32>
      %c0_14 = arith.constant 0 : index
      %c0_15 = arith.constant 0 : index
      %16 = vector.load %arg6[%c0_14, %c0_15] : memref<16x128xf32, #tpu.memory_space<vmem>>, vector<16x128xf32>
      tpu.vector_store %arg6[%c0_14, %c0_15], %15 {strides = array<i32>} : memref<16x128xf32, #tpu.memory_space<vmem>>, vector<16x128xf32>,
    } else {
    }
    return
  }
  func.func @transform_0(%arg0: i32, %arg1: i32, %arg2: i32) -> (i32, i32) {
    %c0_i32 = arith.constant 0 : i32
    return %arg0, %arg2 : i32, i32
  }
  func.func @transform_1(%arg0: i32, %arg1: i32, %arg2: i32) -> (i32, i32) {
    %c0_i32 = arith.constant 0 : i32
    return %arg2, %arg1 : i32, i32
  }
  func.func @transform_2(%arg0: i32, %arg1: i32, %arg2: i32) -> (i32, i32) {
    %c0_i32 = arith.constant 0 : i32
    %c0_i32_0 = arith.constant 0 : i32
    return %c0_i32, %arg1 : i32, i32
  }
  func.func @transform_3(%arg0: i32, %arg1: i32, %arg2: i32) -> (i32, i32) {
    %c0_i32 = arith.constant 0 : i32
    return %arg0, %arg1 : i32, i32
  }
}

module attributes {stable_mosaic.version = 11 : i64} {
  func.func @_gru_scan_kernel(%arg0: i32, %arg1: memref<8x16x384xf32, #tpu.memory_space<vmem>>, %arg2: memref<16x384xf32, #tpu.memory_space<vmem>>, %arg3: memref<16x128xf32, #tpu.memory_space<vmem>>, %arg4: memref<128x384xbf16, #tpu.memory_space<vmem>>, %arg5: memref<1x384xf32, #tpu.memory_space<vmem>>, %arg6: memref<8x16x128xf32, #tpu.memory_space<vmem>>, %arg7: memref<16x128xf32, #tpu.memory_space<vmem>>) attributes {dimension_semantics = [#tpu.dimension_semantics<arbitrary>], iteration_bounds = array<i64: 1>, scalar_prefetch = 0 : i64, scratch_operands = 1 : i64, tpu.core_type = #tpu.core_type<tc>, window_params = [{transform_indices = @transform_0, window_bounds = array<i64: 8, 16, 384>}, {pipeline_mode = #tpu.pipeline_mode<synchronous>, transform_indices = @transform_1, window_bounds = array<i64: 16, 384>}, {pipeline_mode = #tpu.pipeline_mode<synchronous>, transform_indices = @transform_2, window_bounds = array<i64: 16, 128>}, {pipeline_mode = #tpu.pipeline_mode<synchronous>, transform_indices = @transform_3, window_bounds = array<i64: 128, 384>}, {pipeline_mode = #tpu.pipeline_mode<synchronous>, transform_indices = @transform_4, window_bounds = array<i64: 1, 384>}, {transform_indices = @transform_5, window_bounds = array<i64: 8, 16, 128>}]} {
    %c0_i32 = arith.constant 0 : i32
    %0 = arith.cmpi eq, %arg0, %c0_i32 : i32
    %1 = arith.extui %0 : i1 to i32
    %c0_i32_0 = arith.constant 0 : i32
    %2 = arith.cmpi ne, %1, %c0_i32_0 : i32
    scf.if %2 {
      %c0_144 = arith.constant 0 : index
      %c0_145 = arith.constant 0 : index
      %347 = vector.load %arg3[%c0_144, %c0_145] : memref<16x128xf32, #tpu.memory_space<vmem>>, vector<16x128xf32>
      %c0_146 = arith.constant 0 : index
      %c0_147 = arith.constant 0 : index
      %348 = vector.load %arg7[%c0_146, %c0_147] : memref<16x128xf32, #tpu.memory_space<vmem>>, vector<16x128xf32>
      tpu.vector_store %arg7[%c0_146, %c0_147], %347 {strides = array<i32>} : memref<16x128xf32, #tpu.memory_space<vmem>>, vector<16x128xf32>,
    } else {
    }
    %c0_i32_1 = arith.constant 0 : i32
    %c0 = arith.constant 0 : index
    %c0_2 = arith.constant 0 : index
    %3 = vector.load %arg7[%c0, %c0_2] : memref<16x128xf32, #tpu.memory_space<vmem>>, vector<16x128xf32>
    %4 = arith.truncf %3 : vector<16x128xf32> to vector<16x128xbf16>
    %c0_3 = arith.constant 0 : index
    %c0_4 = arith.constant 0 : index
    %5 = vector.load %arg4[%c0_3, %c0_4] : memref<128x384xbf16, #tpu.memory_space<vmem>>, vector<128x384xbf16>
    %cst = arith.constant dense<0.000000e+00> : vector<16x384xf32>
    %6 = tpu.matmul %4, %5, %cst {dimension_numbers = #tpu.dot_dimension_numbers<[1], [0], [0], [1], [0, 0, 1, 1], [], []>} : vector<16x128xbf16>, vector<128x384xbf16>, vector<16x384xf32> -> vector<16x384xf32>
    %c0_5 = arith.constant 0 : index
    %c0_6 = arith.constant 0 : index
    %7 = vector.load %arg5[%c0_5, %c0_6] : memref<1x384xf32, #tpu.memory_space<vmem>>, vector<1x384xf32>
    %8 = vector.broadcast %7 : vector<1x384xf32> to vector<16x384xf32>
    %9 = arith.addf %6, %8 : vector<16x384xf32>
    %10 = arith.index_cast %c0_i32_1 : i32 to index
    %c0_7 = arith.constant 0 : index
    %c0_8 = arith.constant 0 : index
    %11 = vector.load %arg1[%10, %c0_7, %c0_8] : memref<8x16x384xf32, #tpu.memory_space<vmem>>, vector<1x16x384xf32>
    %12 = vector.shape_cast %11 : vector<1x16x384xf32> to vector<16x384xf32>
    %c0_9 = arith.constant 0 : index
    %c0_10 = arith.constant 0 : index
    %13 = vector.load %arg2[%c0_9, %c0_10] : memref<16x384xf32, #tpu.memory_space<vmem>>, vector<16x384xf32>
    %14 = arith.addf %12, %13 : vector<16x384xf32>
    %15 = vector.extract_strided_slice %14 {offsets = [0, 0], sizes = [16, 128], strides = [1, 1]} : vector<16x384xf32> to vector<16x128xf32>
    %16 = vector.extract_strided_slice %9 {offsets = [0, 0], sizes = [16, 128], strides = [1, 1]} : vector<16x384xf32> to vector<16x128xf32>
    %17 = arith.addf %15, %16 : vector<16x128xf32>
    %18 = arith.negf %17 : vector<16x128xf32>
    %19 = math.exp %18 : vector<16x128xf32>
    %cst_11 = arith.constant 1.000000e+00 : f32
    %20 = vector.broadcast %cst_11 : f32 to vector<16x128xf32>
    %21 = arith.addf %20, %19 : vector<16x128xf32>
    %22 = arith.divf %20, %21 : vector<16x128xf32>
    %23 = vector.extract_strided_slice %14 {offsets = [0, 128], sizes = [16, 128], strides = [1, 1]} : vector<16x384xf32> to vector<16x128xf32>
    %24 = vector.extract_strided_slice %9 {offsets = [0, 128], sizes = [16, 128], strides = [1, 1]} : vector<16x384xf32> to vector<16x128xf32>
    %25 = arith.addf %23, %24 : vector<16x128xf32>
    %26 = arith.negf %25 : vector<16x128xf32>
    %27 = math.exp %26 : vector<16x128xf32>
    %cst_12 = arith.constant 1.000000e+00 : f32
    %28 = vector.broadcast %cst_12 : f32 to vector<16x128xf32>
    %29 = arith.addf %28, %27 : vector<16x128xf32>
    %30 = arith.divf %28, %29 : vector<16x128xf32>
    %31 = vector.extract_strided_slice %14 {offsets = [0, 256], sizes = [16, 128], strides = [1, 1]} : vector<16x384xf32> to vector<16x128xf32>
    %32 = vector.extract_strided_slice %9 {offsets = [0, 256], sizes = [16, 128], strides = [1, 1]} : vector<16x384xf32> to vector<16x128xf32>
    %33 = arith.mulf %22, %32 : vector<16x128xf32>
    %34 = arith.addf %31, %33 : vector<16x128xf32>
    %35 = math.tanh %34 : vector<16x128xf32>
    %cst_13 = arith.constant 1.000000e+00 : f32
    %36 = vector.broadcast %cst_13 : f32 to vector<16x128xf32>
    %37 = arith.subf %36, %30 : vector<16x128xf32>
    %38 = arith.mulf %37, %35 : vector<16x128xf32>
    %39 = arith.mulf %30, %3 : vector<16x128xf32>
    %40 = arith.addf %38, %39 : vector<16x128xf32>
    %c0_14 = arith.constant 0 : index
    %c0_15 = arith.constant 0 : index
    %41 = vector.load %arg7[%c0_14, %c0_15] : memref<16x128xf32, #tpu.memory_space<vmem>>, vector<16x128xf32>
    tpu.vector_store %arg7[%c0_14, %c0_15], %40 {strides = array<i32>} : memref<16x128xf32, #tpu.memory_space<vmem>>, vector<16x128xf32>,
    %42 = arith.index_cast %c0_i32_1 : i32 to index
    %c0_16 = arith.constant 0 : index
    %c0_17 = arith.constant 0 : index
    %43 = vector.load %arg6[%42, %c0_16, %c0_17] : memref<8x16x128xf32, #tpu.memory_space<vmem>>, vector<1x16x128xf32>
    %44 = vector.shape_cast %43 : vector<1x16x128xf32> to vector<16x128xf32>
    %45 = vector.shape_cast %40 : vector<16x128xf32> to vector<1x16x128xf32>
    tpu.vector_store %arg6[%42, %c0_16, %c0_17], %45 {strides = array<i32>} : memref<8x16x128xf32, #tpu.memory_space<vmem>>, vector<1x16x128xf32>,
    %c1_i32 = arith.constant 1 : i32
    %c0_18 = arith.constant 0 : index
    %c0_19 = arith.constant 0 : index
    %46 = vector.load %arg7[%c0_18, %c0_19] : memref<16x128xf32, #tpu.memory_space<vmem>>, vector<16x128xf32>
    %47 = arith.truncf %46 : vector<16x128xf32> to vector<16x128xbf16>
    %c0_20 = arith.constant 0 : index
    %c0_21 = arith.constant 0 : index
    %48 = vector.load %arg4[%c0_20, %c0_21] : memref<128x384xbf16, #tpu.memory_space<vmem>>, vector<128x384xbf16>
    %cst_22 = arith.constant dense<0.000000e+00> : vector<16x384xf32>
    %49 = tpu.matmul %47, %48, %cst_22 {dimension_numbers = #tpu.dot_dimension_numbers<[1], [0], [0], [1], [0, 0, 1, 1], [], []>} : vector<16x128xbf16>, vector<128x384xbf16>, vector<16x384xf32> -> vector<16x384xf32>
    %c0_23 = arith.constant 0 : index
    %c0_24 = arith.constant 0 : index
    %50 = vector.load %arg5[%c0_23, %c0_24] : memref<1x384xf32, #tpu.memory_space<vmem>>, vector<1x384xf32>
    %51 = vector.broadcast %50 : vector<1x384xf32> to vector<16x384xf32>
    %52 = arith.addf %49, %51 : vector<16x384xf32>
    %53 = arith.index_cast %c1_i32 : i32 to index
    %c0_25 = arith.constant 0 : index
    %c0_26 = arith.constant 0 : index
    %54 = vector.load %arg1[%53, %c0_25, %c0_26] : memref<8x16x384xf32, #tpu.memory_space<vmem>>, vector<1x16x384xf32>
    %55 = vector.shape_cast %54 : vector<1x16x384xf32> to vector<16x384xf32>
    %c0_27 = arith.constant 0 : index
    %c0_28 = arith.constant 0 : index
    %56 = vector.load %arg2[%c0_27, %c0_28] : memref<16x384xf32, #tpu.memory_space<vmem>>, vector<16x384xf32>
    %57 = arith.addf %55, %56 : vector<16x384xf32>
    %58 = vector.extract_strided_slice %57 {offsets = [0, 0], sizes = [16, 128], strides = [1, 1]} : vector<16x384xf32> to vector<16x128xf32>
    %59 = vector.extract_strided_slice %52 {offsets = [0, 0], sizes = [16, 128], strides = [1, 1]} : vector<16x384xf32> to vector<16x128xf32>
    %60 = arith.addf %58, %59 : vector<16x128xf32>
    %61 = arith.negf %60 : vector<16x128xf32>
    %62 = math.exp %61 : vector<16x128xf32>
    %cst_29 = arith.constant 1.000000e+00 : f32
    %63 = vector.broadcast %cst_29 : f32 to vector<16x128xf32>
    %64 = arith.addf %63, %62 : vector<16x128xf32>
    %65 = arith.divf %63, %64 : vector<16x128xf32>
    %66 = vector.extract_strided_slice %57 {offsets = [0, 128], sizes = [16, 128], strides = [1, 1]} : vector<16x384xf32> to vector<16x128xf32>
    %67 = vector.extract_strided_slice %52 {offsets = [0, 128], sizes = [16, 128], strides = [1, 1]} : vector<16x384xf32> to vector<16x128xf32>
    %68 = arith.addf %66, %67 : vector<16x128xf32>
    %69 = arith.negf %68 : vector<16x128xf32>
    %70 = math.exp %69 : vector<16x128xf32>
    %cst_30 = arith.constant 1.000000e+00 : f32
    %71 = vector.broadcast %cst_30 : f32 to vector<16x128xf32>
    %72 = arith.addf %71, %70 : vector<16x128xf32>
    %73 = arith.divf %71, %72 : vector<16x128xf32>
    %74 = vector.extract_strided_slice %57 {offsets = [0, 256], sizes = [16, 128], strides = [1, 1]} : vector<16x384xf32> to vector<16x128xf32>
    %75 = vector.extract_strided_slice %52 {offsets = [0, 256], sizes = [16, 128], strides = [1, 1]} : vector<16x384xf32> to vector<16x128xf32>
    %76 = arith.mulf %65, %75 : vector<16x128xf32>
    %77 = arith.addf %74, %76 : vector<16x128xf32>
    %78 = math.tanh %77 : vector<16x128xf32>
    %cst_31 = arith.constant 1.000000e+00 : f32
    %79 = vector.broadcast %cst_31 : f32 to vector<16x128xf32>
    %80 = arith.subf %79, %73 : vector<16x128xf32>
    %81 = arith.mulf %80, %78 : vector<16x128xf32>
    %82 = arith.mulf %73, %46 : vector<16x128xf32>
    %83 = arith.addf %81, %82 : vector<16x128xf32>
    %c0_32 = arith.constant 0 : index
    %c0_33 = arith.constant 0 : index
    %84 = vector.load %arg7[%c0_32, %c0_33] : memref<16x128xf32, #tpu.memory_space<vmem>>, vector<16x128xf32>
    tpu.vector_store %arg7[%c0_32, %c0_33], %83 {strides = array<i32>} : memref<16x128xf32, #tpu.memory_space<vmem>>, vector<16x128xf32>,
    %85 = arith.index_cast %c1_i32 : i32 to index
    %c0_34 = arith.constant 0 : index
    %c0_35 = arith.constant 0 : index
    %86 = vector.load %arg6[%85, %c0_34, %c0_35] : memref<8x16x128xf32, #tpu.memory_space<vmem>>, vector<1x16x128xf32>
    %87 = vector.shape_cast %86 : vector<1x16x128xf32> to vector<16x128xf32>
    %88 = vector.shape_cast %83 : vector<16x128xf32> to vector<1x16x128xf32>
    tpu.vector_store %arg6[%85, %c0_34, %c0_35], %88 {strides = array<i32>} : memref<8x16x128xf32, #tpu.memory_space<vmem>>, vector<1x16x128xf32>,
    %c2_i32 = arith.constant 2 : i32
    %c0_36 = arith.constant 0 : index
    %c0_37 = arith.constant 0 : index
    %89 = vector.load %arg7[%c0_36, %c0_37] : memref<16x128xf32, #tpu.memory_space<vmem>>, vector<16x128xf32>
    %90 = arith.truncf %89 : vector<16x128xf32> to vector<16x128xbf16>
    %c0_38 = arith.constant 0 : index
    %c0_39 = arith.constant 0 : index
    %91 = vector.load %arg4[%c0_38, %c0_39] : memref<128x384xbf16, #tpu.memory_space<vmem>>, vector<128x384xbf16>
    %cst_40 = arith.constant dense<0.000000e+00> : vector<16x384xf32>
    %92 = tpu.matmul %90, %91, %cst_40 {dimension_numbers = #tpu.dot_dimension_numbers<[1], [0], [0], [1], [0, 0, 1, 1], [], []>} : vector<16x128xbf16>, vector<128x384xbf16>, vector<16x384xf32> -> vector<16x384xf32>
    %c0_41 = arith.constant 0 : index
    %c0_42 = arith.constant 0 : index
    %93 = vector.load %arg5[%c0_41, %c0_42] : memref<1x384xf32, #tpu.memory_space<vmem>>, vector<1x384xf32>
    %94 = vector.broadcast %93 : vector<1x384xf32> to vector<16x384xf32>
    %95 = arith.addf %92, %94 : vector<16x384xf32>
    %96 = arith.index_cast %c2_i32 : i32 to index
    %c0_43 = arith.constant 0 : index
    %c0_44 = arith.constant 0 : index
    %97 = vector.load %arg1[%96, %c0_43, %c0_44] : memref<8x16x384xf32, #tpu.memory_space<vmem>>, vector<1x16x384xf32>
    %98 = vector.shape_cast %97 : vector<1x16x384xf32> to vector<16x384xf32>
    %c0_45 = arith.constant 0 : index
    %c0_46 = arith.constant 0 : index
    %99 = vector.load %arg2[%c0_45, %c0_46] : memref<16x384xf32, #tpu.memory_space<vmem>>, vector<16x384xf32>
    %100 = arith.addf %98, %99 : vector<16x384xf32>
    %101 = vector.extract_strided_slice %100 {offsets = [0, 0], sizes = [16, 128], strides = [1, 1]} : vector<16x384xf32> to vector<16x128xf32>
    %102 = vector.extract_strided_slice %95 {offsets = [0, 0], sizes = [16, 128], strides = [1, 1]} : vector<16x384xf32> to vector<16x128xf32>
    %103 = arith.addf %101, %102 : vector<16x128xf32>
    %104 = arith.negf %103 : vector<16x128xf32>
    %105 = math.exp %104 : vector<16x128xf32>
    %cst_47 = arith.constant 1.000000e+00 : f32
    %106 = vector.broadcast %cst_47 : f32 to vector<16x128xf32>
    %107 = arith.addf %106, %105 : vector<16x128xf32>
    %108 = arith.divf %106, %107 : vector<16x128xf32>
    %109 = vector.extract_strided_slice %100 {offsets = [0, 128], sizes = [16, 128], strides = [1, 1]} : vector<16x384xf32> to vector<16x128xf32>
    %110 = vector.extract_strided_slice %95 {offsets = [0, 128], sizes = [16, 128], strides = [1, 1]} : vector<16x384xf32> to vector<16x128xf32>
    %111 = arith.addf %109, %110 : vector<16x128xf32>
    %112 = arith.negf %111 : vector<16x128xf32>
    %113 = math.exp %112 : vector<16x128xf32>
    %cst_48 = arith.constant 1.000000e+00 : f32
    %114 = vector.broadcast %cst_48 : f32 to vector<16x128xf32>
    %115 = arith.addf %114, %113 : vector<16x128xf32>
    %116 = arith.divf %114, %115 : vector<16x128xf32>
    %117 = vector.extract_strided_slice %100 {offsets = [0, 256], sizes = [16, 128], strides = [1, 1]} : vector<16x384xf32> to vector<16x128xf32>
    %118 = vector.extract_strided_slice %95 {offsets = [0, 256], sizes = [16, 128], strides = [1, 1]} : vector<16x384xf32> to vector<16x128xf32>
    %119 = arith.mulf %108, %118 : vector<16x128xf32>
    %120 = arith.addf %117, %119 : vector<16x128xf32>
    %121 = math.tanh %120 : vector<16x128xf32>
    %cst_49 = arith.constant 1.000000e+00 : f32
    %122 = vector.broadcast %cst_49 : f32 to vector<16x128xf32>
    %123 = arith.subf %122, %116 : vector<16x128xf32>
    %124 = arith.mulf %123, %121 : vector<16x128xf32>
    %125 = arith.mulf %116, %89 : vector<16x128xf32>
    %126 = arith.addf %124, %125 : vector<16x128xf32>
    %c0_50 = arith.constant 0 : index
    %c0_51 = arith.constant 0 : index
    %127 = vector.load %arg7[%c0_50, %c0_51] : memref<16x128xf32, #tpu.memory_space<vmem>>, vector<16x128xf32>
    tpu.vector_store %arg7[%c0_50, %c0_51], %126 {strides = array<i32>} : memref<16x128xf32, #tpu.memory_space<vmem>>, vector<16x128xf32>,
    %128 = arith.index_cast %c2_i32 : i32 to index
    %c0_52 = arith.constant 0 : index
    %c0_53 = arith.constant 0 : index
    %129 = vector.load %arg6[%128, %c0_52, %c0_53] : memref<8x16x128xf32, #tpu.memory_space<vmem>>, vector<1x16x128xf32>
    %130 = vector.shape_cast %129 : vector<1x16x128xf32> to vector<16x128xf32>
    %131 = vector.shape_cast %126 : vector<16x128xf32> to vector<1x16x128xf32>
    tpu.vector_store %arg6[%128, %c0_52, %c0_53], %131 {strides = array<i32>} : memref<8x16x128xf32, #tpu.memory_space<vmem>>, vector<1x16x128xf32>,
    %c3_i32 = arith.constant 3 : i32
    %c0_54 = arith.constant 0 : index
    %c0_55 = arith.constant 0 : index
    %132 = vector.load %arg7[%c0_54, %c0_55] : memref<16x128xf32, #tpu.memory_space<vmem>>, vector<16x128xf32>
    %133 = arith.truncf %132 : vector<16x128xf32> to vector<16x128xbf16>
    %c0_56 = arith.constant 0 : index
    %c0_57 = arith.constant 0 : index
    %134 = vector.load %arg4[%c0_56, %c0_57] : memref<128x384xbf16, #tpu.memory_space<vmem>>, vector<128x384xbf16>
    %cst_58 = arith.constant dense<0.000000e+00> : vector<16x384xf32>
    %135 = tpu.matmul %133, %134, %cst_58 {dimension_numbers = #tpu.dot_dimension_numbers<[1], [0], [0], [1], [0, 0, 1, 1], [], []>} : vector<16x128xbf16>, vector<128x384xbf16>, vector<16x384xf32> -> vector<16x384xf32>
    %c0_59 = arith.constant 0 : index
    %c0_60 = arith.constant 0 : index
    %136 = vector.load %arg5[%c0_59, %c0_60] : memref<1x384xf32, #tpu.memory_space<vmem>>, vector<1x384xf32>
    %137 = vector.broadcast %136 : vector<1x384xf32> to vector<16x384xf32>
    %138 = arith.addf %135, %137 : vector<16x384xf32>
    %139 = arith.index_cast %c3_i32 : i32 to index
    %c0_61 = arith.constant 0 : index
    %c0_62 = arith.constant 0 : index
    %140 = vector.load %arg1[%139, %c0_61, %c0_62] : memref<8x16x384xf32, #tpu.memory_space<vmem>>, vector<1x16x384xf32>
    %141 = vector.shape_cast %140 : vector<1x16x384xf32> to vector<16x384xf32>
    %c0_63 = arith.constant 0 : index
    %c0_64 = arith.constant 0 : index
    %142 = vector.load %arg2[%c0_63, %c0_64] : memref<16x384xf32, #tpu.memory_space<vmem>>, vector<16x384xf32>
    %143 = arith.addf %141, %142 : vector<16x384xf32>
    %144 = vector.extract_strided_slice %143 {offsets = [0, 0], sizes = [16, 128], strides = [1, 1]} : vector<16x384xf32> to vector<16x128xf32>
    %145 = vector.extract_strided_slice %138 {offsets = [0, 0], sizes = [16, 128], strides = [1, 1]} : vector<16x384xf32> to vector<16x128xf32>
    %146 = arith.addf %144, %145 : vector<16x128xf32>
    %147 = arith.negf %146 : vector<16x128xf32>
    %148 = math.exp %147 : vector<16x128xf32>
    %cst_65 = arith.constant 1.000000e+00 : f32
    %149 = vector.broadcast %cst_65 : f32 to vector<16x128xf32>
    %150 = arith.addf %149, %148 : vector<16x128xf32>
    %151 = arith.divf %149, %150 : vector<16x128xf32>
    %152 = vector.extract_strided_slice %143 {offsets = [0, 128], sizes = [16, 128], strides = [1, 1]} : vector<16x384xf32> to vector<16x128xf32>
    %153 = vector.extract_strided_slice %138 {offsets = [0, 128], sizes = [16, 128], strides = [1, 1]} : vector<16x384xf32> to vector<16x128xf32>
    %154 = arith.addf %152, %153 : vector<16x128xf32>
    %155 = arith.negf %154 : vector<16x128xf32>
    %156 = math.exp %155 : vector<16x128xf32>
    %cst_66 = arith.constant 1.000000e+00 : f32
    %157 = vector.broadcast %cst_66 : f32 to vector<16x128xf32>
    %158 = arith.addf %157, %156 : vector<16x128xf32>
    %159 = arith.divf %157, %158 : vector<16x128xf32>
    %160 = vector.extract_strided_slice %143 {offsets = [0, 256], sizes = [16, 128], strides = [1, 1]} : vector<16x384xf32> to vector<16x128xf32>
    %161 = vector.extract_strided_slice %138 {offsets = [0, 256], sizes = [16, 128], strides = [1, 1]} : vector<16x384xf32> to vector<16x128xf32>
    %162 = arith.mulf %151, %161 : vector<16x128xf32>
    %163 = arith.addf %160, %162 : vector<16x128xf32>
    %164 = math.tanh %163 : vector<16x128xf32>
    %cst_67 = arith.constant 1.000000e+00 : f32
    %165 = vector.broadcast %cst_67 : f32 to vector<16x128xf32>
    %166 = arith.subf %165, %159 : vector<16x128xf32>
    %167 = arith.mulf %166, %164 : vector<16x128xf32>
    %168 = arith.mulf %159, %132 : vector<16x128xf32>
    %169 = arith.addf %167, %168 : vector<16x128xf32>
    %c0_68 = arith.constant 0 : index
    %c0_69 = arith.constant 0 : index
    %170 = vector.load %arg7[%c0_68, %c0_69] : memref<16x128xf32, #tpu.memory_space<vmem>>, vector<16x128xf32>
    tpu.vector_store %arg7[%c0_68, %c0_69], %169 {strides = array<i32>} : memref<16x128xf32, #tpu.memory_space<vmem>>, vector<16x128xf32>,
    %171 = arith.index_cast %c3_i32 : i32 to index
    %c0_70 = arith.constant 0 : index
    %c0_71 = arith.constant 0 : index
    %172 = vector.load %arg6[%171, %c0_70, %c0_71] : memref<8x16x128xf32, #tpu.memory_space<vmem>>, vector<1x16x128xf32>
    %173 = vector.shape_cast %172 : vector<1x16x128xf32> to vector<16x128xf32>
    %174 = vector.shape_cast %169 : vector<16x128xf32> to vector<1x16x128xf32>
    tpu.vector_store %arg6[%171, %c0_70, %c0_71], %174 {strides = array<i32>} : memref<8x16x128xf32, #tpu.memory_space<vmem>>, vector<1x16x128xf32>,
    %c4_i32 = arith.constant 4 : i32
    %c0_72 = arith.constant 0 : index
    %c0_73 = arith.constant 0 : index
    %175 = vector.load %arg7[%c0_72, %c0_73] : memref<16x128xf32, #tpu.memory_space<vmem>>, vector<16x128xf32>
    %176 = arith.truncf %175 : vector<16x128xf32> to vector<16x128xbf16>
    %c0_74 = arith.constant 0 : index
    %c0_75 = arith.constant 0 : index
    %177 = vector.load %arg4[%c0_74, %c0_75] : memref<128x384xbf16, #tpu.memory_space<vmem>>, vector<128x384xbf16>
    %cst_76 = arith.constant dense<0.000000e+00> : vector<16x384xf32>
    %178 = tpu.matmul %176, %177, %cst_76 {dimension_numbers = #tpu.dot_dimension_numbers<[1], [0], [0], [1], [0, 0, 1, 1], [], []>} : vector<16x128xbf16>, vector<128x384xbf16>, vector<16x384xf32> -> vector<16x384xf32>
    %c0_77 = arith.constant 0 : index
    %c0_78 = arith.constant 0 : index
    %179 = vector.load %arg5[%c0_77, %c0_78] : memref<1x384xf32, #tpu.memory_space<vmem>>, vector<1x384xf32>
    %180 = vector.broadcast %179 : vector<1x384xf32> to vector<16x384xf32>
    %181 = arith.addf %178, %180 : vector<16x384xf32>
    %182 = arith.index_cast %c4_i32 : i32 to index
    %c0_79 = arith.constant 0 : index
    %c0_80 = arith.constant 0 : index
    %183 = vector.load %arg1[%182, %c0_79, %c0_80] : memref<8x16x384xf32, #tpu.memory_space<vmem>>, vector<1x16x384xf32>
    %184 = vector.shape_cast %183 : vector<1x16x384xf32> to vector<16x384xf32>
    %c0_81 = arith.constant 0 : index
    %c0_82 = arith.constant 0 : index
    %185 = vector.load %arg2[%c0_81, %c0_82] : memref<16x384xf32, #tpu.memory_space<vmem>>, vector<16x384xf32>
    %186 = arith.addf %184, %185 : vector<16x384xf32>
    %187 = vector.extract_strided_slice %186 {offsets = [0, 0], sizes = [16, 128], strides = [1, 1]} : vector<16x384xf32> to vector<16x128xf32>
    %188 = vector.extract_strided_slice %181 {offsets = [0, 0], sizes = [16, 128], strides = [1, 1]} : vector<16x384xf32> to vector<16x128xf32>
    %189 = arith.addf %187, %188 : vector<16x128xf32>
    %190 = arith.negf %189 : vector<16x128xf32>
    %191 = math.exp %190 : vector<16x128xf32>
    %cst_83 = arith.constant 1.000000e+00 : f32
    %192 = vector.broadcast %cst_83 : f32 to vector<16x128xf32>
    %193 = arith.addf %192, %191 : vector<16x128xf32>
    %194 = arith.divf %192, %193 : vector<16x128xf32>
    %195 = vector.extract_strided_slice %186 {offsets = [0, 128], sizes = [16, 128], strides = [1, 1]} : vector<16x384xf32> to vector<16x128xf32>
    %196 = vector.extract_strided_slice %181 {offsets = [0, 128], sizes = [16, 128], strides = [1, 1]} : vector<16x384xf32> to vector<16x128xf32>
    %197 = arith.addf %195, %196 : vector<16x128xf32>
    %198 = arith.negf %197 : vector<16x128xf32>
    %199 = math.exp %198 : vector<16x128xf32>
    %cst_84 = arith.constant 1.000000e+00 : f32
    %200 = vector.broadcast %cst_84 : f32 to vector<16x128xf32>
    %201 = arith.addf %200, %199 : vector<16x128xf32>
    %202 = arith.divf %200, %201 : vector<16x128xf32>
    %203 = vector.extract_strided_slice %186 {offsets = [0, 256], sizes = [16, 128], strides = [1, 1]} : vector<16x384xf32> to vector<16x128xf32>
    %204 = vector.extract_strided_slice %181 {offsets = [0, 256], sizes = [16, 128], strides = [1, 1]} : vector<16x384xf32> to vector<16x128xf32>
    %205 = arith.mulf %194, %204 : vector<16x128xf32>
    %206 = arith.addf %203, %205 : vector<16x128xf32>
    %207 = math.tanh %206 : vector<16x128xf32>
    %cst_85 = arith.constant 1.000000e+00 : f32
    %208 = vector.broadcast %cst_85 : f32 to vector<16x128xf32>
    %209 = arith.subf %208, %202 : vector<16x128xf32>
    %210 = arith.mulf %209, %207 : vector<16x128xf32>
    %211 = arith.mulf %202, %175 : vector<16x128xf32>
    %212 = arith.addf %210, %211 : vector<16x128xf32>
    %c0_86 = arith.constant 0 : index
    %c0_87 = arith.constant 0 : index
    %213 = vector.load %arg7[%c0_86, %c0_87] : memref<16x128xf32, #tpu.memory_space<vmem>>, vector<16x128xf32>
    tpu.vector_store %arg7[%c0_86, %c0_87], %212 {strides = array<i32>} : memref<16x128xf32, #tpu.memory_space<vmem>>, vector<16x128xf32>,
    %214 = arith.index_cast %c4_i32 : i32 to index
    %c0_88 = arith.constant 0 : index
    %c0_89 = arith.constant 0 : index
    %215 = vector.load %arg6[%214, %c0_88, %c0_89] : memref<8x16x128xf32, #tpu.memory_space<vmem>>, vector<1x16x128xf32>
    %216 = vector.shape_cast %215 : vector<1x16x128xf32> to vector<16x128xf32>
    %217 = vector.shape_cast %212 : vector<16x128xf32> to vector<1x16x128xf32>
    tpu.vector_store %arg6[%214, %c0_88, %c0_89], %217 {strides = array<i32>} : memref<8x16x128xf32, #tpu.memory_space<vmem>>, vector<1x16x128xf32>,
    %c5_i32 = arith.constant 5 : i32
    %c0_90 = arith.constant 0 : index
    %c0_91 = arith.constant 0 : index
    %218 = vector.load %arg7[%c0_90, %c0_91] : memref<16x128xf32, #tpu.memory_space<vmem>>, vector<16x128xf32>
    %219 = arith.truncf %218 : vector<16x128xf32> to vector<16x128xbf16>
    %c0_92 = arith.constant 0 : index
    %c0_93 = arith.constant 0 : index
    %220 = vector.load %arg4[%c0_92, %c0_93] : memref<128x384xbf16, #tpu.memory_space<vmem>>, vector<128x384xbf16>
    %cst_94 = arith.constant dense<0.000000e+00> : vector<16x384xf32>
    %221 = tpu.matmul %219, %220, %cst_94 {dimension_numbers = #tpu.dot_dimension_numbers<[1], [0], [0], [1], [0, 0, 1, 1], [], []>} : vector<16x128xbf16>, vector<128x384xbf16>, vector<16x384xf32> -> vector<16x384xf32>
    %c0_95 = arith.constant 0 : index
    %c0_96 = arith.constant 0 : index
    %222 = vector.load %arg5[%c0_95, %c0_96] : memref<1x384xf32, #tpu.memory_space<vmem>>, vector<1x384xf32>
    %223 = vector.broadcast %222 : vector<1x384xf32> to vector<16x384xf32>
    %224 = arith.addf %221, %223 : vector<16x384xf32>
    %225 = arith.index_cast %c5_i32 : i32 to index
    %c0_97 = arith.constant 0 : index
    %c0_98 = arith.constant 0 : index
    %226 = vector.load %arg1[%225, %c0_97, %c0_98] : memref<8x16x384xf32, #tpu.memory_space<vmem>>, vector<1x16x384xf32>
    %227 = vector.shape_cast %226 : vector<1x16x384xf32> to vector<16x384xf32>
    %c0_99 = arith.constant 0 : index
    %c0_100 = arith.constant 0 : index
    %228 = vector.load %arg2[%c0_99, %c0_100] : memref<16x384xf32, #tpu.memory_space<vmem>>, vector<16x384xf32>
    %229 = arith.addf %227, %228 : vector<16x384xf32>
    %230 = vector.extract_strided_slice %229 {offsets = [0, 0], sizes = [16, 128], strides = [1, 1]} : vector<16x384xf32> to vector<16x128xf32>
    %231 = vector.extract_strided_slice %224 {offsets = [0, 0], sizes = [16, 128], strides = [1, 1]} : vector<16x384xf32> to vector<16x128xf32>
    %232 = arith.addf %230, %231 : vector<16x128xf32>
    %233 = arith.negf %232 : vector<16x128xf32>
    %234 = math.exp %233 : vector<16x128xf32>
    %cst_101 = arith.constant 1.000000e+00 : f32
    %235 = vector.broadcast %cst_101 : f32 to vector<16x128xf32>
    %236 = arith.addf %235, %234 : vector<16x128xf32>
    %237 = arith.divf %235, %236 : vector<16x128xf32>
    %238 = vector.extract_strided_slice %229 {offsets = [0, 128], sizes = [16, 128], strides = [1, 1]} : vector<16x384xf32> to vector<16x128xf32>
    %239 = vector.extract_strided_slice %224 {offsets = [0, 128], sizes = [16, 128], strides = [1, 1]} : vector<16x384xf32> to vector<16x128xf32>
    %240 = arith.addf %238, %239 : vector<16x128xf32>
    %241 = arith.negf %240 : vector<16x128xf32>
    %242 = math.exp %241 : vector<16x128xf32>
    %cst_102 = arith.constant 1.000000e+00 : f32
    %243 = vector.broadcast %cst_102 : f32 to vector<16x128xf32>
    %244 = arith.addf %243, %242 : vector<16x128xf32>
    %245 = arith.divf %243, %244 : vector<16x128xf32>
    %246 = vector.extract_strided_slice %229 {offsets = [0, 256], sizes = [16, 128], strides = [1, 1]} : vector<16x384xf32> to vector<16x128xf32>
    %247 = vector.extract_strided_slice %224 {offsets = [0, 256], sizes = [16, 128], strides = [1, 1]} : vector<16x384xf32> to vector<16x128xf32>
    %248 = arith.mulf %237, %247 : vector<16x128xf32>
    %249 = arith.addf %246, %248 : vector<16x128xf32>
    %250 = math.tanh %249 : vector<16x128xf32>
    %cst_103 = arith.constant 1.000000e+00 : f32
    %251 = vector.broadcast %cst_103 : f32 to vector<16x128xf32>
    %252 = arith.subf %251, %245 : vector<16x128xf32>
    %253 = arith.mulf %252, %250 : vector<16x128xf32>
    %254 = arith.mulf %245, %218 : vector<16x128xf32>
    %255 = arith.addf %253, %254 : vector<16x128xf32>
    %c0_104 = arith.constant 0 : index
    %c0_105 = arith.constant 0 : index
    %256 = vector.load %arg7[%c0_104, %c0_105] : memref<16x128xf32, #tpu.memory_space<vmem>>, vector<16x128xf32>
    tpu.vector_store %arg7[%c0_104, %c0_105], %255 {strides = array<i32>} : memref<16x128xf32, #tpu.memory_space<vmem>>, vector<16x128xf32>,
    %257 = arith.index_cast %c5_i32 : i32 to index
    %c0_106 = arith.constant 0 : index
    %c0_107 = arith.constant 0 : index
    %258 = vector.load %arg6[%257, %c0_106, %c0_107] : memref<8x16x128xf32, #tpu.memory_space<vmem>>, vector<1x16x128xf32>
    %259 = vector.shape_cast %258 : vector<1x16x128xf32> to vector<16x128xf32>
    %260 = vector.shape_cast %255 : vector<16x128xf32> to vector<1x16x128xf32>
    tpu.vector_store %arg6[%257, %c0_106, %c0_107], %260 {strides = array<i32>} : memref<8x16x128xf32, #tpu.memory_space<vmem>>, vector<1x16x128xf32>,
    %c6_i32 = arith.constant 6 : i32
    %c0_108 = arith.constant 0 : index
    %c0_109 = arith.constant 0 : index
    %261 = vector.load %arg7[%c0_108, %c0_109] : memref<16x128xf32, #tpu.memory_space<vmem>>, vector<16x128xf32>
    %262 = arith.truncf %261 : vector<16x128xf32> to vector<16x128xbf16>
    %c0_110 = arith.constant 0 : index
    %c0_111 = arith.constant 0 : index
    %263 = vector.load %arg4[%c0_110, %c0_111] : memref<128x384xbf16, #tpu.memory_space<vmem>>, vector<128x384xbf16>
    %cst_112 = arith.constant dense<0.000000e+00> : vector<16x384xf32>
    %264 = tpu.matmul %262, %263, %cst_112 {dimension_numbers = #tpu.dot_dimension_numbers<[1], [0], [0], [1], [0, 0, 1, 1], [], []>} : vector<16x128xbf16>, vector<128x384xbf16>, vector<16x384xf32> -> vector<16x384xf32>
    %c0_113 = arith.constant 0 : index
    %c0_114 = arith.constant 0 : index
    %265 = vector.load %arg5[%c0_113, %c0_114] : memref<1x384xf32, #tpu.memory_space<vmem>>, vector<1x384xf32>
    %266 = vector.broadcast %265 : vector<1x384xf32> to vector<16x384xf32>
    %267 = arith.addf %264, %266 : vector<16x384xf32>
    %268 = arith.index_cast %c6_i32 : i32 to index
    %c0_115 = arith.constant 0 : index
    %c0_116 = arith.constant 0 : index
    %269 = vector.load %arg1[%268, %c0_115, %c0_116] : memref<8x16x384xf32, #tpu.memory_space<vmem>>, vector<1x16x384xf32>
    %270 = vector.shape_cast %269 : vector<1x16x384xf32> to vector<16x384xf32>
    %c0_117 = arith.constant 0 : index
    %c0_118 = arith.constant 0 : index
    %271 = vector.load %arg2[%c0_117, %c0_118] : memref<16x384xf32, #tpu.memory_space<vmem>>, vector<16x384xf32>
    %272 = arith.addf %270, %271 : vector<16x384xf32>
    %273 = vector.extract_strided_slice %272 {offsets = [0, 0], sizes = [16, 128], strides = [1, 1]} : vector<16x384xf32> to vector<16x128xf32>
    %274 = vector.extract_strided_slice %267 {offsets = [0, 0], sizes = [16, 128], strides = [1, 1]} : vector<16x384xf32> to vector<16x128xf32>
    %275 = arith.addf %273, %274 : vector<16x128xf32>
    %276 = arith.negf %275 : vector<16x128xf32>
    %277 = math.exp %276 : vector<16x128xf32>
    %cst_119 = arith.constant 1.000000e+00 : f32
    %278 = vector.broadcast %cst_119 : f32 to vector<16x128xf32>
    %279 = arith.addf %278, %277 : vector<16x128xf32>
    %280 = arith.divf %278, %279 : vector<16x128xf32>
    %281 = vector.extract_strided_slice %272 {offsets = [0, 128], sizes = [16, 128], strides = [1, 1]} : vector<16x384xf32> to vector<16x128xf32>
    %282 = vector.extract_strided_slice %267 {offsets = [0, 128], sizes = [16, 128], strides = [1, 1]} : vector<16x384xf32> to vector<16x128xf32>
    %283 = arith.addf %281, %282 : vector<16x128xf32>
    %284 = arith.negf %283 : vector<16x128xf32>
    %285 = math.exp %284 : vector<16x128xf32>
    %cst_120 = arith.constant 1.000000e+00 : f32
    %286 = vector.broadcast %cst_120 : f32 to vector<16x128xf32>
    %287 = arith.addf %286, %285 : vector<16x128xf32>
    %288 = arith.divf %286, %287 : vector<16x128xf32>
    %289 = vector.extract_strided_slice %272 {offsets = [0, 256], sizes = [16, 128], strides = [1, 1]} : vector<16x384xf32> to vector<16x128xf32>
    %290 = vector.extract_strided_slice %267 {offsets = [0, 256], sizes = [16, 128], strides = [1, 1]} : vector<16x384xf32> to vector<16x128xf32>
    %291 = arith.mulf %280, %290 : vector<16x128xf32>
    %292 = arith.addf %289, %291 : vector<16x128xf32>
    %293 = math.tanh %292 : vector<16x128xf32>
    %cst_121 = arith.constant 1.000000e+00 : f32
    %294 = vector.broadcast %cst_121 : f32 to vector<16x128xf32>
    %295 = arith.subf %294, %288 : vector<16x128xf32>
    %296 = arith.mulf %295, %293 : vector<16x128xf32>
    %297 = arith.mulf %288, %261 : vector<16x128xf32>
    %298 = arith.addf %296, %297 : vector<16x128xf32>
    %c0_122 = arith.constant 0 : index
    %c0_123 = arith.constant 0 : index
    %299 = vector.load %arg7[%c0_122, %c0_123] : memref<16x128xf32, #tpu.memory_space<vmem>>, vector<16x128xf32>
    tpu.vector_store %arg7[%c0_122, %c0_123], %298 {strides = array<i32>} : memref<16x128xf32, #tpu.memory_space<vmem>>, vector<16x128xf32>,
    %300 = arith.index_cast %c6_i32 : i32 to index
    %c0_124 = arith.constant 0 : index
    %c0_125 = arith.constant 0 : index
    %301 = vector.load %arg6[%300, %c0_124, %c0_125] : memref<8x16x128xf32, #tpu.memory_space<vmem>>, vector<1x16x128xf32>
    %302 = vector.shape_cast %301 : vector<1x16x128xf32> to vector<16x128xf32>
    %303 = vector.shape_cast %298 : vector<16x128xf32> to vector<1x16x128xf32>
    tpu.vector_store %arg6[%300, %c0_124, %c0_125], %303 {strides = array<i32>} : memref<8x16x128xf32, #tpu.memory_space<vmem>>, vector<1x16x128xf32>,
    %c7_i32 = arith.constant 7 : i32
    %c0_126 = arith.constant 0 : index
    %c0_127 = arith.constant 0 : index
    %304 = vector.load %arg7[%c0_126, %c0_127] : memref<16x128xf32, #tpu.memory_space<vmem>>, vector<16x128xf32>
    %305 = arith.truncf %304 : vector<16x128xf32> to vector<16x128xbf16>
    %c0_128 = arith.constant 0 : index
    %c0_129 = arith.constant 0 : index
    %306 = vector.load %arg4[%c0_128, %c0_129] : memref<128x384xbf16, #tpu.memory_space<vmem>>, vector<128x384xbf16>
    %cst_130 = arith.constant dense<0.000000e+00> : vector<16x384xf32>
    %307 = tpu.matmul %305, %306, %cst_130 {dimension_numbers = #tpu.dot_dimension_numbers<[1], [0], [0], [1], [0, 0, 1, 1], [], []>} : vector<16x128xbf16>, vector<128x384xbf16>, vector<16x384xf32> -> vector<16x384xf32>
    %c0_131 = arith.constant 0 : index
    %c0_132 = arith.constant 0 : index
    %308 = vector.load %arg5[%c0_131, %c0_132] : memref<1x384xf32, #tpu.memory_space<vmem>>, vector<1x384xf32>
    %309 = vector.broadcast %308 : vector<1x384xf32> to vector<16x384xf32>
    %310 = arith.addf %307, %309 : vector<16x384xf32>
    %311 = arith.index_cast %c7_i32 : i32 to index
    %c0_133 = arith.constant 0 : index
    %c0_134 = arith.constant 0 : index
    %312 = vector.load %arg1[%311, %c0_133, %c0_134] : memref<8x16x384xf32, #tpu.memory_space<vmem>>, vector<1x16x384xf32>
    %313 = vector.shape_cast %312 : vector<1x16x384xf32> to vector<16x384xf32>
    %c0_135 = arith.constant 0 : index
    %c0_136 = arith.constant 0 : index
    %314 = vector.load %arg2[%c0_135, %c0_136] : memref<16x384xf32, #tpu.memory_space<vmem>>, vector<16x384xf32>
    %315 = arith.addf %313, %314 : vector<16x384xf32>
    %316 = vector.extract_strided_slice %315 {offsets = [0, 0], sizes = [16, 128], strides = [1, 1]} : vector<16x384xf32> to vector<16x128xf32>
    %317 = vector.extract_strided_slice %310 {offsets = [0, 0], sizes = [16, 128], strides = [1, 1]} : vector<16x384xf32> to vector<16x128xf32>
    %318 = arith.addf %316, %317 : vector<16x128xf32>
    %319 = arith.negf %318 : vector<16x128xf32>
    %320 = math.exp %319 : vector<16x128xf32>
    %cst_137 = arith.constant 1.000000e+00 : f32
    %321 = vector.broadcast %cst_137 : f32 to vector<16x128xf32>
    %322 = arith.addf %321, %320 : vector<16x128xf32>
    %323 = arith.divf %321, %322 : vector<16x128xf32>
    %324 = vector.extract_strided_slice %315 {offsets = [0, 128], sizes = [16, 128], strides = [1, 1]} : vector<16x384xf32> to vector<16x128xf32>
    %325 = vector.extract_strided_slice %310 {offsets = [0, 128], sizes = [16, 128], strides = [1, 1]} : vector<16x384xf32> to vector<16x128xf32>
    %326 = arith.addf %324, %325 : vector<16x128xf32>
    %327 = arith.negf %326 : vector<16x128xf32>
    %328 = math.exp %327 : vector<16x128xf32>
    %cst_138 = arith.constant 1.000000e+00 : f32
    %329 = vector.broadcast %cst_138 : f32 to vector<16x128xf32>
    %330 = arith.addf %329, %328 : vector<16x128xf32>
    %331 = arith.divf %329, %330 : vector<16x128xf32>
    %332 = vector.extract_strided_slice %315 {offsets = [0, 256], sizes = [16, 128], strides = [1, 1]} : vector<16x384xf32> to vector<16x128xf32>
    %333 = vector.extract_strided_slice %310 {offsets = [0, 256], sizes = [16, 128], strides = [1, 1]} : vector<16x384xf32> to vector<16x128xf32>
    %334 = arith.mulf %323, %333 : vector<16x128xf32>
    %335 = arith.addf %332, %334 : vector<16x128xf32>
    %336 = math.tanh %335 : vector<16x128xf32>
    %cst_139 = arith.constant 1.000000e+00 : f32
    %337 = vector.broadcast %cst_139 : f32 to vector<16x128xf32>
    %338 = arith.subf %337, %331 : vector<16x128xf32>
    %339 = arith.mulf %338, %336 : vector<16x128xf32>
    %340 = arith.mulf %331, %304 : vector<16x128xf32>
    %341 = arith.addf %339, %340 : vector<16x128xf32>
    %c0_140 = arith.constant 0 : index
    %c0_141 = arith.constant 0 : index
    %342 = vector.load %arg7[%c0_140, %c0_141] : memref<16x128xf32, #tpu.memory_space<vmem>>, vector<16x128xf32>
    tpu.vector_store %arg7[%c0_140, %c0_141], %341 {strides = array<i32>} : memref<16x128xf32, #tpu.memory_space<vmem>>, vector<16x128xf32>,
    %343 = arith.index_cast %c7_i32 : i32 to index
    %c0_142 = arith.constant 0 : index
    %c0_143 = arith.constant 0 : index
    %344 = vector.load %arg6[%343, %c0_142, %c0_143] : memref<8x16x128xf32, #tpu.memory_space<vmem>>, vector<1x16x128xf32>
    %345 = vector.shape_cast %344 : vector<1x16x128xf32> to vector<16x128xf32>
    %346 = vector.shape_cast %341 : vector<16x128xf32> to vector<1x16x128xf32>
    tpu.vector_store %arg6[%343, %c0_142, %c0_143], %346 {strides = array<i32>} : memref<8x16x128xf32, #tpu.memory_space<vmem>>, vector<1x16x128xf32>,
    %c8_i32 = arith.constant 8 : i32
    return
  }
  func.func @transform_0(%arg0: i32) -> (i32, i32, i32) {
    %c0_i32 = arith.constant 0 : i32
    %c0_i32_0 = arith.constant 0 : i32
    %c0_i32_1 = arith.constant 0 : i32
    return %arg0, %c0_i32, %c0_i32_0 : i32, i32, i32
  }
  func.func @transform_1(%arg0: i32) -> (i32, i32) {
    %c0_i32 = arith.constant 0 : i32
    %c0_i32_0 = arith.constant 0 : i32
    %c0_i32_1 = arith.constant 0 : i32
    return %c0_i32, %c0_i32_0 : i32, i32
  }
  func.func @transform_2(%arg0: i32) -> (i32, i32) {
    %c0_i32 = arith.constant 0 : i32
    %c0_i32_0 = arith.constant 0 : i32
    %c0_i32_1 = arith.constant 0 : i32
    return %c0_i32, %c0_i32_0 : i32, i32
  }
  func.func @transform_3(%arg0: i32) -> (i32, i32) {
    %c0_i32 = arith.constant 0 : i32
    %c0_i32_0 = arith.constant 0 : i32
    %c0_i32_1 = arith.constant 0 : i32
    return %c0_i32, %c0_i32_0 : i32, i32
  }
  func.func @transform_4(%arg0: i32) -> (i32, i32) {
    %c0_i32 = arith.constant 0 : i32
    %c0_i32_0 = arith.constant 0 : i32
    %c0_i32_1 = arith.constant 0 : i32
    return %c0_i32, %c0_i32_0 : i32, i32
  }
  func.func @transform_5(%arg0: i32) -> (i32, i32, i32) {
    %c0_i32 = arith.constant 0 : i32
    %c0_i32_0 = arith.constant 0 : i32
    %c0_i32_1 = arith.constant 0 : i32
    return %arg0, %c0_i32, %c0_i32_0 : i32, i32, i32
  }
}

module attributes {stable_mosaic.version = 11 : i64} {
  func.func @_matmul_bias_kernel(%arg0: i32, %arg1: i32, %arg2: i32, %arg3: memref<128x128xbf16, #tpu.memory_space<vmem>>, %arg4: memref<128x128xbf16, #tpu.memory_space<vmem>>, %arg5: memref<1x128xf32, #tpu.memory_space<vmem>>, %arg6: memref<128x128xf32, #tpu.memory_space<vmem>>, %arg7: memref<128x128xf32, #tpu.memory_space<vmem>>) attributes {dimension_semantics = [#tpu.dimension_semantics<parallel>, #tpu.dimension_semantics<parallel>, #tpu.dimension_semantics<arbitrary>], iteration_bounds = array<i64: 1, 1, 1>, scalar_prefetch = 0 : i64, scratch_operands = 1 : i64, tpu.core_type = #tpu.core_type<tc>, window_params = [{transform_indices = @transform_0, window_bounds = array<i64: 128, 128>}, {transform_indices = @transform_1, window_bounds = array<i64: 128, 128>}, {transform_indices = @transform_2, window_bounds = array<i64: 1, 128>}, {transform_indices = @transform_3, window_bounds = array<i64: 128, 128>}]} {
    %c0_i32 = arith.constant 0 : i32
    %0 = arith.cmpi eq, %arg2, %c0_i32 : i32
    %1 = arith.extui %0 : i1 to i32
    %c0_i32_0 = arith.constant 0 : i32
    %2 = arith.cmpi ne, %1, %c0_i32_0 : i32
    scf.if %2 {
      %cst_10 = arith.constant 0.000000e+00 : f32
      %12 = vector.broadcast %cst_10 : f32 to vector<128x128xf32>
      %c0_11 = arith.constant 0 : index
      %c0_12 = arith.constant 0 : index
      %13 = vector.load %arg7[%c0_11, %c0_12] : memref<128x128xf32, #tpu.memory_space<vmem>>, vector<128x128xf32>
      tpu.vector_store %arg7[%c0_11, %c0_12], %12 {strides = array<i32>} : memref<128x128xf32, #tpu.memory_space<vmem>>, vector<128x128xf32>,
    } else {
    }
    %c0 = arith.constant 0 : index
    %c0_1 = arith.constant 0 : index
    %3 = vector.load %arg7[%c0, %c0_1] : memref<128x128xf32, #tpu.memory_space<vmem>>, vector<128x128xf32>
    %c0_2 = arith.constant 0 : index
    %c0_3 = arith.constant 0 : index
    %4 = vector.load %arg3[%c0_2, %c0_3] : memref<128x128xbf16, #tpu.memory_space<vmem>>, vector<128x128xbf16>
    %c0_4 = arith.constant 0 : index
    %c0_5 = arith.constant 0 : index
    %5 = vector.load %arg4[%c0_4, %c0_5] : memref<128x128xbf16, #tpu.memory_space<vmem>>, vector<128x128xbf16>
    %cst = arith.constant dense<0.000000e+00> : vector<128x128xf32>
    %6 = tpu.matmul %4, %5, %cst {dimension_numbers = #tpu.dot_dimension_numbers<[1], [0], [0], [1], [0, 0, 1, 1], [], []>} : vector<128x128xbf16>, vector<128x128xbf16>, vector<128x128xf32> -> vector<128x128xf32>
    %7 = arith.addf %3, %6 : vector<128x128xf32>
    %c0_6 = arith.constant 0 : index
    %c0_7 = arith.constant 0 : index
    %8 = vector.load %arg7[%c0_6, %c0_7] : memref<128x128xf32, #tpu.memory_space<vmem>>, vector<128x128xf32>
    tpu.vector_store %arg7[%c0_6, %c0_7], %7 {strides = array<i32>} : memref<128x128xf32, #tpu.memory_space<vmem>>, vector<128x128xf32>,
    %c0_i32_8 = arith.constant 0 : i32
    %9 = arith.cmpi eq, %arg2, %c0_i32_8 : i32
    %10 = arith.extui %9 : i1 to i32
    %c0_i32_9 = arith.constant 0 : i32
    %11 = arith.cmpi ne, %10, %c0_i32_9 : i32
    scf.if %11 {
      %c0_10 = arith.constant 0 : index
      %c0_11 = arith.constant 0 : index
      %12 = vector.load %arg7[%c0_10, %c0_11] : memref<128x128xf32, #tpu.memory_space<vmem>>, vector<128x128xf32>
      %c0_12 = arith.constant 0 : index
      %c0_13 = arith.constant 0 : index
      %13 = vector.load %arg5[%c0_12, %c0_13] : memref<1x128xf32, #tpu.memory_space<vmem>>, vector<1x128xf32>
      %14 = vector.broadcast %13 : vector<1x128xf32> to vector<128x128xf32>
      %15 = arith.addf %12, %14 : vector<128x128xf32>
      %c0_14 = arith.constant 0 : index
      %c0_15 = arith.constant 0 : index
      %16 = vector.load %arg6[%c0_14, %c0_15] : memref<128x128xf32, #tpu.memory_space<vmem>>, vector<128x128xf32>
      tpu.vector_store %arg6[%c0_14, %c0_15], %15 {strides = array<i32>} : memref<128x128xf32, #tpu.memory_space<vmem>>, vector<128x128xf32>,
    } else {
    }
    return
  }
  func.func @transform_0(%arg0: i32, %arg1: i32, %arg2: i32) -> (i32, i32) {
    %c0_i32 = arith.constant 0 : i32
    return %arg0, %arg2 : i32, i32
  }
  func.func @transform_1(%arg0: i32, %arg1: i32, %arg2: i32) -> (i32, i32) {
    %c0_i32 = arith.constant 0 : i32
    return %arg2, %arg1 : i32, i32
  }
  func.func @transform_2(%arg0: i32, %arg1: i32, %arg2: i32) -> (i32, i32) {
    %c0_i32 = arith.constant 0 : i32
    %c0_i32_0 = arith.constant 0 : i32
    return %c0_i32, %arg1 : i32, i32
  }
  func.func @transform_3(%arg0: i32, %arg1: i32, %arg2: i32) -> (i32, i32) {
    %c0_i32 = arith.constant 0 : i32
    return %arg0, %arg1 : i32, i32
  }
}

</mosaic_0001>

<bundles_post_ra>
// kernel: encoder_decoder_forward.14
= control target key start
LH: loop header
LB: loop body
LE: loop exit
PB: predicated region body
PF: predicated region fallthrough
CT: control target
= control target key end

     0   :  { %s796_s12 = smov 0   ;;  %s798_s13 = smov 0   ;;  %s898_s0 = inlined_call_operand.vmem [shape: bf16[16,128], index: 0, kind: input, shape index: {}]   ;;  %s899_s1 = inlined_call_operand.vmem [shape: bf16[128,384], index: 1, kind: input, shape index: {}]   ;;  %s900_s2 = inlined_call_operand.vmem [shape: f32[1,384], index: 2, kind: input, shape index: {}]   ;;  %s901_s3 = inlined_call_operand.vmem [shape: f32[16,384], index: 3, kind: output, shape index: {}]  }
   0x1   :  { %s800_s14 = smov 0   ;;  %s802_s15 = smov 0  }
   0x2   :  { %s804_s16 = smov 0  }
   0x3 LB: > { %s28_s17 = sadd.s32 1, %s768_s15  ;;  %s630_s18 = sadd.s32 4294967295, %s772_s16   ;;  %s772_s16 = sphi %s804_s16, %s13_s16   ;;  %s768_s15 = sphi %s802_s15, %s906_s15   ;;  %s764_s14 = sphi %s800_s14, %s905_s14   ;;  %s760_s13 = sphi %s798_s13, %s904_s13   ;;  %s756_s12 = sphi %s796_s12, %s903_s12  }
   0x4   : > { %p30_p0 = scmp.ge.s32.totalorder %s28_s17, 3  ;;  %p76_p1 = scmp.ne.s32.totalorder %s760_s13, %s756_s12 }
   0x5   : > { %p77_p2 = scmp.eq.s32.totalorder %s772_s16, 0  ;;  %p134_p4 = scmp.eq.s32.totalorder %s630_s18, 2 }
   0x6   : > { %s908_s17 = smov (%p30_p0, %s28_s17), 0  ;;  %s69_s20 = sadd.s32 1, %s760_s13 }
   0x7   : > { %p78_p3 = por %p77_p2, %p76_p1  ;;  %s65_s19 = ssub.s32 %s768_s15, %s908_s17 }
   0x8   : > { %p67_p5 = scmp.eq.s32.totalorder %s65_s19, 0  ;;  %p831_p6 = por %p134_p4, %p76_p1 }
   0x9   : > { %p634_p7 = scmp.ge.s32.totalorder %s772_s16, 3 }
   0xa   : > { %s836_s22 = scalar_select %p67_p5, %s760_s13, %s69_s20  }
   0xb   : > { %168 = sbr.rel (%p634_p7) target bundleno = 32 (0x20), region = 20 }
  0x12   : > { %171 = sbr.rel (!%p78_p3) target bundleno = 32 (0x20), region = 24  ;;  %s173_s23 = sand.u32 (%p78_p3), 1, %s760_s13  }
  0x13   : > { %s636_s24 = sshll.u32 (%p78_p3), %s768_s15, 2  ;;  %s635_s25 = sshll.u32 (%p78_p3), %s173_s23, 6 }
  0x14   : > { %s844_s28 = scalar_lea.vmem (%p78_p3), %s899_s1, %s636_s24  ;;  %s175_s29 = scalar_lea.vmem (%p78_p3), [#allocation3], %s635_s25 }
  0x15   : > { %v196_v0 = vld [vmem:[%s844_s28] sm:$0xf] (%p78_p3)  ;;  %v198_v1 = vld [vmem:[%s844_s28 + $0xc] sm:$0xf] (%p78_p3)  ;;  %v200_v2 = vld [vmem:[%s844_s28 + $0x18] sm:$0xf] (%p78_p3) }
  0x16   : > { %197 = vst [vmem:[%s175_s29] sm:$0xf] (%p78_p3), %v196_v0  ;;  %199 = vst [vmem:[%s175_s29 + $0x4] sm:$0xf] (%p78_p3), %v198_v1  ;;  %v202_v3 = vld [vmem:[%s844_s28 + $0x24] sm:$0xf] (%p78_p3) }
  0x17   : > { %v204_v4 = vld [vmem:[%s844_s28 + $0x30] sm:$0xf] (%p78_p3)  ;;  %201 = vst [vmem:[%s175_s29 + $0x8] sm:$0xf] (%p78_p3), %v200_v2  ;;  %203 = vst [vmem:[%s175_s29 + $0xc] sm:$0xf] (%p78_p3), %v202_v3 }
  0x18   : > { %205 = vst [vmem:[%s175_s29 + $0x10] sm:$0xf] (%p78_p3), %v204_v4  ;;  %v206_v5 = vld [vmem:[%s844_s28 + $0x3c] sm:$0xf] (%p78_p3)  ;;  %v208_v6 = vld [vmem:[%s844_s28 + $0x48] sm:$0xf] (%p78_p3) }
  0x19   : > { %v210_v7 = vld [vmem:[%s844_s28 + $0x54] sm:$0xf]  ;;  %207 = vst [vmem:[%s175_s29 + $0x14] sm:$0xf] %v206_v5  ;;  %209 = vst [vmem:[%s175_s29 + $0x18] sm:$0xf] %v208_v6 }
  0x1a   : > { %211 = vst [vmem:[%s175_s29 + $0x1c] sm:$0xf] %v210_v7  ;;  %v212_v8 = vld [vmem:[%s844_s28 + $0x60] sm:$0xf]  ;;  %v214_v9 = vld [vmem:[%s844_s28 + $0x6c] sm:$0xf] }
  0x1b   : > { %v216_v10 = vld [vmem:[%s844_s28 + $0x78] sm:$0xf]  ;;  %213 = vst [vmem:[%s175_s29 + $0x20] sm:$0xf] %v212_v8  ;;  %215 = vst [vmem:[%s175_s29 + $0x24] sm:$0xf] %v214_v9 }
  0x1c   : > { %217 = vst [vmem:[%s175_s29 + $0x28] sm:$0xf] %v216_v10  ;;  %v218_v11 = vld [vmem:[%s844_s28 + $0x84] sm:$0xf]  ;;  %v220_v12 = vld [vmem:[%s844_s28 + $0x90] sm:$0xf] }
  0x1d   : > { %v222_v13 = vld [vmem:[%s844_s28 + $0x9c] sm:$0xf]  ;;  %219 = vst [vmem:[%s175_s29 + $0x2c] sm:$0xf] %v218_v11  ;;  %221 = vst [vmem:[%s175_s29 + $0x30] sm:$0xf] %v220_v12 }
  0x1e   : > { %223 = vst [vmem:[%s175_s29 + $0x34] sm:$0xf] %v222_v13  ;;  %v224_v14 = vld [vmem:[%s844_s28 + $0xa8] sm:$0xf]  ;;  %v226_v15 = vld [vmem:[%s844_s28 + $0xb4] sm:$0xf] }
  0x1f   : > { %225 = vst [vmem:[%s175_s29 + $0x38] sm:$0xf] %v224_v14  ;;  %227 = vst [vmem:[%s175_s29 + $0x3c] sm:$0xf] %v226_v15 }
  0x20 PF: > { %p637_p8 = scmp.ge.s32.totalorder %s772_s16, 1  ;;  %p287_p9 = scmp.lt.s32.totalorder %s772_s16, 4 }
  0x22   : > { %p288_p10 = pnand %p637_p8, %p287_p9 }
  0x23   : > { %s294_s30 = sand.u32 (!%p288_p10), 1, %s756_s12   ;;  %v774_v16 = vmov (!%p288_p10), 0.0   ;;  %vm775_vm0 = vmmov (!%p288_p10), 0   ;;  %v733_v25 = vld [vmem:[%s898_s0] sm:$0xff] (!%p288_p10)   ;;  %p337_p11 = scmp.lt.s32.totalorder (!%p288_p10), %s764_s14, 2 }
  0x24   : > { %291 = sbr.rel (%p288_p10) target bundleno = 295 (0x127), region = 69  ;;  %663 = vmatprep.subr.bf16.mxu0 (!%p288_p10), %v774_v16  ;;  %s638_s4 = sshll.u32 (!%p288_p10), %s294_s30, 6  ;;  %679 = vmatprep.mubr.msk.bf16.mxu0 (!%p288_p10), %vm775_vm0, %v774_v16 }
  0x25   : > { %s296_s5 = scalar_lea.vmem (!%p288_p10), [#allocation3], %s638_s4  ;;  %s639_s18 = sshll.u32 (!%p288_p10), %s294_s30, 4 }
  0x26   : > { %v725_v17 = vld [vmem:[%s296_s5] sm:$0xff] (!%p288_p10)   ;;  %v726_v18 = vld [vmem:[%s296_s5 + $0x8] sm:$0xff] (!%p288_p10)   ;;  %v727_v19 = vld [vmem:[%s296_s5 + $0x10] sm:$0xff] (!%p288_p10)   ;;  %s326_s19 = scalar_lea.vmem (!%p288_p10), [#allocation4], %s639_s18 }
  0x27   : > { %664 = vmatpush3.bf16.msra.mxu0 (!%p288_p10), %v725_v17  ;;  %v728_v20 = vld [vmem:[%s296_s5 + $0x18] sm:$0xff] (!%p288_p10)   ;;  %v729_v21 = vld [vmem:[%s296_s5 + $0x20] sm:$0xff] (!%p288_p10)   ;;  %v730_v22 = vld [vmem:[%s296_s5 + $0x28] sm:$0xff] (!%p288_p10)  }
  0x28   : > { %665 = vmatprep.subr.bf16.mxu0 (!%p288_p10), %v774_v16  ;;  %v731_v23 = vld [vmem:[%s296_s5 + $0x30] sm:$0xff] (!%p288_p10)   ;;  %v732_v24 = vld [vmem:[%s296_s5 + $0x38] sm:$0xff] (!%p288_p10)  }
  0x2b   : > { %666 = vmatpush3.bf16.msra.mxu0 %v726_v18  ;;  %s338_s8 = scalar_select %p337_p11, %s764_s14, 2 }
  0x2c   : > { %667 = vmatprep.subr.bf16.mxu0 %v774_v16  ;;  %s651_s20 = sshll.u32 (%p831_p6), %s764_s14, 3 }
  0x2d   : > { %s339_s11 = scalar_lea.vmem %s900_s2, %s338_s8  ;;  %s494_s24 = scalar_lea.vmem (%p831_p6), %s901_s3, %s651_s20 }
  0x2e   : > { %v649_v26 = vld [vmem:[%s339_s11] ss:$0 sm:$0xff] }
  0x2f   : > { %668 = vmatpush3.bf16.msra.mxu0 %v727_v19 }
  0x30   : > { %669 = vmatprep.subr.bf16.mxu0 %v774_v16 }
  0x33   : > { %670 = vmatpush3.bf16.msra.mxu0 %v728_v20 }
  0x34   : > { %671 = vmatprep.subr.bf16.mxu0 %v774_v16 }
  0x37   : > { %672 = vmatpush3.bf16.msra.mxu0 %v729_v21 }
  0x38   : > { %673 = vmatprep.subr.bf16.mxu0 %v774_v16 }
  0x3b   : > { %674 = vmatpush3.bf16.msra.mxu0 %v730_v22 }
  0x3c   : > { %675 = vmatprep.subr.bf16.mxu0 %v774_v16 }
  0x3f   : > { %676 = vmatpush3.bf16.msra.mxu0 %v731_v23 }
  0x40   : > { %677 = vmatprep.subr.bf16.mxu0 %v774_v16 }
  0x43   : > { %678 = vmatpush3.bf16.msra.mxu0 %v732_v24 }
  0x46   : > { %680 = vmatmul.mubr.bf16.vlgmr.msra.gmra.mrb[0].mxu0 %v733_v25 }
 0x118   : > { %489 = sbr.rel (!%p831_p6) target bundleno = 295 (0x127), region = 85 }
 0x119   : > { %v456_v27 = vpop.f32.mrb[0].mxu0 }
 0x11a   : > { %v479_v28 = vadd.f32 %v649_v26, %v456_v27  ;;  %v681_v29 = vpop.f32.mrb[1].mxu0 }
 0x11b   : > { %v459_v30 = vpop.f32.mrb[2].mxu0 }
 0x11c   : > { %481 = vst [vmem:[%s326_s19] sm:$0xff] %v479_v28  ;;  %v480_v31 = vadd.f32 %v649_v26, %v459_v30  ;;  %v682_v32 = vpop.f32.mrb[3].mxu0 }
 0x11e   : > { %482 = vst [vmem:[%s326_s19 + $0x8] sm:$0xff] %v480_v31 }
 0x123   : > { %v524_v33 = vld [vmem:[%s326_s19] sm:$0xff] }
 0x124   : > { %525 = vst [vmem:[%s494_s24] sm:$0xff] %v524_v33 }
 0x125   : > { %v526_v34 = vld [vmem:[%s326_s19 + $0x8] sm:$0xff] }
 0x126   : > { %527 = vst [vmem:[%s494_s24 + $0x18] sm:$0xff] %v526_v34 }
 0x127 PF: > { %s13_s16 = sadd.s32 1, %s772_s16   ;;  %s903_s12 = smov %s760_s13 }
 0x128   : > { %p10_p12 = scmp.ge.s32.totalorder %s13_s16, 5   ;;  %s904_s13 = smov %s836_s22 }
 0x129   : > { %s905_s14 = smov %s768_s15  ;;  %s906_s15 = smov %s908_s17 }
 0x12a   :  { %12 = sbr.rel (!%p10_p12) target bundleno = 3 (0x3), region = 160 }

// kernel: encoder_decoder_forward.10
= control target key start
LH: loop header
LB: loop body
LE: loop exit
PB: predicated region body
PF: predicated region fallthrough
CT: control target
= control target key end

     0   :  { %s1107_s12 = smov 0   ;;  %s1109_s13 = smov 0   ;;  %s1274_s0 = inlined_call_operand.vmem [shape: bf16[128,128], index: 0, kind: input, shape index: {}]   ;;  %s1275_s1 = inlined_call_operand.vmem [shape: bf16[128,384], index: 1, kind: input, shape index: {}]   ;;  %s1276_s2 = inlined_call_operand.vmem [shape: f32[1,384], index: 2, kind: input, shape index: {}]   ;;  %s1277_s3 = inlined_call_operand.vmem [shape: f32[128,384], index: 3, kind: output, shape index: {}]  }
   0x1   :  { %s1111_s14 = smov 0   ;;  %s1113_s15 = smov 0  }
   0x2   :  { %s1115_s16 = smov 0  }
   0x3 LB: > { %s28_s17 = sadd.s32 1, %s1081_s15  ;;  %s896_s18 = sadd.s32 4294967295, %s1085_s16   ;;  %s1085_s16 = sphi %s1115_s16, %s13_s16   ;;  %s1081_s15 = sphi %s1113_s15, %s1282_s15   ;;  %s1077_s14 = sphi %s1111_s14, %s1281_s14   ;;  %s1073_s13 = sphi %s1109_s13, %s1280_s13   ;;  %s1069_s12 = sphi %s1107_s12, %s1279_s12  }
   0x4   : > { %p30_p0 = scmp.ge.s32.totalorder %s28_s17, 3  ;;  %p76_p1 = scmp.ne.s32.totalorder %s1073_s13, %s1069_s12 }
   0x5   : > { %p77_p2 = scmp.eq.s32.totalorder %s1085_s16, 0  ;;  %p134_p4 = scmp.eq.s32.totalorder %s896_s18, 2 }
   0x6   : > { %s1284_s17 = smov (%p30_p0, %s28_s17), 0  ;;  %s69_s20 = sadd.s32 1, %s1073_s13 }
   0x7   : > { %p78_p3 = por %p77_p2, %p76_p1  ;;  %s65_s19 = ssub.s32 %s1081_s15, %s1284_s17 }
   0x8   : > { %p67_p5 = scmp.eq.s32.totalorder %s65_s19, 0  ;;  %p1142_p6 = por %p134_p4, %p76_p1 }
   0x9   : > { %p900_p7 = scmp.ge.s32.totalorder %s1085_s16, 3 }
   0xa   : > { %s1147_s22 = scalar_select %p67_p5, %s1073_s13, %s69_s20  }
   0xb   : > { %168 = sbr.rel (%p900_p7) target bundleno = 32 (0x20), region = 20 }
  0x12   : > { %171 = sbr.rel (!%p78_p3) target bundleno = 32 (0x20), region = 24  ;;  %s173_s23 = sand.u32 (%p78_p3), 1, %s1073_s13  }
  0x13   : > { %s902_s24 = sshll.u32 (%p78_p3), %s1081_s15, 2  ;;  %s901_s25 = sshll.u32 (%p78_p3), %s173_s23, 6 }
  0x14   : > { %s1155_s28 = scalar_lea.vmem (%p78_p3), %s1275_s1, %s902_s24  ;;  %s175_s29 = scalar_lea.vmem (%p78_p3), [#allocation3], %s901_s25 }
  0x15   : > { %v196_v0 = vld [vmem:[%s1155_s28] sm:$0xf] (%p78_p3)  ;;  %v198_v1 = vld [vmem:[%s1155_s28 + $0xc] sm:$0xf] (%p78_p3)  ;;  %v200_v2 = vld [vmem:[%s1155_s28 + $0x18] sm:$0xf] (%p78_p3) }
  0x16   : > { %197 = vst [vmem:[%s175_s29] sm:$0xf] (%p78_p3), %v196_v0  ;;  %199 = vst [vmem:[%s175_s29 + $0x4] sm:$0xf] (%p78_p3), %v198_v1  ;;  %v202_v3 = vld [vmem:[%s1155_s28 + $0x24] sm:$0xf] (%p78_p3) }
  0x17   : > { %v204_v4 = vld [vmem:[%s1155_s28 + $0x30] sm:$0xf] (%p78_p3)  ;;  %201 = vst [vmem:[%s175_s29 + $0x8] sm:$0xf] (%p78_p3), %v200_v2  ;;  %203 = vst [vmem:[%s175_s29 + $0xc] sm:$0xf] (%p78_p3), %v202_v3 }
  0x18   : > { %205 = vst [vmem:[%s175_s29 + $0x10] sm:$0xf] (%p78_p3), %v204_v4  ;;  %v206_v5 = vld [vmem:[%s1155_s28 + $0x3c] sm:$0xf] (%p78_p3)  ;;  %v208_v6 = vld [vmem:[%s1155_s28 + $0x48] sm:$0xf] (%p78_p3) }
  0x19   : > { %v210_v7 = vld [vmem:[%s1155_s28 + $0x54] sm:$0xf]  ;;  %207 = vst [vmem:[%s175_s29 + $0x14] sm:$0xf] %v206_v5  ;;  %209 = vst [vmem:[%s175_s29 + $0x18] sm:$0xf] %v208_v6 }
  0x1a   : > { %211 = vst [vmem:[%s175_s29 + $0x1c] sm:$0xf] %v210_v7  ;;  %v212_v8 = vld [vmem:[%s1155_s28 + $0x60] sm:$0xf]  ;;  %v214_v9 = vld [vmem:[%s1155_s28 + $0x6c] sm:$0xf] }
  0x1b   : > { %v216_v10 = vld [vmem:[%s1155_s28 + $0x78] sm:$0xf]  ;;  %213 = vst [vmem:[%s175_s29 + $0x20] sm:$0xf] %v212_v8  ;;  %215 = vst [vmem:[%s175_s29 + $0x24] sm:$0xf] %v214_v9 }
  0x1c   : > { %217 = vst [vmem:[%s175_s29 + $0x28] sm:$0xf] %v216_v10  ;;  %v218_v11 = vld [vmem:[%s1155_s28 + $0x84] sm:$0xf]  ;;  %v220_v12 = vld [vmem:[%s1155_s28 + $0x90] sm:$0xf] }
  0x1d   : > { %v222_v13 = vld [vmem:[%s1155_s28 + $0x9c] sm:$0xf]  ;;  %219 = vst [vmem:[%s175_s29 + $0x2c] sm:$0xf] %v218_v11  ;;  %221 = vst [vmem:[%s175_s29 + $0x30] sm:$0xf] %v220_v12 }
  0x1e   : > { %223 = vst [vmem:[%s175_s29 + $0x34] sm:$0xf] %v222_v13  ;;  %v224_v14 = vld [vmem:[%s1155_s28 + $0xa8] sm:$0xf]  ;;  %v226_v15 = vld [vmem:[%s1155_s28 + $0xb4] sm:$0xf] }
  0x1f   : > { %225 = vst [vmem:[%s175_s29 + $0x38] sm:$0xf] %v224_v14  ;;  %227 = vst [vmem:[%s175_s29 + $0x3c] sm:$0xf] %v226_v15 }
  0x20 PF: > { %p903_p8 = scmp.ge.s32.totalorder %s1085_s16, 1  ;;  %p287_p9 = scmp.lt.s32.totalorder %s1085_s16, 4 }
  0x22   : > { %p288_p10 = pnand %p903_p8, %p287_p9 }
  0x23   : > { %s294_s30 = sand.u32 (!%p288_p10), 1, %s1069_s12   ;;  %v1039_v16 = vld [vmem:[%s1274_s0] sm:$0xff] (!%p288_p10)   ;;  %v1041_v26 = vld [vmem:[%s1274_s0 + $0x8] sm:$0xff] (!%p288_p10)   ;;  %v1043_v28 = vld [vmem:[%s1274_s0 + $0x10] sm:$0xff] (!%p288_p10)   ;;  %p337_p11 = scmp.lt.s32.totalorder (!%p288_p10), %s1077_s14, 2 }
  0x24   : > { %291 = sbr.rel (%p288_p10) target bundleno = 306 (0x132), region = 69  ;;  %s904_s6 = sshll.u32 (!%p288_p10), %s294_s30, 6  ;;  %v1040_v17 = vld [vmem:[%s1274_s0 + $0x20] sm:$0xff] (!%p288_p10)   ;;  %959 = vmatprep.mubr.bf16.mxu0 (!%p288_p10), %v1039_v16  ;;  %v1042_v27 = vld [vmem:[%s1274_s0 + $0x28] sm:$0xff] (!%p288_p10)   ;;  %v1044_v29 = vld [vmem:[%s1274_s0 + $0x30] sm:$0xff] (!%p288_p10)  }
  0x25   : > { %s1184_s9 = scalar_lea.vmem (!%p288_p10), [#allocation3], %s904_s6  ;;  %967 = vmatprep.mubr.bf16.mxu1 (!%p288_p10), %v1040_v17  ;;  %v1045_v30 = vld [vmem:[%s1274_s0 + $0x18] sm:$0xff] (!%p288_p10)   ;;  %s905_s8 = sshll.u32 (!%p288_p10), %s294_s30, 7 }
  0x26   : > { %v1031_v18 = vld [vmem:[%s1184_s9] sm:$0xff] (!%p288_p10)   ;;  %v1032_v19 = vld [vmem:[%s1184_s9 + $0x8] sm:$0xff] (!%p288_p10)   ;;  %v1033_v20 = vld [vmem:[%s1184_s9 + $0x10] sm:$0xff] (!%p288_p10)  }
  0x27   : > { %943 = vmatprep.subr.bf16.mxu0 (!%p288_p10), %v1031_v18  ;;  %975 = vmatprep.subr.bf16.mxu1 (!%p288_p10), %v1031_v18  ;;  %v1034_v21 = vld [vmem:[%s1184_s9 + $0x18] sm:$0xff] (!%p288_p10)   ;;  %v1035_v22 = vld [vmem:[%s1184_s9 + $0x20] sm:$0xff] (!%p288_p10)   ;;  %v1036_v23 = vld [vmem:[%s1184_s9 + $0x28] sm:$0xff] (!%p288_p10)  }
  0x28   : > { %944 = vmatpush3.bf16.msra.mxu0 (!%p288_p10), %v1031_v18  ;;  %983 = vmatpush3.bf16.msra.mxu1 (!%p288_p10), %v1031_v18  ;;  %v1037_v24 = vld [vmem:[%s1184_s9 + $0x30] sm:$0xff] (!%p288_p10)   ;;  %v1038_v25 = vld [vmem:[%s1184_s9 + $0x38] sm:$0xff] (!%p288_p10)   ;;  %s1219_s9 = scalar_lea.vmem (!%p288_p10), [#allocation4], %s905_s8 }
  0x29   : > { %945 = vmatprep.subr.bf16.mxu0 (!%p288_p10), %v1032_v19  ;;  %976 = vmatprep.subr.bf16.mxu1 (!%p288_p10), %v1032_v19  ;;  %v1046_v31 = vld [vmem:[%s1274_s0 + $0x38] sm:$0xff] (!%p288_p10)  }
  0x2b   : > { %s338_s4 = scalar_select %p337_p11, %s1077_s14, 2 }
  0x2c   : > { %946 = vmatpush3.bf16.msra.mxu0 %v1032_v19  ;;  %984 = vmatpush3.bf16.msra.mxu1 %v1032_v19  ;;  %s924_s12 = sshll.u32 (%p1142_p6), %s1077_s14, 3 }
  0x2d   : > { %947 = vmatprep.subr.bf16.mxu0 %v1033_v20  ;;  %977 = vmatprep.subr.bf16.mxu1 %v1033_v20  ;;  %s339_s7 = scalar_lea.vmem %s1276_s2, %s338_s4  ;;  %s704_s11 = scalar_lea.vmem (%p1142_p6), %s1277_s3, %s924_s12 }
  0x2e   : > { %v922_v32 = vld [vmem:[%s339_s7] ss:$0 sm:$0xff] }
  0x30   : > { %948 = vmatpush3.bf16.msra.mxu0 %v1033_v20  ;;  %985 = vmatpush3.bf16.msra.mxu1 %v1033_v20 }
  0x31   : > { %949 = vmatprep.subr.bf16.mxu0 %v1034_v21  ;;  %978 = vmatprep.subr.bf16.mxu1 %v1034_v21 }
  0x34   : > { %950 = vmatpush3.bf16.msra.mxu0 %v1034_v21  ;;  %986 = vmatpush3.bf16.msra.mxu1 %v1034_v21 }
  0x35   : > { %951 = vmatprep.subr.bf16.mxu0 %v1035_v22  ;;  %979 = vmatprep.subr.bf16.mxu1 %v1035_v22 }
  0x38   : > { %952 = vmatpush3.bf16.msra.mxu0 %v1035_v22  ;;  %987 = vmatpush3.bf16.msra.mxu1 %v1035_v22 }
  0x39   : > { %953 = vmatprep.subr.bf16.mxu0 %v1036_v23  ;;  %980 = vmatprep.subr.bf16.mxu1 %v1036_v23 }
  0x3c   : > { %954 = vmatpush3.bf16.msra.mxu0 %v1036_v23  ;;  %988 = vmatpush3.bf16.msra.mxu1 %v1036_v23 }
  0x3d   : > { %955 = vmatprep.subr.bf16.mxu0 %v1037_v24  ;;  %981 = vmatprep.subr.bf16.mxu1 %v1037_v24 }
  0x40   : > { %956 = vmatpush3.bf16.msra.mxu0 %v1037_v24  ;;  %989 = vmatpush3.bf16.msra.mxu1 %v1037_v24 }
  0x41   : > { %957 = vmatprep.subr.bf16.mxu0 %v1038_v25  ;;  %982 = vmatprep.subr.bf16.mxu1 %v1038_v25 }
  0x44   : > { %958 = vmatpush3.bf16.msra.mxu0 %v1038_v25  ;;  %990 = vmatpush3.bf16.msra.mxu1 %v1038_v25 }
  0x47   : > { %960 = vmatmul.mubr.bf16.vlgmr.msra.gmra.mrb[0].mxu0 %v1041_v26  ;;  %968 = vmatmul.mubr.bf16.vlgmr.msra.gmra.mrb[0].mxu1 %v1042_v27 }
  0x48   : > { %963 = vmatprep.mubr.bf16.mxu0 %v1043_v28  ;;  %971 = vmatprep.mubr.bf16.mxu1 %v1044_v29 }
  0x4f   : > { %964 = vmatmul.mubr.bf16.gmra.mrb[4].mxu0 %v1045_v30  ;;  %972 = vmatmul.mubr.bf16.gmra.mrb[4].mxu1 %v1046_v31 }
 0x11a   : > { %v961_v33 = vpop.f32.mrb[0].mxu0  ;;  %v969_v34 = vpop.f32.mrb[0].mxu1 }
 0x11b   : > { %v663_v35 = vadd.f32 %v961_v33, %v922_v32  ;;  %v671_v36 = vadd.f32 %v969_v34, %v922_v32  ;;  %v540_v37 = vpop.f32.mrb[1].mxu0  ;;  %v572_v38 = vpop.f32.mrb[1].mxu1 }
 0x11c   : > { %v661_v39 = vadd.f32 %v922_v32, %v540_v37  ;;  %v669_v40 = vadd.f32 %v922_v32, %v572_v38  ;;  %v962_v41 = vpop.f32.mrb[2].mxu0  ;;  %v970_v42 = vpop.f32.mrb[2].mxu1 }
 0x11d   : > { %679 = vst [vmem:[%s1219_s9 + $0x10] sm:$0xff] %v663_v35  ;;  %687 = vst [vmem:[%s1219_s9 + $0x50] sm:$0xff] %v671_v36  ;;  %v664_v43 = vadd.f32 %v962_v41, %v922_v32  ;;  %v672_v44 = vadd.f32 %v970_v42, %v922_v32  ;;  %v543_v45 = vpop.f32.mrb[3].mxu0  ;;  %v575_v46 = vpop.f32.mrb[3].mxu1 }
 0x11e   : > { %677 = vst [vmem:[%s1219_s9] sm:$0xff] %v661_v39  ;;  %685 = vst [vmem:[%s1219_s9 + $0x40] sm:$0xff] %v669_v40  ;;  %v662_v47 = vadd.f32 %v922_v32, %v543_v45  ;;  %v670_v48 = vadd.f32 %v922_v32, %v575_v46 }
 0x11f   : > { %680 = vst [vmem:[%s1219_s9 + $0x18] sm:$0xff] %v664_v43  ;;  %688 = vst [vmem:[%s1219_s9 + $0x58] sm:$0xff] %v672_v44 }
 0x120   : > { %678 = vst [vmem:[%s1219_s9 + $0x8] sm:$0xff] %v662_v47  ;;  %686 = vst [vmem:[%s1219_s9 + $0x48] sm:$0xff] %v670_v48 }
 0x122   : > { %v965_v49 = vpop.f32.mrb[4].mxu0  ;;  %v973_v50 = vpop.f32.mrb[4].mxu1  ;;  %699 = sbr.rel (!%p1142_p6) target bundleno = 306 (0x132), region = 85 }
 0x123   : > { %v667_v51 = vadd.f32 %v965_v49, %v922_v32  ;;  %v675_v52 = vadd.f32 %v973_v50, %v922_v32  ;;  %v556_v53 = vpop.f32.mrb[5].mxu0  ;;  %v588_v54 = vpop.f32.mrb[5].mxu1 }
 0x124   : > { %v665_v55 = vadd.f32 %v922_v32, %v556_v53  ;;  %v673_v56 = vadd.f32 %v922_v32, %v588_v54  ;;  %v966_v57 = vpop.f32.mrb[6].mxu0  ;;  %v974_v58 = vpop.f32.mrb[6].mxu1  ;;  %v766_v3 = vld [vmem:[%s1219_s9 + $0x10] sm:$0xff] (%p1142_p6) }
 0x125   : > { %683 = vst [vmem:[%s1219_s9 + $0x30] sm:$0xff] %v667_v51  ;;  %691 = vst [vmem:[%s1219_s9 + $0x70] sm:$0xff] %v675_v52  ;;  %v668_v59 = vadd.f32 %v966_v57, %v922_v32  ;;  %v676_v60 = vadd.f32 %v974_v58, %v922_v32  ;;  %v559_v61 = vpop.f32.mrb[7].mxu0  ;;  %v591_v62 = vpop.f32.mrb[7].mxu1  ;;  %v762_v1 = vld [vmem:[%s1219_s9] sm:$0xff] (%p1142_p6)  ;;  %v782_v11 = vld [vmem:[%s1219_s9 + $0x50] sm:$0xff] (%p1142_p6) }
 0x126   : > { %681 = vst [vmem:[%s1219_s9 + $0x20] sm:$0xff] %v665_v55  ;;  %689 = vst [vmem:[%s1219_s9 + $0x60] sm:$0xff] %v673_v56  ;;  %v666_v63 = vadd.f32 %v922_v32, %v559_v61  ;;  %v674_v0 = vadd.f32 %v922_v32, %v591_v62  ;;  %v768_v4 = vld [vmem:[%s1219_s9 + $0x18] sm:$0xff] (%p1142_p6)  ;;  %v778_v9 = vld [vmem:[%s1219_s9 + $0x40] sm:$0xff] (%p1142_p6) }
 0x127   : > { %684 = vst [vmem:[%s1219_s9 + $0x38] sm:$0xff] %v668_v59  ;;  %692 = vst [vmem:[%s1219_s9 + $0x78] sm:$0xff] %v676_v60  ;;  %v764_v2 = vld [vmem:[%s1219_s9 + $0x8] sm:$0xff] (%p1142_p6)  ;;  %v784_v12 = vld [vmem:[%s1219_s9 + $0x58] sm:$0xff] (%p1142_p6) }
 0x128   : > { %682 = vst [vmem:[%s1219_s9 + $0x28] sm:$0xff] %v666_v63  ;;  %690 = vst [vmem:[%s1219_s9 + $0x68] sm:$0xff] %v674_v0  ;;  %v780_v10 = vld [vmem:[%s1219_s9 + $0x48] sm:$0xff] (%p1142_p6) }
 0x129   : > { %763 = vst [vmem:[%s704_s11] sm:$0xff] %v762_v1  ;;  %765 = vst [vmem:[%s704_s11 + $0x18] sm:$0xff] %v764_v2 }
 0x12a   : > { %767 = vst [vmem:[%s704_s11 + $0x30] sm:$0xff] %v766_v3  ;;  %769 = vst [vmem:[%s704_s11 + $0x48] sm:$0xff] %v768_v4 }
 0x12b   : > { %779 = vst [vmem:[%s704_s11 + $0xc0] sm:$0xff] %v778_v9  ;;  %781 = vst [vmem:[%s704_s11 + $0xd8] sm:$0xff] %v780_v10 }
 0x12c   : > { %v774_v7 = vld [vmem:[%s1219_s9 + $0x30] sm:$0xff]  ;;  %783 = vst [vmem:[%s704_s11 + $0xf0] sm:$0xff] %v782_v11  ;;  %785 = vst [vmem:[%s704_s11 + $0x108] sm:$0xff] %v784_v12 }
 0x12d   : > { %v770_v5 = vld [vmem:[%s1219_s9 + $0x20] sm:$0xff]  ;;  %775 = vst [vmem:[%s704_s11 + $0x90] sm:$0xff] %v774_v7  ;;  %v790_v15 = vld [vmem:[%s1219_s9 + $0x70] sm:$0xff] }
 0x12e   : > { %771 = vst [vmem:[%s704_s11 + $0x60] sm:$0xff] %v770_v5  ;;  %v776_v8 = vld [vmem:[%s1219_s9 + $0x38] sm:$0xff]  ;;  %v786_v13 = vld [vmem:[%s1219_s9 + $0x60] sm:$0xff]  ;;  %791 = vst [vmem:[%s704_s11 + $0x150] sm:$0xff] %v790_v15 }
 0x12f   : > { %v772_v6 = vld [vmem:[%s1219_s9 + $0x28] sm:$0xff]  ;;  %777 = vst [vmem:[%s704_s11 + $0xa8] sm:$0xff] %v776_v8  ;;  %787 = vst [vmem:[%s704_s11 + $0x120] sm:$0xff] %v786_v13  ;;  %v792_v16 = vld [vmem:[%s1219_s9 + $0x78] sm:$0xff] }
 0x130   : > { %773 = vst [vmem:[%s704_s11 + $0x78] sm:$0xff] %v772_v6  ;;  %v788_v14 = vld [vmem:[%s1219_s9 + $0x68] sm:$0xff]  ;;  %793 = vst [vmem:[%s704_s11 + $0x168] sm:$0xff] %v792_v16 }
 0x131   : > { %789 = vst [vmem:[%s704_s11 + $0x138] sm:$0xff] %v788_v14 }
 0x132 PF: > { %s13_s16 = sadd.s32 1, %s1085_s16   ;;  %s1279_s12 = smov %s1073_s13 }
 0x133   : > { %p10_p12 = scmp.ge.s32.totalorder %s13_s16, 5   ;;  %s1280_s13 = smov %s1147_s22 }
 0x134   : > { %s1281_s14 = smov %s1081_s15  ;;  %s1282_s15 = smov %s1284_s17 }
 0x135   :  { %12 = sbr.rel (!%p10_p12) target bundleno = 3 (0x3), region = 160 }

// kernel: encoder_decoder_forward.19
= control target key start
LH: loop header
LB: loop body
LE: loop exit
PB: predicated region body
PF: predicated region fallthrough
CT: control target
= control target key end

     0   :  { %s586_s1 = inlined_call_operand.vmem [shape: bf16[128,128], index: 1, kind: input, shape index: {}]   ;;  %s587_s0 = inlined_call_operand.vmem [shape: bf16[128,128], index: 0, kind: input, shape index: {}]   ;;  %s588_s2 = inlined_call_operand.vmem [shape: f32[1,128], index: 2, kind: input, shape index: {}]   ;;  %s589_s3 = inlined_call_operand.vmem [shape: f32[128,128], index: 3, kind: output, shape index: {}]  }
   0x1   :  { %v451_v0 = vld [vmem:[%s586_s1] sm:$0xff]   ;;  %v452_v1 = vld [vmem:[%s586_s1 + $0x8] sm:$0xff]   ;;  %v453_v2 = vld [vmem:[%s586_s1 + $0x10] sm:$0xff]  }
   0x2   :  { %403 = vmatprep.subr.bf16.mxu0 %v451_v0  ;;  %435 = vmatprep.subr.bf16.mxu1 %v451_v0  ;;  %v454_v3 = vld [vmem:[%s586_s1 + $0x18] sm:$0xff]   ;;  %v459_v4 = vld [vmem:[%s587_s0] sm:$0xff]   ;;  %v456_v7 = vld [vmem:[%s586_s1 + $0x28] sm:$0xff]  }
   0x3   :  { %404 = vmatpush3.bf16.msra.mxu0 %v451_v0  ;;  %443 = vmatpush3.bf16.msra.mxu1 %v451_v0  ;;  %v460_v5 = vld [vmem:[%s587_s0 + $0x20] sm:$0xff]   ;;  %v457_v8 = vld [vmem:[%s586_s1 + $0x30] sm:$0xff]   ;;  %v458_v9 = vld [vmem:[%s586_s1 + $0x38] sm:$0xff]  }
   0x4   :  { %405 = vmatprep.subr.bf16.mxu0 %v452_v1  ;;  %436 = vmatprep.subr.bf16.mxu1 %v452_v1  ;;  %v455_v6 = vld [vmem:[%s586_s1 + $0x20] sm:$0xff]   ;;  %v461_v10 = vld [vmem:[%s587_s0 + $0x8] sm:$0xff]   ;;  %v463_v12 = vld [vmem:[%s587_s0 + $0x10] sm:$0xff]  }
   0x5   :  { %419 = vmatprep.mubr.bf16.mxu0 %v459_v4  ;;  %427 = vmatprep.mubr.bf16.mxu1 %v460_v5  ;;  %v462_v11 = vld [vmem:[%s587_s0 + $0x28] sm:$0xff]   ;;  %v464_v13 = vld [vmem:[%s587_s0 + $0x30] sm:$0xff]   ;;  %v465_v14 = vld [vmem:[%s587_s0 + $0x18] sm:$0xff]  }
   0x6   :  { %v466_v15 = vld [vmem:[%s587_s0 + $0x38] sm:$0xff]   ;;  %v386_v16 = vld [vmem:[%s588_s2] ss:$0 sm:$0xff] }
   0x7   :  { %406 = vmatpush3.bf16.msra.mxu0 %v452_v1  ;;  %444 = vmatpush3.bf16.msra.mxu1 %v452_v1 }
   0x8   :  { %407 = vmatprep.subr.bf16.mxu0 %v453_v2  ;;  %437 = vmatprep.subr.bf16.mxu1 %v453_v2 }
   0xb   :  { %408 = vmatpush3.bf16.msra.mxu0 %v453_v2  ;;  %445 = vmatpush3.bf16.msra.mxu1 %v453_v2 }
   0xc   :  { %409 = vmatprep.subr.bf16.mxu0 %v454_v3  ;;  %438 = vmatprep.subr.bf16.mxu1 %v454_v3 }
   0xf   :  { %410 = vmatpush3.bf16.msra.mxu0 %v454_v3  ;;  %446 = vmatpush3.bf16.msra.mxu1 %v454_v3 }
  0x10   :  { %411 = vmatprep.subr.bf16.mxu0 %v455_v6  ;;  %439 = vmatprep.subr.bf16.mxu1 %v455_v6 }
  0x13   :  { %412 = vmatpush3.bf16.msra.mxu0 %v455_v6  ;;  %447 = vmatpush3.bf16.msra.mxu1 %v455_v6 }
  0x14   :  { %413 = vmatprep.subr.bf16.mxu0 %v456_v7  ;;  %440 = vmatprep.subr.bf16.mxu1 %v456_v7 }
  0x17   :  { %414 = vmatpush3.bf16.msra.mxu0 %v456_v7  ;;  %448 = vmatpush3.bf16.msra.mxu1 %v456_v7 }
  0x18   :  { %415 = vmatprep.subr.bf16.mxu0 %v457_v8  ;;  %441 = vmatprep.subr.bf16.mxu1 %v457_v8 }
  0x1b   :  { %416 = vmatpush3.bf16.msra.mxu0 %v457_v8  ;;  %449 = vmatpush3.bf16.msra.mxu1 %v457_v8 }
  0x1c   :  { %417 = vmatprep.subr.bf16.mxu0 %v458_v9  ;;  %442 = vmatprep.subr.bf16.mxu1 %v458_v9 }
  0x1f   :  { %418 = vmatpush3.bf16.msra.mxu0 %v458_v9  ;;  %450 = vmatpush3.bf16.msra.mxu1 %v458_v9 }
  0x22   :  { %420 = vmatmul.mubr.bf16.vlgmr.msra.gmra.mrb[0].mxu0 %v461_v10  ;;  %428 = vmatmul.mubr.bf16.vlgmr.msra.gmra.mrb[0].mxu1 %v462_v11 }
  0x23   :  { %423 = vmatprep.mubr.bf16.mxu0 %v463_v12  ;;  %431 = vmatprep.mubr.bf16.mxu1 %v464_v13 }
  0x2a   :  { %424 = vmatmul.mubr.bf16.gmra.mrb[4].mxu0 %v465_v14  ;;  %432 = vmatmul.mubr.bf16.gmra.mrb[4].mxu1 %v466_v15 }
  0xf5   :  { %v421_v17 = vpop.f32.mrb[0].mxu0  ;;  %v429_v18 = vpop.f32.mrb[0].mxu1 }
  0xf6   :  { %v336_v19 = vadd.f32 %v421_v17, %v386_v16  ;;  %v344_v20 = vadd.f32 %v429_v18, %v386_v16  ;;  %v213_v21 = vpop.f32.mrb[1].mxu0  ;;  %v245_v22 = vpop.f32.mrb[1].mxu1 }
  0xf7   :  { %v334_v23 = vadd.f32 %v386_v16, %v213_v21  ;;  %v342_v24 = vadd.f32 %v386_v16, %v245_v22  ;;  %v422_v25 = vpop.f32.mrb[2].mxu0  ;;  %v430_v26 = vpop.f32.mrb[2].mxu1 }
  0xf8   :  { %352 = vst [vmem:[%s589_s3 + $0x10] sm:$0xff] %v336_v19  ;;  %360 = vst [vmem:[%s589_s3 + $0x50] sm:$0xff] %v344_v20  ;;  %v337_v27 = vadd.f32 %v422_v25, %v386_v16  ;;  %v345_v28 = vadd.f32 %v430_v26, %v386_v16  ;;  %v216_v29 = vpop.f32.mrb[3].mxu0  ;;  %v248_v30 = vpop.f32.mrb[3].mxu1 }
  0xf9   :  { %350 = vst [vmem:[%s589_s3] sm:$0xff] %v334_v23  ;;  %358 = vst [vmem:[%s589_s3 + $0x40] sm:$0xff] %v342_v24  ;;  %v335_v31 = vadd.f32 %v386_v16, %v216_v29  ;;  %v343_v32 = vadd.f32 %v386_v16, %v248_v30 }
  0xfa   :  { %353 = vst [vmem:[%s589_s3 + $0x18] sm:$0xff] %v337_v27  ;;  %361 = vst [vmem:[%s589_s3 + $0x58] sm:$0xff] %v345_v28 }
  0xfb   :  { %351 = vst [vmem:[%s589_s3 + $0x8] sm:$0xff] %v335_v31  ;;  %359 = vst [vmem:[%s589_s3 + $0x48] sm:$0xff] %v343_v32 }
  0xfd   :  { %v425_v33 = vpop.f32.mrb[4].mxu0  ;;  %v433_v34 = vpop.f32.mrb[4].mxu1 }
  0xfe   :  { %v340_v35 = vadd.f32 %v425_v33, %v386_v16  ;;  %v348_v36 = vadd.f32 %v433_v34, %v386_v16  ;;  %v229_v37 = vpop.f32.mrb[5].mxu0  ;;  %v261_v38 = vpop.f32.mrb[5].mxu1 }
  0xff   :  { %v338_v39 = vadd.f32 %v386_v16, %v229_v37  ;;  %v346_v40 = vadd.f32 %v386_v16, %v261_v38  ;;  %v426_v41 = vpop.f32.mrb[6].mxu0  ;;  %v434_v42 = vpop.f32.mrb[6].mxu1 }
 0x100   :  { %356 = vst [vmem:[%s589_s3 + $0x30] sm:$0xff] %v340_v35  ;;  %364 = vst [vmem:[%s589_s3 + $0x70] sm:$0xff] %v348_v36  ;;  %v341_v43 = vadd.f32 %v426_v41, %v386_v16  ;;  %v349_v44 = vadd.f32 %v434_v42, %v386_v16  ;;  %v232_v45 = vpop.f32.mrb[7].mxu0  ;;  %v264_v46 = vpop.f32.mrb[7].mxu1 }
 0x101   :  { %354 = vst [vmem:[%s589_s3 + $0x20] sm:$0xff] %v338_v39  ;;  %362 = vst [vmem:[%s589_s3 + $0x60] sm:$0xff] %v346_v40  ;;  %v339_v47 = vadd.f32 %v386_v16, %v232_v45  ;;  %v347_v48 = vadd.f32 %v386_v16, %v264_v46 }
 0x102   :  { %357 = vst [vmem:[%s589_s3 + $0x38] sm:$0xff] %v341_v43  ;;  %365 = vst [vmem:[%s589_s3 + $0x78] sm:$0xff] %v349_v44 }
 0x103   :  { %355 = vst [vmem:[%s589_s3 + $0x28] sm:$0xff] %v339_v47  ;;  %363 = vst [vmem:[%s589_s3 + $0x68] sm:$0xff] %v347_v48 }

// kernel: encoder_decoder_forward.11
= control target key start
LH: loop header
LB: loop body
LE: loop exit
PB: predicated region body
PF: predicated region fallthrough
CT: control target
= control target key end

     0   :  { %v3473_v1 = vmov 0.0   ;;  %v3474_v2 = vmov 0   ;;  %vm3475_vm0 = vmmov 0   ;;  %v66_v37 = vlaneseq  ;;  %s4534_s3 = inlined_call_operand.vmem [shape: bf16[128,384], index: 3, kind: input, shape index: {}]   ;;  %s4535_s2 = inlined_call_operand.vmem [shape: f32[16,128], index: 2, kind: input, shape index: {}]   ;;  %s4536_s4 = inlined_call_operand.vmem [shape: f32[1,384], index: 4, kind: input, shape index: {}]   ;;  %s4537_s0 = inlined_call_operand.vmem [shape: f32[8,16,384], index: 0, kind: input, shape index: {}]   ;;  %s4538_s1 = inlined_call_operand.vmem [shape: f32[16,384], index: 1, kind: input, shape index: {}]   ;;  %s4539_s5 = inlined_call_operand.vmem [shape: f32[8,16,128], index: 5, kind: output, shape index: {}]  }
   0x1   :  { %v3509_v0 = vld [vmem:[%s4534_s3 + $0x4] ss:$12 sps:$4 sm:$0xff]   ;;  %3023 = vmatprep.subr.bf16.mxu1 %v3473_v1  ;;  %241 = vmatprep.mubr.bf16.mxu0 %v3474_v2  ;;  %v3516_v3 = vld [vmem:[%s4534_s3] ss:$12 sps:$4 sm:$0xff]   ;;  %v3524_v4 = vld [vmem:[%s4534_s3 + $0x1c] ss:$12 sps:$4 sm:$0xff]  }
   0x2   :  { %3039 = vmatprep.mubr.msk.bf16.mxu1 %vm3475_vm0, %v3473_v1  ;;  %209 = vmatprep.subr.bf16.mxu0 %v3509_v0  ;;  %v3530_v5 = vld [vmem:[%s4534_s3 + $0x18] ss:$12 sps:$4 sm:$0xff]   ;;  %v3536_v6 = vld [vmem:[%s4534_s3 + $0x34] ss:$12 sps:$4 sm:$0xff]   ;;  %v3542_v7 = vld [vmem:[%s4534_s3 + $0x30] ss:$12 sps:$4 sm:$0xff]  }
   0x3   :  { %210 = vmatpush1.bf16.msra.mxu0 %v3516_v3  ;;  %v3548_v8 = vld [vmem:[%s4534_s3 + $0x4c] ss:$12 sps:$4 sm:$0xff]   ;;  %v3207_v9 = vld [vmem:[%s4534_s3 + $0x8] ss:$12 sps:$4 sm:$0xff]   ;;  %v3563_v11 = vld [vmem:[%s4534_s3 + $0x64] ss:$12 sps:$4 sm:$0xff]  }
   0x4   :  { %211 = vmatprep.subr.bf16.mxu0 %v3524_v4  ;;  %v3557_v10 = vld [vmem:[%s4534_s3 + $0x48] ss:$12 sps:$4 sm:$0xff]   ;;  %3024 = vmatpush3.bf16.msra.mxu1 %v3207_v9  ;;  %v3211_v12 = vld [vmem:[%s4534_s3 + $0x20] ss:$12 sps:$4 sm:$0xff]   ;;  %v3212_v15 = vld [vmem:[%s4534_s3 + $0x38] ss:$12 sps:$4 sm:$0xff]  }
   0x5   :  { %3025 = vmatprep.subr.bf16.mxu1 %v3473_v1  ;;  %v3572_v13 = vld [vmem:[%s4534_s3 + $0x60] ss:$12 sps:$4 sm:$0xff]   ;;  %v3578_v14 = vld [vmem:[%s4534_s3 + $0x7c] ss:$12 sps:$4 sm:$0xff]   ;;  %v3588_v16 = vld [vmem:[%s4534_s3 + $0x78] ss:$12 sps:$4 sm:$0xff]  }
   0x6   :  { %v3594_v17 = vld [vmem:[%s4534_s3 + $0x94] ss:$12 sps:$4 sm:$0xff]   ;;  %v3213_v18 = vld [vmem:[%s4534_s3 + $0x50] ss:$12 sps:$4 sm:$0xff]   ;;  %v3609_v20 = vld [vmem:[%s4534_s3 + $0xac] ss:$12 sps:$4 sm:$0xff]  }
   0x7   :  { %212 = vmatpush1.bf16.msra.mxu0 %v3530_v5  ;;  %v3603_v19 = vld [vmem:[%s4534_s3 + $0x90] ss:$12 sps:$4 sm:$0xff]   ;;  %v3214_v21 = vld [vmem:[%s4534_s3 + $0x68] ss:$12 sps:$4 sm:$0xff]   ;;  %v3624_v23 = vld [vmem:[%s4535_s2] sm:$0xff]  ;;  %v67_v38 = vshrl.u32 %v66_v37, 7 }
   0x8   :  { %213 = vmatprep.subr.bf16.mxu0 %v3536_v6  ;;  %3026 = vmatpush3.bf16.msra.mxu1 %v3211_v12  ;;  %v3619_v22 = vld [vmem:[%s4534_s3 + $0xa8] ss:$12 sps:$4 sm:$0xff]   ;;  %v3215_v25 = vld [vmem:[%s4534_s3 + $0x80] ss:$12 sps:$4 sm:$0xff]   ;;  %v3216_v27 = vld [vmem:[%s4534_s3 + $0x98] ss:$12 sps:$4 sm:$0xff]  }
   0x9   :  { %3027 = vmatprep.subr.bf16.mxu1 %v3473_v1  ;;  %v3629_v24 = vld [vmem:[%s4535_s2 + $0x8] sm:$0xff]  ;;  %v3217_v28 = vld [vmem:[%s4534_s3 + $0xb0] ss:$12 sps:$4 sm:$0xff]   ;;  %v3220_v31 = vld [vmem:[%s4534_s3 + $0x38] ss:$12 sps:$4 sm:$0xff]   ;;  %v3702_v39 = vsub.s32 0, %v67_v38 }
   0xa   :  { %v31_v26 = vpack.c.bf16 %v3629_v24, %v3624_v23  ;;  %v3218_v29 = vld [vmem:[%s4534_s3 + $0x8] ss:$12 sps:$4 sm:$0xff]   ;;  %v3219_v30 = vld [vmem:[%s4534_s3 + $0x20] ss:$12 sps:$4 sm:$0xff]   ;;  %v3221_v32 = vld [vmem:[%s4534_s3 + $0x50] ss:$12 sps:$4 sm:$0xff]  }
   0xb   :  { %214 = vmatpush1.bf16.msra.mxu0 %v3542_v7  ;;  %v3222_v33 = vld [vmem:[%s4534_s3 + $0x68] ss:$12 sps:$4 sm:$0xff]   ;;  %v3223_v34 = vld [vmem:[%s4534_s3 + $0x80] ss:$12 sps:$4 sm:$0xff]   ;;  %v3224_v35 = vld [vmem:[%s4534_s3 + $0x98] ss:$12 sps:$4 sm:$0xff]  }
   0xc   :  { %215 = vmatprep.subr.bf16.mxu0 %v3548_v8  ;;  %3028 = vmatpush3.bf16.msra.mxu1 %v3212_v15  ;;  %v3225_v36 = vld [vmem:[%s4534_s3 + $0xb0] ss:$12 sps:$4 sm:$0xff]   ;;  %v64_v40 = vld [vmem:[%s4536_s4] sm:$0x7]  ;;  %v3707_v41 = vsub.s32 1, %v67_v38  ;;  %v294_v49 = vld [vmem:[%s4537_s0 + $0x8] sm:$0xff] }
   0xd   :  { %3029 = vmatprep.subr.bf16.mxu1 %v3473_v1  ;;  %v293_v42 = vld [vmem:[%s4537_s0] sm:$0xff]  ;;  %v69_v44 = vrot.slane %v64_v40, %v3702_v39  ;;  %v296_v46 = vld [vmem:[%s4537_s0 + $0x18] sm:$0xff]  ;;  %v3734_v50 = vld [vmem:[%s4538_s1 + $0x8] sm:$0xff] }
   0xe   :  { %v3715_v43 = vld [vmem:[%s4538_s1] sm:$0xff]  ;;  %v73_v45 = vrot.slane %v64_v40, %v3707_v41  ;;  %v3725_v47 = vld [vmem:[%s4538_s1 + $0x18] sm:$0xff]  ;;  %v306_v58 = vadd.f32 %v3734_v50, %v294_v49 }
   0xf   :  { %216 = vmatpush1.bf16.msra.mxu0 %v3557_v10  ;;  %v305_v48 = vadd.f32 %v3715_v43, %v293_v42  ;;  %v308_v54 = vadd.f32 %v3725_v47, %v296_v46  ;;  %v297_v55 = vld [vmem:[%s4537_s0 + $0x20] sm:$0xff]  ;;  %v3756_v46 = vld [vmem:[%s4538_s1 + $0x10] sm:$0xff] }
  0x10   :  { %217 = vmatprep.subr.bf16.mxu0 %v3563_v11  ;;  %3030 = vmatpush3.bf16.msra.mxu1 %v3213_v18  ;;  %v3743_v56 = vld [vmem:[%s4538_s1 + $0x20] sm:$0xff] }
  0x11   :  { %3031 = vmatprep.subr.bf16.mxu1 %v3473_v1  ;;  %v309_v9 = vadd.f32 %v3743_v56, %v297_v55 }
  0x13   :  { %218 = vmatpush1.bf16.msra.mxu0 %v3572_v13 }
  0x14   :  { %219 = vmatprep.subr.bf16.mxu0 %v3578_v14  ;;  %3032 = vmatpush3.bf16.msra.mxu1 %v3214_v21 }
  0x15   :  { %3033 = vmatprep.subr.bf16.mxu1 %v3473_v1 }
  0x17   :  { %220 = vmatpush1.bf16.msra.mxu0 %v3588_v16 }
  0x18   :  { %221 = vmatprep.subr.bf16.mxu0 %v3594_v17  ;;  %3034 = vmatpush3.bf16.msra.mxu1 %v3215_v25 }
  0x19   :  { %3035 = vmatprep.subr.bf16.mxu1 %v3473_v1 }
  0x1b   :  { %222 = vmatpush1.bf16.msra.mxu0 %v3603_v19 }
  0x1c   :  { %223 = vmatprep.subr.bf16.mxu0 %v3609_v20  ;;  %3036 = vmatpush3.bf16.msra.mxu1 %v3216_v27 }
  0x1d   :  { %3037 = vmatprep.subr.bf16.mxu1 %v3473_v1 }
  0x1f   :  { %224 = vmatpush1.bf16.msra.mxu0 %v3619_v22 }
  0x20   :  { %537 = vmatprep.subr.bf16.mxu0 %v3509_v0  ;;  %3038 = vmatpush3.bf16.msra.mxu1 %v3217_v28 }
  0x21   :  { %3043 = vmatprep.subr.bf16.mxu1 %v3473_v1 }
  0x22   :  { %242 = vmatmul.mubr.bf16.vlgmr.msra.gmra.mrb[0].mxu0 %v31_v26 }
  0x23   :  { %538 = vmatpush1.bf16.msra.mxu0 %v3516_v3  ;;  %569 = vmatprep.mubr.bf16.mxu0 %v3474_v2 }
  0x24   :  { %539 = vmatprep.subr.bf16.mxu0 %v3524_v4  ;;  %3040 = vmatmul.mubr.bf16.vlgmr.msra.gmra.mrb[0].mxu1 %v31_v26 }
  0x25   :  { %3059 = vmatprep.mubr.msk.bf16.mxu1 %vm3475_vm0, %v3473_v1  ;;  %3044 = vmatpush3.bf16.msra.mxu1 %v3218_v29 }
  0x26   :  { %3045 = vmatprep.subr.bf16.mxu1 %v3473_v1 }
  0x27   :  { %540 = vmatpush1.bf16.msra.mxu0 %v3530_v5 }
  0x28   :  { %541 = vmatprep.subr.bf16.mxu0 %v3536_v6 }
  0x29   :  { %3046 = vmatpush3.bf16.msra.mxu1 %v3219_v30 }
  0x2a   :  { %3047 = vmatprep.subr.bf16.mxu1 %v3473_v1 }
  0x2b   :  { %542 = vmatpush1.bf16.msra.mxu0 %v3542_v7 }
  0x2c   :  { %543 = vmatprep.subr.bf16.mxu0 %v3548_v8 }
  0x2d   :  { %3048 = vmatpush3.bf16.msra.mxu1 %v3220_v31 }
  0x2e   :  { %3049 = vmatprep.subr.bf16.mxu1 %v3473_v1 }
  0x2f   :  { %544 = vmatpush1.bf16.msra.mxu0 %v3557_v10 }
  0x30   :  { %545 = vmatprep.subr.bf16.mxu0 %v3563_v11 }
  0x31   :  { %3050 = vmatpush3.bf16.msra.mxu1 %v3221_v32 }
  0x32   :  { %3051 = vmatprep.subr.bf16.mxu1 %v3473_v1 }
  0x33   :  { %546 = vmatpush1.bf16.msra.mxu0 %v3572_v13 }
  0x34   :  { %547 = vmatprep.subr.bf16.mxu0 %v3578_v14 }
  0x35   :  { %3052 = vmatpush3.bf16.msra.mxu1 %v3222_v33 }
  0x36   :  { %3053 = vmatprep.subr.bf16.mxu1 %v3473_v1 }
  0x37   :  { %548 = vmatpush1.bf16.msra.mxu0 %v3588_v16 }
  0x38   :  { %549 = vmatprep.subr.bf16.mxu0 %v3594_v17 }
  0x39   :  { %3054 = vmatpush3.bf16.msra.mxu1 %v3223_v34 }
  0x3a   :  { %3055 = vmatprep.subr.bf16.mxu1 %v3473_v1 }
  0x3b   :  { %550 = vmatpush1.bf16.msra.mxu0 %v3603_v19 }
  0x3c   :  { %551 = vmatprep.subr.bf16.mxu0 %v3609_v20 }
  0x3d   :  { %3056 = vmatpush3.bf16.msra.mxu1 %v3224_v35  ;;  %v3747_v35 = vsub.s32 2, %v67_v38  ;;  %v298_v38 = vld [vmem:[%s4537_s0 + $0x28] sm:$0xff] }
  0x3e   :  { %3057 = vmatprep.subr.bf16.mxu1 %v3473_v1 }
  0x3f   :  { %552 = vmatpush1.bf16.msra.mxu0 %v3619_v22  ;;  %v77_v37 = vrot.slane %v64_v40, %v3747_v35  ;;  %v3764_v40 = vld [vmem:[%s4538_s1 + $0x28] sm:$0xff] }
  0x40   :  { %867 = vmatprep.subr.bf16.mxu0 %v3509_v0 }
  0x41   :  { %3058 = vmatpush3.bf16.msra.mxu1 %v3225_v36 }
  0x42   :  { %3063 = vmatprep.subr.bf16.mxu1 %v3473_v1 }
  0xf5   :  { %v243_v51 = vpop.f32.mrb[0].mxu0 }
  0xf6   :  { %v244_v52 = vadd.f32 %v243_v51, %v69_v44  ;;  %v245_v53 = vpop.f32.mrb[1].mxu0 }
  0xf7   :  { %v246_v57 = vadd.f32 %v245_v53, %v73_v45  ;;  %v247_v59 = vpop.f32.mrb[2].mxu0  ;;  %v286_v26 = vpop.f32.mrb[0].mxu1 }
  0xf8   :  { %v311_v60 = vadd.f32 %v305_v48, %v244_v52  ;;  %v248_v61 = vadd.f32 %v247_v59, %v69_v44  ;;  %v249_v62 = vpop.f32.mrb[3].mxu0  ;;  %v3041_v28 = vpop.f32.mrb[1].mxu1  ;;  %v287_v49 = vadd.f32 %v286_v26, %v77_v37 }
  0xf9   :  { %v250_v63 = vadd.f32 %v249_v62, %v73_v45  ;;  %v325_v18 = vadd.f32 %v306_v58, %v246_v57  ;;  %v289_v29 = vpop.f32.mrb[2].mxu1  ;;  %v295_v45 = vld [vmem:[%s4537_s0 + $0x10] sm:$0xff]  ;;  %v310_v57 = vadd.f32 %v3764_v40, %v298_v38 }
  0xfa   :  { %v2695_v12 = vmul.f32 -1.442695, %v311_v60  ;;  %v312_v15 = vadd.f32 %v308_v54, %v248_v61  ;;  %v3042_v31 = vpop.f32.mrb[3].mxu1  ;;  %v307_v52 = vadd.f32 %v3756_v46, %v295_v45  ;;  %v290_v55 = vadd.f32 %v289_v29, %v77_v37  ;;  %v2727_v45 = vld [vmem:[%s4537_s0 + $0x50] sm:$0xff] }
  0xfb   :  { %v326_v25 = vadd.f32 %v309_v9, %v250_v63  ;;  %v2697_v27 = vmul.f32 -1.442695, %v325_v18 }
  0xfc   :  { %3313 = vpow2.f32 %v2695_v12  ;;  %v2696_v21 = vmul.f32 -1.442695, %v312_v15 }
  0xfd   :  { %v2698_v30 = vmul.f32 -1.442695, %v326_v25 }
  0xfe   :  { %3315 = vpow2.f32 %v2696_v21 }
  0xff   :  { %3317 = vpow2.f32 %v2697_v27 }
 0x100   :  { %3319 = vpow2.f32 %v2698_v30  ;;  %v2726_v30 = vld [vmem:[%s4537_s0 + $0x48] sm:$0xff] }
 0x106   :  { %v3314_v32 = vpop.eup %3313 }
 0x107   :  { %v319_v33 = vadd.f32 1.0, %v3314_v32  ;;  %v2724_v32 = vld [vmem:[%s4537_s0 + $0x38] sm:$0xff] }
 0x108   :  { %v3316_v34 = vpop.eup %3315 }
 0x109   :  { %3321 = vrcp.f32 %v319_v33  ;;  %v320_v36 = vadd.f32 1.0, %v3316_v34  ;;  %v3318_v42 = vpop.eup %3317 }
 0x10a   :  { %v3320_v44 = vpop.eup %3319  ;;  %v333_v48 = vadd.f32 1.0, %v3318_v42 }
 0x10b   :  { %3323 = vrcp.f32 %v320_v36  ;;  %v334_v51 = vadd.f32 1.0, %v3320_v44  ;;  %v637_v44 = vadd.f32 %v2726_v30, %v3725_v47 }
 0x10c   :  { %3325 = vrcp.f32 %v333_v48 }
 0x10d   :  { %3327 = vrcp.f32 %v334_v51 }
 0x113   :  { %v3322_v53 = vpop.eup %3321 }
 0x114   :  { %v339_v54 = vmul.f32 %v3322_v53, %v287_v49  ;;  %v635_v49 = vadd.f32 %v2724_v32, %v3734_v50 }
 0x115   :  { %v3324_v58 = vpop.eup %3323 }
 0x116   :  { %v341_v59 = vadd.f32 %v339_v54, %v307_v52  ;;  %v340_v60 = vmul.f32 %v3324_v58, %v290_v55  ;;  %v3326_v62 = vpop.eup %3325  ;;  %v638_v58 = vadd.f32 %v2727_v45, %v3743_v56 }
 0x117   :  { %v3328_v63 = vpop.eup %3327  ;;  %v345_v9 = vsub.f32 1.0, %v3326_v62  ;;  %v349_v21 = vmul.f32 %v3326_v62, %v3624_v23 }
 0x118   :  { %3329 = vtanh.f32 %v341_v59  ;;  %v342_v61 = vadd.f32 %v340_v60, %v310_v57  ;;  %v346_v15 = vsub.f32 1.0, %v3328_v63  ;;  %v350_v27 = vmul.f32 %v3328_v63, %v3629_v24 }
 0x11a   :  { %3331 = vtanh.f32 %v342_v61 }
 0x122   :  { %v3330_v12 = vpop.eup %3329 }
 0x123   :  { %v347_v18 = vmul.f32 %v3330_v12, %v345_v9 }
 0x124   :  { %v3332_v25 = vpop.eup %3331 }
 0x125   :  { %v348_v26 = vmul.f32 %v3332_v25, %v346_v15  ;;  %v3770_v28 = vadd.f32 %v349_v21, %v347_v18 }
 0x127   :  { %v3772_v29 = vadd.f32 %v350_v27, %v348_v26  ;;  %355 = vst [vmem:[%s4539_s5] sm:$0xff] %v3770_v28 }
 0x129   :  { %356 = vst [vmem:[%s4539_s5 + $0x8] sm:$0xff] %v3772_v29  ;;  %v359_v23 = vpack.c.bf16 %v3772_v29, %v3770_v28 }
 0x12b   :  { %570 = vmatmul.mubr.bf16.vlgmr.msra.gmra.mrb[4].mxu0 %v359_v23  ;;  %3060 = vmatmul.mubr.bf16.vlgmr.msra.gmra.mrb[4].mxu1 %v359_v23 }
 0x12c   :  { %868 = vmatpush1.bf16.msra.mxu0 %v3516_v3  ;;  %899 = vmatprep.mubr.bf16.mxu0 %v3474_v2 }
 0x12d   :  { %869 = vmatprep.subr.bf16.mxu0 %v3524_v4  ;;  %3079 = vmatprep.mubr.msk.bf16.mxu1 %vm3475_vm0, %v3473_v1 }
 0x130   :  { %870 = vmatpush1.bf16.msra.mxu0 %v3530_v5 }
 0x131   :  { %871 = vmatprep.subr.bf16.mxu0 %v3536_v6 }
 0x134   :  { %872 = vmatpush1.bf16.msra.mxu0 %v3542_v7 }
 0x135   :  { %873 = vmatprep.subr.bf16.mxu0 %v3548_v8  ;;  %v3226_v8 = vld [vmem:[%s4534_s3 + $0x8] ss:$12 sps:$4 sm:$0xff]  }
 0x136   :  { %3064 = vmatpush3.bf16.msra.mxu1 %v3226_v8  ;;  %v2725_v8 = vld [vmem:[%s4537_s0 + $0x40] sm:$0xff] }
 0x137   :  { %3065 = vmatprep.subr.bf16.mxu1 %v3473_v1 }
 0x138   :  { %874 = vmatpush1.bf16.msra.mxu0 %v3557_v10  ;;  %v3227_v10 = vld [vmem:[%s4534_s3 + $0x20] ss:$12 sps:$4 sm:$0xff]  }
 0x139   :  { %875 = vmatprep.subr.bf16.mxu0 %v3563_v11  ;;  %v3228_v11 = vld [vmem:[%s4534_s3 + $0x38] ss:$12 sps:$4 sm:$0xff]  }
 0x13a   :  { %3066 = vmatpush3.bf16.msra.mxu1 %v3227_v10 }
 0x13b   :  { %3067 = vmatprep.subr.bf16.mxu1 %v3473_v1 }
 0x13c   :  { %876 = vmatpush1.bf16.msra.mxu0 %v3572_v13  ;;  %v3230_v13 = vld [vmem:[%s4534_s3 + $0x68] ss:$12 sps:$4 sm:$0xff]  }
 0x13d   :  { %877 = vmatprep.subr.bf16.mxu0 %v3578_v14  ;;  %v3231_v14 = vld [vmem:[%s4534_s3 + $0x80] ss:$12 sps:$4 sm:$0xff]  }
 0x13e   :  { %3068 = vmatpush3.bf16.msra.mxu1 %v3228_v11  ;;  %v2728_v11 = vld [vmem:[%s4537_s0 + $0x58] sm:$0xff] }
 0x13f   :  { %3069 = vmatprep.subr.bf16.mxu1 %v3473_v1 }
 0x140   :  { %878 = vmatpush1.bf16.msra.mxu0 %v3588_v16  ;;  %v3232_v16 = vld [vmem:[%s4534_s3 + $0x98] ss:$12 sps:$4 sm:$0xff]  }
 0x141   :  { %879 = vmatprep.subr.bf16.mxu0 %v3594_v17  ;;  %v3233_v17 = vld [vmem:[%s4534_s3 + $0xb0] ss:$12 sps:$4 sm:$0xff]  }
 0x144   :  { %880 = vmatpush1.bf16.msra.mxu0 %v3603_v19  ;;  %v392_v19 = vld [vmem:[%s4536_s4] sm:$0x7] }
 0x145   :  { %881 = vmatprep.subr.bf16.mxu0 %v3609_v20  ;;  %v2723_v20 = vld [vmem:[%s4537_s0 + $0x30] sm:$0xff]  ;;  %v401_v24 = vrot.slane %v392_v19, %v3707_v41  ;;  %v405_v27 = vrot.slane %v392_v19, %v3747_v35 }
 0x146   :  { %v634_v31 = vadd.f32 %v2723_v20, %v3715_v43 }
 0x148   :  { %882 = vmatpush1.bf16.msra.mxu0 %v3619_v22  ;;  %v397_v22 = vrot.slane %v392_v19, %v3702_v39  ;;  %v639_v19 = vadd.f32 %v2728_v11, %v3764_v40 }
 0x149   :  { %1197 = vmatprep.subr.bf16.mxu0 %v3509_v0  ;;  %v3229_v0 = vld [vmem:[%s4534_s3 + $0x50] ss:$12 sps:$4 sm:$0xff]  }
 0x14a   :  { %3070 = vmatpush3.bf16.msra.mxu1 %v3229_v0 }
 0x14b   :  { %3071 = vmatprep.subr.bf16.mxu1 %v3473_v1 }
 0x14e   :  { %3072 = vmatpush3.bf16.msra.mxu1 %v3230_v13  ;;  %v636_v13 = vadd.f32 %v2725_v8, %v3756_v46 }
 0x14f   :  { %3073 = vmatprep.subr.bf16.mxu1 %v3473_v1 }
 0x152   :  { %3074 = vmatpush3.bf16.msra.mxu1 %v3231_v14 }
 0x153   :  { %3075 = vmatprep.subr.bf16.mxu1 %v3473_v1 }
 0x156   :  { %3076 = vmatpush3.bf16.msra.mxu1 %v3232_v16 }
 0x157   :  { %3077 = vmatprep.subr.bf16.mxu1 %v3473_v1 }
 0x15a   :  { %3078 = vmatpush3.bf16.msra.mxu1 %v3233_v17 }
 0x15b   :  { %3083 = vmatprep.subr.bf16.mxu1 %v3473_v1 }
 0x1fe   :  { %v571_v33 = vpop.f32.mrb[4].mxu0  ;;  %v614_v34 = vpop.f32.mrb[4].mxu1 }
 0x1ff   :  { %v572_v36 = vadd.f32 %v571_v33, %v397_v22  ;;  %v573_v37 = vpop.f32.mrb[5].mxu0  ;;  %v3061_v42 = vpop.f32.mrb[5].mxu1  ;;  %v615_v0 = vadd.f32 %v614_v34, %v405_v27 }
 0x200   :  { %v574_v48 = vadd.f32 %v573_v37, %v401_v24  ;;  %v575_v38 = vpop.f32.mrb[6].mxu0  ;;  %v617_v51 = vpop.f32.mrb[6].mxu1 }
 0x201   :  { %v640_v52 = vadd.f32 %v634_v31, %v572_v36  ;;  %v576_v53 = vadd.f32 %v575_v38, %v397_v22  ;;  %v577_v54 = vpop.f32.mrb[7].mxu0  ;;  %v3062_v55 = vpop.f32.mrb[7].mxu1  ;;  %v618_v20 = vadd.f32 %v617_v51, %v405_v27  ;;  %v2760_v27 = vld [vmem:[%s4537_s0 + $0x68] sm:$0xff] }
 0x202   :  { %v578_v57 = vadd.f32 %v577_v54, %v401_v24  ;;  %v654_v61 = vadd.f32 %v635_v49, %v574_v48  ;;  %v3244_v54 = vld [vmem:[%s4534_s3 + $0x68] ss:$12 sps:$4 sm:$0xff]  }
 0x203   :  { %v2729_v59 = vmul.f32 -1.442695, %v640_v52  ;;  %v641_v60 = vadd.f32 %v637_v44, %v576_v53  ;;  %v3919_v52 = vld [vmem:[%s4534_s3 + $0x64] ss:$12 sps:$4 sm:$0xff]   ;;  %v3925_v53 = vld [vmem:[%s4534_s3 + $0x60] ss:$12 sps:$4 sm:$0xff]  }
 0x204   :  { %v655_v63 = vadd.f32 %v638_v58, %v578_v57  ;;  %v2731_v9 = vmul.f32 -1.442695, %v654_v61  ;;  %v3934_v55 = vld [vmem:[%s4534_s3 + $0x7c] ss:$12 sps:$4 sm:$0xff]   ;;  %v3940_v57 = vld [vmem:[%s4534_s3 + $0x78] ss:$12 sps:$4 sm:$0xff]  }
 0x205   :  { %3333 = vpow2.f32 %v2729_v59  ;;  %v2730_v62 = vmul.f32 -1.442695, %v641_v60  ;;  %v3248_v58 = vld [vmem:[%s4534_s3 + $0x80] ss:$12 sps:$4 sm:$0xff]   ;;  %v3956_v60 = vld [vmem:[%s4534_s3 + $0x90] ss:$12 sps:$4 sm:$0xff]  }
 0x206   :  { %v2732_v12 = vmul.f32 -1.442695, %v655_v63  ;;  %v3950_v59 = vld [vmem:[%s4534_s3 + $0x94] ss:$12 sps:$4 sm:$0xff]   ;;  %v3252_v61 = vld [vmem:[%s4534_s3 + $0x98] ss:$12 sps:$4 sm:$0xff]  }
 0x207   :  { %3335 = vpow2.f32 %v2730_v62  ;;  %v3966_v62 = vld [vmem:[%s4534_s3 + $0xac] ss:$12 sps:$4 sm:$0xff]   ;;  %v3972_v63 = vld [vmem:[%s4534_s3 + $0xa8] ss:$12 sps:$4 sm:$0xff]  }
 0x208   :  { %3337 = vpow2.f32 %v2731_v9  ;;  %v3256_v9 = vld [vmem:[%s4534_s3 + $0xb0] ss:$12 sps:$4 sm:$0xff]  }
 0x209   :  { %3339 = vpow2.f32 %v2732_v12  ;;  %v722_v12 = vld [vmem:[%s4536_s4] sm:$0x7] }
 0x20f   :  { %v3334_v15 = vpop.eup %3333 }
 0x210   :  { %v648_v18 = vadd.f32 1.0, %v3334_v15  ;;  %v2759_v15 = vld [vmem:[%s4537_s0 + $0x60] sm:$0xff] }
 0x211   :  { %v3336_v21 = vpop.eup %3335 }
 0x212   :  { %3341 = vrcp.f32 %v648_v18  ;;  %v649_v25 = vadd.f32 1.0, %v3336_v21  ;;  %v3338_v26 = vpop.eup %3337  ;;  %v727_v18 = vrot.slane %v722_v12, %v3702_v39  ;;  %v731_v21 = vrot.slane %v722_v12, %v3707_v41 }
 0x213   :  { %v3340_v23 = vpop.eup %3339  ;;  %v662_v10 = vadd.f32 1.0, %v3338_v26  ;;  %v964_v26 = vadd.f32 %v2759_v15, %v3715_v43 }
 0x214   :  { %3343 = vrcp.f32 %v649_v25  ;;  %v663_v14 = vadd.f32 1.0, %v3340_v23  ;;  %v2762_v25 = vld [vmem:[%s4537_s0 + $0x78] sm:$0xff] }
 0x215   :  { %3345 = vrcp.f32 %v662_v10 }
 0x216   :  { %3347 = vrcp.f32 %v663_v14  ;;  %v2763_v14 = vld [vmem:[%s4537_s0 + $0x80] sm:$0xff] }
 0x21c   :  { %v3342_v16 = vpop.eup %3341 }
 0x21d   :  { %v668_v17 = vmul.f32 %v3342_v16, %v615_v0 }
 0x21e   :  { %v3344_v22 = vpop.eup %3343 }
 0x21f   :  { %v670_v24 = vadd.f32 %v668_v17, %v636_v13  ;;  %v669_v30 = vmul.f32 %v3344_v22, %v618_v20  ;;  %v3346_v32 = vpop.eup %3345  ;;  %v967_v13 = vadd.f32 %v2762_v25, %v3725_v47  ;;  %v965_v17 = vadd.f32 %v2760_v27, %v3734_v50 }
 0x220   :  { %v3348_v33 = vpop.eup %3347  ;;  %v674_v36 = vsub.f32 1.0, %v3346_v32  ;;  %v678_v44 = vmul.f32 %v3346_v32, %v3770_v28 }
 0x221   :  { %3349 = vtanh.f32 %v670_v24  ;;  %v671_v31 = vadd.f32 %v669_v30, %v639_v19  ;;  %v675_v37 = vsub.f32 1.0, %v3348_v33  ;;  %v679_v49 = vmul.f32 %v3348_v33, %v3772_v29  ;;  %v3234_v29 = vld [vmem:[%s4534_s3 + $0x8] ss:$12 sps:$4 sm:$0xff]  }
 0x222   :  { %v968_v33 = vadd.f32 %v2763_v14, %v3743_v56  ;;  %v735_v56 = vrot.slane %v722_v12, %v3747_v35 }
 0x223   :  { %3351 = vtanh.f32 %v671_v31 }
 0x22b   :  { %v3350_v34 = vpop.eup %3349 }
 0x22c   :  { %v676_v42 = vmul.f32 %v3350_v34, %v674_v36 }
 0x22d   :  { %v3352_v45 = vpop.eup %3351 }
 0x22e   :  { %v677_v48 = vmul.f32 %v3352_v45, %v675_v37  ;;  %v3867_v38 = vadd.f32 %v678_v44, %v676_v42 }
 0x230   :  { %v3869_v51 = vadd.f32 %v679_v49, %v677_v48  ;;  %2733 = vst [vmem:[%s4539_s5 + $0x10] sm:$0xff] %v3867_v38 }
 0x232   :  { %2734 = vst [vmem:[%s4539_s5 + $0x18] sm:$0xff] %v3869_v51  ;;  %v689_v28 = vpack.c.bf16 %v3869_v51, %v3867_v38 }
 0x234   :  { %900 = vmatmul.mubr.bf16.vlgmr.msra.gmra.mrb[8].mxu0 %v689_v28  ;;  %3080 = vmatmul.mubr.bf16.vlgmr.msra.gmra.mrb[8].mxu1 %v689_v28 }
 0x235   :  { %1198 = vmatpush1.bf16.msra.mxu0 %v3516_v3  ;;  %1229 = vmatprep.mubr.bf16.mxu0 %v3474_v2  ;;  %v3235_v3 = vld [vmem:[%s4534_s3 + $0x20] ss:$12 sps:$4 sm:$0xff]  }
 0x236   :  { %1199 = vmatprep.subr.bf16.mxu0 %v3524_v4  ;;  %3099 = vmatprep.mubr.msk.bf16.mxu1 %vm3475_vm0, %v3473_v1  ;;  %v3236_v4 = vld [vmem:[%s4534_s3 + $0x38] ss:$12 sps:$4 sm:$0xff]  }
 0x237   :  { %3084 = vmatpush3.bf16.msra.mxu1 %v3234_v29 }
 0x238   :  { %3085 = vmatprep.subr.bf16.mxu1 %v3473_v1 }
 0x239   :  { %1200 = vmatpush1.bf16.msra.mxu0 %v3530_v5  ;;  %v3903_v5 = vld [vmem:[%s4534_s3 + $0x4c] ss:$12 sps:$4 sm:$0xff]  }
 0x23a   :  { %1201 = vmatprep.subr.bf16.mxu0 %v3536_v6  ;;  %v3909_v6 = vld [vmem:[%s4534_s3 + $0x48] ss:$12 sps:$4 sm:$0xff]  }
 0x23b   :  { %3086 = vmatpush3.bf16.msra.mxu1 %v3235_v3 }
 0x23c   :  { %3087 = vmatprep.subr.bf16.mxu1 %v3473_v1 }
 0x23d   :  { %1202 = vmatpush1.bf16.msra.mxu0 %v3542_v7  ;;  %v3240_v7 = vld [vmem:[%s4534_s3 + $0x50] ss:$12 sps:$4 sm:$0xff]  }
 0x23e   :  { %1203 = vmatprep.subr.bf16.mxu0 %v3903_v5 }
 0x23f   :  { %3088 = vmatpush3.bf16.msra.mxu1 %v3236_v4 }
 0x240   :  { %3089 = vmatprep.subr.bf16.mxu1 %v3473_v1 }
 0x241   :  { %1204 = vmatpush1.bf16.msra.mxu0 %v3909_v6 }
 0x242   :  { %1205 = vmatprep.subr.bf16.mxu0 %v3919_v52 }
 0x243   :  { %3090 = vmatpush3.bf16.msra.mxu1 %v3240_v7 }
 0x244   :  { %3091 = vmatprep.subr.bf16.mxu1 %v3473_v1 }
 0x245   :  { %1206 = vmatpush1.bf16.msra.mxu0 %v3925_v53 }
 0x246   :  { %1207 = vmatprep.subr.bf16.mxu0 %v3934_v55 }
 0x247   :  { %3092 = vmatpush3.bf16.msra.mxu1 %v3244_v54  ;;  %v2761_v54 = vld [vmem:[%s4537_s0 + $0x70] sm:$0xff] }
 0x248   :  { %3093 = vmatprep.subr.bf16.mxu1 %v3473_v1  ;;  %v966_v15 = vadd.f32 %v2761_v54, %v3756_v46 }
 0x249   :  { %1208 = vmatpush1.bf16.msra.mxu0 %v3940_v57 }
 0x24a   :  { %1209 = vmatprep.subr.bf16.mxu0 %v3950_v59 }
 0x24b   :  { %3094 = vmatpush3.bf16.msra.mxu1 %v3248_v58 }
 0x24c   :  { %3095 = vmatprep.subr.bf16.mxu1 %v3473_v1 }
 0x24d   :  { %1210 = vmatpush1.bf16.msra.mxu0 %v3956_v60 }
 0x24e   :  { %1211 = vmatprep.subr.bf16.mxu0 %v3966_v62 }
 0x24f   :  { %3096 = vmatpush3.bf16.msra.mxu1 %v3252_v61  ;;  %v2764_v61 = vld [vmem:[%s4537_s0 + $0x88] sm:$0xff] }
 0x250   :  { %3097 = vmatprep.subr.bf16.mxu1 %v3473_v1  ;;  %v969_v12 = vadd.f32 %v2764_v61, %v3764_v40 }
 0x251   :  { %1212 = vmatpush1.bf16.msra.mxu0 %v3972_v63 }
 0x253   :  { %3098 = vmatpush3.bf16.msra.mxu1 %v3256_v9 }
 0x254   :  { %3103 = vmatprep.subr.bf16.mxu1 %v3473_v1 }
 0x307   :  { %v901_v23 = vpop.f32.mrb[8].mxu0  ;;  %v944_v8 = vpop.f32.mrb[8].mxu1 }
 0x308   :  { %v902_v10 = vadd.f32 %v901_v23, %v727_v18  ;;  %v903_v11 = vpop.f32.mrb[9].mxu0  ;;  %v3081_v0 = vpop.f32.mrb[9].mxu1  ;;  %v945_v9 = vadd.f32 %v944_v8, %v735_v56 }
 0x309   :  { %v904_v16 = vadd.f32 %v903_v11, %v731_v21  ;;  %v905_v20 = vpop.f32.mrb[10].mxu0  ;;  %v947_v19 = vpop.f32.mrb[10].mxu1 }
 0x30a   :  { %v970_v22 = vadd.f32 %v964_v26, %v902_v10  ;;  %v906_v24 = vadd.f32 %v905_v20, %v727_v18  ;;  %v907_v30 = vpop.f32.mrb[11].mxu0  ;;  %v3082_v31 = vpop.f32.mrb[11].mxu1  ;;  %v948_v26 = vadd.f32 %v947_v19, %v735_v56  ;;  %v2795_v56 = vld [vmem:[%s4537_s0 + $0x90] sm:$0xff] }
 0x30b   :  { %v908_v32 = vadd.f32 %v907_v30, %v731_v21  ;;  %v984_v37 = vadd.f32 %v965_v17, %v904_v16  ;;  %v1294_v61 = vadd.f32 %v2795_v56, %v3715_v43  ;;  %v2797_v56 = vld [vmem:[%s4537_s0 + $0xa0] sm:$0xff] }
 0x30c   :  { %v2765_v36 = vmul.f32 -1.442695, %v970_v22  ;;  %v971_v34 = vadd.f32 %v967_v13, %v906_v24 }
 0x30d   :  { %v985_v44 = vadd.f32 %v968_v33, %v908_v32  ;;  %v2767_v45 = vmul.f32 -1.442695, %v984_v37  ;;  %v4038_v32 = vld [vmem:[%s4534_s3] ss:$12 sps:$4 sm:$0xff]   ;;  %v3260_v33 = vld [vmem:[%s4534_s3 + $0x8] ss:$12 sps:$4 sm:$0xff]  }
 0x30e   :  { %3353 = vpow2.f32 %v2765_v36  ;;  %v2766_v42 = vmul.f32 -1.442695, %v971_v34  ;;  %v4048_v36 = vld [vmem:[%s4534_s3 + $0x1c] ss:$12 sps:$4 sm:$0xff]   ;;  %v4054_v34 = vld [vmem:[%s4534_s3 + $0x18] ss:$12 sps:$4 sm:$0xff]  }
 0x30f   :  { %v2768_v48 = vmul.f32 -1.442695, %v985_v44  ;;  %v3264_v37 = vld [vmem:[%s4534_s3 + $0x20] ss:$12 sps:$4 sm:$0xff]   ;;  %v4070_v44 = vld [vmem:[%s4534_s3 + $0x30] ss:$12 sps:$4 sm:$0xff]  }
 0x310   :  { %3355 = vpow2.f32 %v2766_v42  ;;  %v4064_v42 = vld [vmem:[%s4534_s3 + $0x34] ss:$12 sps:$4 sm:$0xff]  }
 0x311   :  { %3357 = vpow2.f32 %v2767_v45  ;;  %v3268_v45 = vld [vmem:[%s4534_s3 + $0x38] ss:$12 sps:$4 sm:$0xff]  }
 0x312   :  { %3359 = vpow2.f32 %v2768_v48  ;;  %v3269_v48 = vld [vmem:[%s4534_s3 + $0x50] ss:$12 sps:$4 sm:$0xff]  }
 0x318   :  { %v3354_v49 = vpop.eup %3353 }
 0x319   :  { %v978_v28 = vadd.f32 1.0, %v3354_v49  ;;  %v3270_v49 = vld [vmem:[%s4534_s3 + $0x68] ss:$12 sps:$4 sm:$0xff]  }
 0x31a   :  { %v3356_v29 = vpop.eup %3355 }
 0x31b   :  { %3361 = vrcp.f32 %v978_v28  ;;  %v979_v3 = vadd.f32 1.0, %v3356_v29  ;;  %v3358_v4 = vpop.eup %3357  ;;  %v3271_v28 = vld [vmem:[%s4534_s3 + $0x80] ss:$12 sps:$4 sm:$0xff]   ;;  %v3272_v29 = vld [vmem:[%s4534_s3 + $0x98] ss:$12 sps:$4 sm:$0xff]  }
 0x31c   :  { %v3360_v7 = vpop.eup %3359  ;;  %v992_v58 = vadd.f32 1.0, %v3358_v4  ;;  %v1052_v4 = vld [vmem:[%s4536_s4] sm:$0x7] }
 0x31d   :  { %3363 = vrcp.f32 %v979_v3  ;;  %v993_v18 = vadd.f32 1.0, %v3360_v7  ;;  %v3273_v3 = vld [vmem:[%s4534_s3 + $0xb0] ss:$12 sps:$4 sm:$0xff]   ;;  %v1057_v7 = vrot.slane %v1052_v4, %v3702_v39  ;;  %v1061_v54 = vrot.slane %v1052_v4, %v3707_v41 }
 0x31e   :  { %3365 = vrcp.f32 %v992_v58  ;;  %v2798_v58 = vld [vmem:[%s4537_s0 + $0xa8] sm:$0xff] }
 0x31f   :  { %3367 = vrcp.f32 %v993_v18 }
 0x325   :  { %v3362_v21 = vpop.eup %3361 }
 0x326   :  { %v998_v25 = vmul.f32 %v3362_v21, %v945_v9  ;;  %v2796_v9 = vld [vmem:[%s4537_s0 + $0x98] sm:$0xff] }
 0x327   :  { %v3364_v27 = vpop.eup %3363 }
 0x328   :  { %v1000_v23 = vadd.f32 %v998_v25, %v966_v15  ;;  %v999_v10 = vmul.f32 %v3364_v27, %v948_v26  ;;  %v3366_v0 = vpop.eup %3365  ;;  %v2799_v27 = vld [vmem:[%s4537_s0 + $0xb0] sm:$0xff] }
 0x329   :  { %v3368_v13 = vpop.eup %3367  ;;  %v1004_v14 = vsub.f32 1.0, %v3366_v0  ;;  %v1008_v20 = vmul.f32 %v3366_v0, %v3867_v38 }
 0x32a   :  { %3369 = vtanh.f32 %v1000_v23  ;;  %v1001_v11 = vadd.f32 %v999_v10, %v969_v12  ;;  %v1005_v16 = vsub.f32 1.0, %v3368_v13  ;;  %v1009_v19 = vmul.f32 %v3368_v13, %v3869_v51  ;;  %v4033_v51 = vld [vmem:[%s4534_s3 + $0x4] ss:$12 sps:$4 sm:$0xff]  }
 0x32b   :  { %1527 = vmatprep.subr.bf16.mxu0 %v4033_v51  ;;  %v1297_v12 = vadd.f32 %v2798_v58, %v3725_v47  ;;  %v4131_v23 = vld [vmem:[%s4538_s1 + $0x20] sm:$0xff]  ;;  %v1295_v10 = vadd.f32 %v2796_v9, %v3734_v50 }
 0x32c   :  { %3371 = vtanh.f32 %v1001_v11  ;;  %v1298_v47 = vadd.f32 %v2799_v27, %v4131_v23 }
 0x334   :  { %v3370_v8 = vpop.eup %3369 }
 0x335   :  { %v1006_v17 = vmul.f32 %v3370_v8, %v1004_v14 }
 0x336   :  { %v3372_v22 = vpop.eup %3371 }
 0x337   :  { %v1007_v24 = vmul.f32 %v3372_v22, %v1005_v16  ;;  %v4013_v30 = vadd.f32 %v1008_v20, %v1006_v17 }
 0x339   :  { %v4015_v31 = vadd.f32 %v1009_v19, %v1007_v24  ;;  %2769 = vst [vmem:[%s4539_s5 + $0x20] sm:$0xff] %v4013_v30 }
 0x33b   :  { %2770 = vst [vmem:[%s4539_s5 + $0x28] sm:$0xff] %v4015_v31  ;;  %v1019_v38 = vpack.c.bf16 %v4015_v31, %v4013_v30 }
 0x33d   :  { %1230 = vmatmul.mubr.bf16.vlgmr.msra.gmra.mrb[12].mxu0 %v1019_v38  ;;  %3100 = vmatmul.mubr.bf16.vlgmr.msra.gmra.mrb[12].mxu1 %v1019_v38 }
 0x33e   :  { %1559 = vmatprep.mubr.bf16.mxu0 %v3474_v2  ;;  %3119 = vmatprep.mubr.msk.bf16.mxu1 %vm3475_vm0, %v3473_v1 }
 0x33f   :  { %1528 = vmatpush1.bf16.msra.mxu0 %v4038_v32  ;;  %3104 = vmatpush3.bf16.msra.mxu1 %v3260_v33 }
 0x340   :  { %3105 = vmatprep.subr.bf16.mxu1 %v3473_v1  ;;  %1529 = vmatprep.subr.bf16.mxu0 %v4048_v36 }
 0x343   :  { %1530 = vmatpush1.bf16.msra.mxu0 %v4054_v34  ;;  %3106 = vmatpush3.bf16.msra.mxu1 %v3264_v37 }
 0x344   :  { %3107 = vmatprep.subr.bf16.mxu1 %v3473_v1  ;;  %1531 = vmatprep.subr.bf16.mxu0 %v4064_v42 }
 0x347   :  { %1532 = vmatpush1.bf16.msra.mxu0 %v4070_v44  ;;  %3108 = vmatpush3.bf16.msra.mxu1 %v3268_v45 }
 0x348   :  { %1533 = vmatprep.subr.bf16.mxu0 %v3903_v5  ;;  %3109 = vmatprep.subr.bf16.mxu1 %v3473_v1 }
 0x34b   :  { %1534 = vmatpush1.bf16.msra.mxu0 %v3909_v6  ;;  %3110 = vmatpush3.bf16.msra.mxu1 %v3269_v48 }
 0x34c   :  { %1535 = vmatprep.subr.bf16.mxu0 %v3919_v52  ;;  %3111 = vmatprep.subr.bf16.mxu1 %v3473_v1 }
 0x34f   :  { %1536 = vmatpush1.bf16.msra.mxu0 %v3925_v53  ;;  %3112 = vmatpush3.bf16.msra.mxu1 %v3270_v49 }
 0x350   :  { %1537 = vmatprep.subr.bf16.mxu0 %v3934_v55  ;;  %3113 = vmatprep.subr.bf16.mxu1 %v3473_v1 }
 0x353   :  { %1538 = vmatpush1.bf16.msra.mxu0 %v3940_v57  ;;  %3114 = vmatpush3.bf16.msra.mxu1 %v3271_v28 }
 0x354   :  { %1539 = vmatprep.subr.bf16.mxu0 %v3950_v59  ;;  %3115 = vmatprep.subr.bf16.mxu1 %v3473_v1 }
 0x357   :  { %1540 = vmatpush1.bf16.msra.mxu0 %v3956_v60  ;;  %3116 = vmatpush3.bf16.msra.mxu1 %v3272_v29  ;;  %v1065_v29 = vrot.slane %v1052_v4, %v3747_v35 }
 0x358   :  { %1541 = vmatprep.subr.bf16.mxu0 %v3966_v62  ;;  %3117 = vmatprep.subr.bf16.mxu1 %v3473_v1 }
 0x35b   :  { %1542 = vmatpush1.bf16.msra.mxu0 %v3972_v63  ;;  %3118 = vmatpush3.bf16.msra.mxu1 %v3273_v3 }
 0x35c   :  { %1857 = vmatprep.subr.bf16.mxu0 %v4033_v51  ;;  %3123 = vmatprep.subr.bf16.mxu1 %v3473_v1 }
 0x410   :  { %v1231_v15 = vpop.f32.mrb[12].mxu0  ;;  %v1274_v18 = vpop.f32.mrb[12].mxu1 }
 0x411   :  { %v1232_v21 = vadd.f32 %v1231_v15, %v1057_v7  ;;  %v1233_v25 = vpop.f32.mrb[13].mxu0  ;;  %v3101_v26 = vpop.f32.mrb[13].mxu1  ;;  %v1275_v58 = vadd.f32 %v1274_v18, %v1065_v29 }
 0x412   :  { %v1234_v43 = vadd.f32 %v1233_v25, %v1061_v54  ;;  %v1235_v11 = vpop.f32.mrb[14].mxu0  ;;  %v1277_v0 = vpop.f32.mrb[14].mxu1 }
 0x413   :  { %v1300_v13 = vadd.f32 %v1294_v61, %v1232_v21  ;;  %v1236_v14 = vadd.f32 %v1235_v11, %v1057_v7  ;;  %v1237_v8 = vpop.f32.mrb[15].mxu0  ;;  %v3102_v16 = vpop.f32.mrb[15].mxu1  ;;  %v1296_v61 = vadd.f32 %v2797_v56, %v3756_v46  ;;  %v1278_v25 = vadd.f32 %v1277_v0, %v1065_v29  ;;  %v2834_v29 = vld [vmem:[%s4537_s0 + $0xd8] sm:$0xff] }
 0x414   :  { %v1238_v17 = vadd.f32 %v1237_v8, %v1061_v54  ;;  %v1314_v24 = vadd.f32 %v1295_v10, %v1234_v43  ;;  %v2800_v54 = vld [vmem:[%s4537_s0 + $0xb8] sm:$0xff] }
 0x415   :  { %v2801_v20 = vmul.f32 -1.442695, %v1300_v13  ;;  %v1301_v22 = vadd.f32 %v1297_v12, %v1236_v14  ;;  %v1299_v4 = vadd.f32 %v2800_v54, %v3764_v40  ;;  %v4239_v54 = vld [vmem:[%s4538_s1 + $0x8] sm:$0xff] }
 0x416   :  { %v1315_v38 = vadd.f32 %v1298_v47, %v1238_v17  ;;  %v2803_v33 = vmul.f32 -1.442695, %v1314_v24  ;;  %v3277_v24 = vld [vmem:[%s4534_s3 + $0x50] ss:$12 sps:$4 sm:$0xff]  }
 0x417   :  { %3373 = vpow2.f32 %v2801_v20  ;;  %v2802_v19 = vmul.f32 -1.442695, %v1301_v22  ;;  %v3275_v20 = vld [vmem:[%s4534_s3 + $0x20] ss:$12 sps:$4 sm:$0xff]   ;;  %v3276_v22 = vld [vmem:[%s4534_s3 + $0x38] ss:$12 sps:$4 sm:$0xff]  }
 0x418   :  { %v2804_v37 = vmul.f32 -1.442695, %v1315_v38  ;;  %v3279_v38 = vld [vmem:[%s4534_s3 + $0x80] ss:$12 sps:$4 sm:$0xff]  }
 0x419   :  { %3375 = vpow2.f32 %v2802_v19  ;;  %v3278_v19 = vld [vmem:[%s4534_s3 + $0x68] ss:$12 sps:$4 sm:$0xff]  }
 0x41a   :  { %3377 = vpow2.f32 %v2803_v33  ;;  %v3280_v33 = vld [vmem:[%s4534_s3 + $0x98] ss:$12 sps:$4 sm:$0xff]  }
 0x41b   :  { %3379 = vpow2.f32 %v2804_v37  ;;  %v3281_v37 = vld [vmem:[%s4534_s3 + $0xb0] ss:$12 sps:$4 sm:$0xff]  }
 0x421   :  { %v3374_v50 = vpop.eup %3373 }
 0x422   :  { %v1308_v45 = vadd.f32 1.0, %v3374_v50  ;;  %v1382_v50 = vld [vmem:[%s4536_s4] sm:$0x7] }
 0x423   :  { %v3376_v48 = vpop.eup %3375 }
 0x424   :  { %3381 = vrcp.f32 %v1308_v45  ;;  %v1309_v49 = vadd.f32 1.0, %v3376_v48  ;;  %v3378_v28 = vpop.eup %3377  ;;  %v2831_v45 = vld [vmem:[%s4537_s0 + $0xc0] sm:$0xff] }
 0x425   :  { %v3380_v3 = vpop.eup %3379  ;;  %v1322_v7 = vadd.f32 1.0, %v3378_v28  ;;  %v4220_v48 = vld [vmem:[%s4538_s1] sm:$0xff]  ;;  %v1391_v28 = vrot.slane %v1382_v50, %v3707_v41 }
 0x426   :  { %3383 = vrcp.f32 %v1309_v49  ;;  %v1323_v9 = vadd.f32 1.0, %v3380_v3  ;;  %v1387_v49 = vrot.slane %v1382_v50, %v3702_v39  ;;  %v4230_v3 = vld [vmem:[%s4538_s1 + $0x18] sm:$0xff]  ;;  %v1624_v56 = vadd.f32 %v2831_v45, %v4220_v48 }
 0x427   :  { %3385 = vrcp.f32 %v1322_v7  ;;  %v2832_v7 = vld [vmem:[%s4537_s0 + $0xc8] sm:$0xff] }
 0x428   :  { %3387 = vrcp.f32 %v1323_v9 }
 0x42e   :  { %v3382_v15 = vpop.eup %3381 }
 0x42f   :  { %v1328_v21 = vmul.f32 %v3382_v15, %v1275_v58 }
 0x430   :  { %v3384_v26 = vpop.eup %3383 }
 0x431   :  { %v1330_v12 = vadd.f32 %v1328_v21, %v1296_v61  ;;  %v1329_v27 = vmul.f32 %v3384_v26, %v1278_v25  ;;  %v3386_v10 = vpop.eup %3385  ;;  %v1627_v25 = vadd.f32 %v2834_v29, %v4230_v3 }
 0x432   :  { %v3388_v11 = vpop.eup %3387  ;;  %v1334_v13 = vsub.f32 1.0, %v3386_v10  ;;  %v1338_v8 = vmul.f32 %v3386_v10, %v4013_v30 }
 0x433   :  { %3389 = vtanh.f32 %v1330_v12  ;;  %v1331_v43 = vadd.f32 %v1329_v27, %v1299_v4  ;;  %v1335_v14 = vsub.f32 1.0, %v3388_v11  ;;  %v1339_v0 = vmul.f32 %v3388_v11, %v4015_v31  ;;  %v3274_v31 = vld [vmem:[%s4534_s3 + $0x8] ss:$12 sps:$4 sm:$0xff]   ;;  %v2835_v4 = vld [vmem:[%s4537_s0 + $0xe0] sm:$0xff] }
 0x434   :  { %v1625_v12 = vadd.f32 %v2832_v7, %v4239_v54  ;;  %v4262_v7 = vld [vmem:[%s4538_s1 + $0x28] sm:$0xff] }
 0x435   :  { %3391 = vtanh.f32 %v1331_v43 }
 0x43d   :  { %v3390_v18 = vpop.eup %3389 }
 0x43e   :  { %v1336_v46 = vmul.f32 %v3390_v18, %v1334_v13 }
 0x43f   :  { %v3392_v16 = vpop.eup %3391 }
 0x440   :  { %v1337_v17 = vmul.f32 %v3392_v16, %v1335_v14  ;;  %v4146_v40 = vadd.f32 %v1338_v8, %v1336_v46  ;;  %v1628_v46 = vadd.f32 %v2835_v4, %v4131_v23 }
 0x442   :  { %v4148_v47 = vadd.f32 %v1339_v0, %v1337_v17  ;;  %2805 = vst [vmem:[%s4539_s5 + $0x30] sm:$0xff] %v4146_v40 }
 0x444   :  { %2806 = vst [vmem:[%s4539_s5 + $0x38] sm:$0xff] %v4148_v47  ;;  %v1349_v30 = vpack.c.bf16 %v4148_v47, %v4146_v40 }
 0x446   :  { %1560 = vmatmul.mubr.bf16.vlgmr.msra.gmra.mrb[16].mxu0 %v1349_v30  ;;  %3120 = vmatmul.mubr.bf16.vlgmr.msra.gmra.mrb[16].mxu1 %v1349_v30 }
 0x447   :  { %1858 = vmatpush1.bf16.msra.mxu0 %v4038_v32  ;;  %1889 = vmatprep.mubr.bf16.mxu0 %v3474_v2 }
 0x448   :  { %1859 = vmatprep.subr.bf16.mxu0 %v4048_v36  ;;  %3139 = vmatprep.mubr.msk.bf16.mxu1 %vm3475_vm0, %v3473_v1 }
 0x449   :  { %3124 = vmatpush3.bf16.msra.mxu1 %v3274_v31 }
 0x44a   :  { %3125 = vmatprep.subr.bf16.mxu1 %v3473_v1 }
 0x44b   :  { %1860 = vmatpush1.bf16.msra.mxu0 %v4054_v34 }
 0x44c   :  { %1861 = vmatprep.subr.bf16.mxu0 %v4064_v42 }
 0x44d   :  { %3126 = vmatpush3.bf16.msra.mxu1 %v3275_v20 }
 0x44e   :  { %3127 = vmatprep.subr.bf16.mxu1 %v3473_v1 }
 0x44f   :  { %1862 = vmatpush1.bf16.msra.mxu0 %v4070_v44 }
 0x450   :  { %1863 = vmatprep.subr.bf16.mxu0 %v3903_v5 }
 0x451   :  { %3128 = vmatpush3.bf16.msra.mxu1 %v3276_v22 }
 0x452   :  { %3129 = vmatprep.subr.bf16.mxu1 %v3473_v1 }
 0x453   :  { %1864 = vmatpush1.bf16.msra.mxu0 %v3909_v6 }
 0x454   :  { %1865 = vmatprep.subr.bf16.mxu0 %v3919_v52 }
 0x455   :  { %3130 = vmatpush3.bf16.msra.mxu1 %v3277_v24 }
 0x456   :  { %3131 = vmatprep.subr.bf16.mxu1 %v3473_v1 }
 0x457   :  { %1866 = vmatpush1.bf16.msra.mxu0 %v3925_v53 }
 0x458   :  { %1867 = vmatprep.subr.bf16.mxu0 %v3934_v55 }
 0x459   :  { %3132 = vmatpush3.bf16.msra.mxu1 %v3278_v19 }
 0x45a   :  { %3133 = vmatprep.subr.bf16.mxu1 %v3473_v1 }
 0x45b   :  { %1868 = vmatpush1.bf16.msra.mxu0 %v3940_v57 }
 0x45c   :  { %1869 = vmatprep.subr.bf16.mxu0 %v3950_v59 }
 0x45d   :  { %3134 = vmatpush3.bf16.msra.mxu1 %v3279_v38 }
 0x45e   :  { %3135 = vmatprep.subr.bf16.mxu1 %v3473_v1 }
 0x45f   :  { %1870 = vmatpush1.bf16.msra.mxu0 %v3956_v60 }
 0x460   :  { %1871 = vmatprep.subr.bf16.mxu0 %v3966_v62 }
 0x461   :  { %3136 = vmatpush3.bf16.msra.mxu1 %v3280_v33 }
 0x462   :  { %3137 = vmatprep.subr.bf16.mxu1 %v3473_v1 }
 0x463   :  { %1872 = vmatpush1.bf16.msra.mxu0 %v3972_v63 }
 0x464   :  { %2187 = vmatprep.subr.bf16.mxu0 %v4033_v51 }
 0x465   :  { %3138 = vmatpush3.bf16.msra.mxu1 %v3281_v37  ;;  %v1395_v37 = vrot.slane %v1382_v50, %v3747_v35 }
 0x466   :  { %3143 = vmatprep.subr.bf16.mxu1 %v3473_v1 }
 0x519   :  { %v1561_v58 = vpop.f32.mrb[16].mxu0  ;;  %v1604_v61 = vpop.f32.mrb[16].mxu1 }
 0x51a   :  { %v1562_v9 = vadd.f32 %v1561_v58, %v1387_v49  ;;  %v1563_v15 = vpop.f32.mrb[17].mxu0  ;;  %v3121_v21 = vpop.f32.mrb[17].mxu1  ;;  %v1605_v50 = vadd.f32 %v1604_v61, %v1395_v37 }
 0x51b   :  { %v1564_v26 = vadd.f32 %v1563_v15, %v1391_v28  ;;  %v1565_v27 = vpop.f32.mrb[18].mxu0  ;;  %v1607_v43 = vpop.f32.mrb[18].mxu1 }
 0x51c   :  { %v1630_v10 = vadd.f32 %v1624_v56, %v1562_v9  ;;  %v1566_v11 = vadd.f32 %v1565_v27, %v1387_v49  ;;  %v1567_v13 = vpop.f32.mrb[19].mxu0  ;;  %v3122_v18 = vpop.f32.mrb[19].mxu1  ;;  %v2833_v49 = vld [vmem:[%s4537_s0 + $0xd0] sm:$0xff]  ;;  %v2836_v56 = vld [vmem:[%s4537_s0 + $0xe8] sm:$0xff] }
 0x51d   :  { %v1568_v14 = vadd.f32 %v1567_v13, %v1391_v28  ;;  %v1644_v17 = vadd.f32 %v1625_v12, %v1564_v26  ;;  %v4254_v28 = vld [vmem:[%s4538_s1 + $0x10] sm:$0xff]  ;;  %v1629_v4 = vadd.f32 %v2836_v56, %v4262_v7 }
 0x51e   :  { %v2837_v8 = vmul.f32 -1.442695, %v1630_v10  ;;  %v1631_v16 = vadd.f32 %v1627_v25, %v1566_v11  ;;  %v1626_v58 = vadd.f32 %v2833_v49, %v4254_v28  ;;  %v1608_v25 = vadd.f32 %v1607_v43, %v1395_v37  ;;  %v2871_v49 = vld [vmem:[%s4537_s0 + $0x110] sm:$0xff] }
 0x51f   :  { %v1645_v30 = vadd.f32 %v1628_v46, %v1568_v14  ;;  %v2839_v31 = vmul.f32 -1.442695, %v1644_v17 }
 0x520   :  { %3393 = vpow2.f32 %v2837_v8  ;;  %v2838_v0 = vmul.f32 -1.442695, %v1631_v16 }
 0x521   :  { %v2840_v20 = vmul.f32 -1.442695, %v1645_v30 }
 0x522   :  { %3395 = vpow2.f32 %v2838_v0 }
 0x523   :  { %3397 = vpow2.f32 %v2839_v31  ;;  %v2870_v31 = vld [vmem:[%s4537_s0 + $0x108] sm:$0xff] }
 0x524   :  { %3399 = vpow2.f32 %v2840_v20 }
 0x52a   :  { %v3394_v22 = vpop.eup %3393 }
 0x52b   :  { %v1638_v24 = vadd.f32 1.0, %v3394_v22  ;;  %v2868_v22 = vld [vmem:[%s4537_s0 + $0xf8] sm:$0xff] }
 0x52c   :  { %v3396_v19 = vpop.eup %3395  ;;  %v1955_v56 = vadd.f32 %v2868_v22, %v4239_v54 }
 0x52d   :  { %3401 = vrcp.f32 %v1638_v24  ;;  %v1639_v38 = vadd.f32 1.0, %v3396_v19  ;;  %v3398_v33 = vpop.eup %3397 }
 0x52e   :  { %v3400_v45 = vpop.eup %3399  ;;  %v1652_v29 = vadd.f32 1.0, %v3398_v33 }
 0x52f   :  { %3403 = vrcp.f32 %v1639_v38  ;;  %v1653_v9 = vadd.f32 1.0, %v3400_v45  ;;  %v1957_v45 = vadd.f32 %v2870_v31, %v4230_v3 }
 0x530   :  { %3405 = vrcp.f32 %v1652_v29 }
 0x531   :  { %3407 = vrcp.f32 %v1653_v9 }
 0x537   :  { %v3402_v15 = vpop.eup %3401 }
 0x538   :  { %v1658_v21 = vmul.f32 %v3402_v15, %v1605_v50 }
 0x539   :  { %v3404_v26 = vpop.eup %3403 }
 0x53a   :  { %v1660_v12 = vadd.f32 %v1658_v21, %v1626_v58  ;;  %v1659_v27 = vmul.f32 %v3404_v26, %v1608_v25  ;;  %v3406_v11 = vpop.eup %3405  ;;  %v1958_v26 = vadd.f32 %v2871_v49, %v4131_v23 }
 0x53b   :  { %v3408_v13 = vpop.eup %3407  ;;  %v1664_v18 = vsub.f32 1.0, %v3406_v11  ;;  %v1668_v8 = vmul.f32 %v3406_v11, %v4146_v40 }
 0x53c   :  { %3409 = vtanh.f32 %v1660_v12  ;;  %v1661_v10 = vadd.f32 %v1659_v27, %v1629_v4  ;;  %v1665_v14 = vsub.f32 1.0, %v3408_v13  ;;  %v1669_v43 = vmul.f32 %v3408_v13, %v4148_v47 }
 0x53e   :  { %3411 = vtanh.f32 %v1661_v10 }
 0x546   :  { %v3410_v61 = vpop.eup %3409 }
 0x547   :  { %v1666_v46 = vmul.f32 %v3410_v61, %v1664_v18 }
 0x548   :  { %v3412_v16 = vpop.eup %3411 }
 0x549   :  { %v1667_v17 = vmul.f32 %v3412_v16, %v1665_v14  ;;  %v4268_v0 = vadd.f32 %v1668_v8, %v1666_v46 }
 0x54b   :  { %v4270_v30 = vadd.f32 %v1669_v43, %v1667_v17  ;;  %2841 = vst [vmem:[%s4539_s5 + $0x40] sm:$0xff] %v4268_v0 }
 0x54d   :  { %2842 = vst [vmem:[%s4539_s5 + $0x48] sm:$0xff] %v4270_v30  ;;  %v1679_v40 = vpack.c.bf16 %v4270_v30, %v4268_v0 }
 0x54f   :  { %1890 = vmatmul.mubr.bf16.vlgmr.msra.gmra.mrb[20].mxu0 %v1679_v40  ;;  %3140 = vmatmul.mubr.bf16.vlgmr.msra.gmra.mrb[20].mxu1 %v1679_v40 }
 0x550   :  { %2188 = vmatpush1.bf16.msra.mxu0 %v4038_v32  ;;  %2219 = vmatprep.mubr.bf16.mxu0 %v3474_v2 }
 0x551   :  { %2189 = vmatprep.subr.bf16.mxu0 %v4048_v36  ;;  %3159 = vmatprep.mubr.msk.bf16.mxu1 %vm3475_vm0, %v3473_v1 }
 0x554   :  { %2190 = vmatpush1.bf16.msra.mxu0 %v4054_v34 }
 0x555   :  { %2191 = vmatprep.subr.bf16.mxu0 %v4064_v42 }
 0x558   :  { %2192 = vmatpush1.bf16.msra.mxu0 %v4070_v44 }
 0x559   :  { %2193 = vmatprep.subr.bf16.mxu0 %v3903_v5  ;;  %v3282_v5 = vld [vmem:[%s4534_s3 + $0x8] ss:$12 sps:$4 sm:$0xff]  }
 0x55a   :  { %3144 = vmatpush3.bf16.msra.mxu1 %v3282_v5  ;;  %v2869_v5 = vld [vmem:[%s4537_s0 + $0x100] sm:$0xff] }
 0x55b   :  { %3145 = vmatprep.subr.bf16.mxu1 %v3473_v1 }
 0x55c   :  { %2194 = vmatpush1.bf16.msra.mxu0 %v3909_v6  ;;  %v3283_v6 = vld [vmem:[%s4534_s3 + $0x20] ss:$12 sps:$4 sm:$0xff]  }
 0x55d   :  { %2195 = vmatprep.subr.bf16.mxu0 %v3919_v52  ;;  %v3284_v52 = vld [vmem:[%s4534_s3 + $0x38] ss:$12 sps:$4 sm:$0xff]  }
 0x55e   :  { %3146 = vmatpush3.bf16.msra.mxu1 %v3283_v6 }
 0x55f   :  { %3147 = vmatprep.subr.bf16.mxu1 %v3473_v1 }
 0x560   :  { %2196 = vmatpush1.bf16.msra.mxu0 %v3925_v53  ;;  %v3285_v53 = vld [vmem:[%s4534_s3 + $0x50] ss:$12 sps:$4 sm:$0xff]  }
 0x561   :  { %2197 = vmatprep.subr.bf16.mxu0 %v3934_v55  ;;  %v3286_v55 = vld [vmem:[%s4534_s3 + $0x68] ss:$12 sps:$4 sm:$0xff]  }
 0x562   :  { %3148 = vmatpush3.bf16.msra.mxu1 %v3284_v52  ;;  %v2872_v52 = vld [vmem:[%s4537_s0 + $0x118] sm:$0xff] }
 0x563   :  { %3149 = vmatprep.subr.bf16.mxu1 %v3473_v1 }
 0x564   :  { %2198 = vmatpush1.bf16.msra.mxu0 %v3940_v57  ;;  %v3287_v57 = vld [vmem:[%s4534_s3 + $0x80] ss:$12 sps:$4 sm:$0xff]  }
 0x565   :  { %2199 = vmatprep.subr.bf16.mxu0 %v3950_v59  ;;  %v3288_v59 = vld [vmem:[%s4534_s3 + $0x98] ss:$12 sps:$4 sm:$0xff]  }
 0x566   :  { %3150 = vmatpush3.bf16.msra.mxu1 %v3285_v53 }
 0x567   :  { %3151 = vmatprep.subr.bf16.mxu1 %v3473_v1 }
 0x568   :  { %2200 = vmatpush1.bf16.msra.mxu0 %v3956_v60  ;;  %v3289_v60 = vld [vmem:[%s4534_s3 + $0xb0] ss:$12 sps:$4 sm:$0xff]  }
 0x569   :  { %2201 = vmatprep.subr.bf16.mxu0 %v3966_v62  ;;  %v1712_v62 = vld [vmem:[%s4536_s4] sm:$0x7] }
 0x56a   :  { %3152 = vmatpush3.bf16.msra.mxu1 %v3286_v55  ;;  %v1721_v47 = vrot.slane %v1712_v62, %v3707_v41  ;;  %v1725_v43 = vrot.slane %v1712_v62, %v3747_v35  ;;  %v1956_v55 = vadd.f32 %v2869_v5, %v4254_v28 }
 0x56b   :  { %3153 = vmatprep.subr.bf16.mxu1 %v3473_v1 }
 0x56c   :  { %2202 = vmatpush1.bf16.msra.mxu0 %v3972_v63  ;;  %v2867_v63 = vld [vmem:[%s4537_s0 + $0xf0] sm:$0xff] }
 0x56d   :  { %2517 = vmatprep.subr.bf16.mxu0 %v4033_v51  ;;  %v1717_v51 = vrot.slane %v1712_v62, %v3702_v39  ;;  %v1954_v20 = vadd.f32 %v2867_v63, %v4220_v48  ;;  %v1959_v62 = vadd.f32 %v2872_v52, %v4262_v7 }
 0x56e   :  { %3154 = vmatpush3.bf16.msra.mxu1 %v3287_v57 }
 0x56f   :  { %3155 = vmatprep.subr.bf16.mxu1 %v3473_v1 }
 0x572   :  { %3156 = vmatpush3.bf16.msra.mxu1 %v3288_v59 }
 0x573   :  { %3157 = vmatprep.subr.bf16.mxu1 %v3473_v1 }
 0x576   :  { %3158 = vmatpush3.bf16.msra.mxu1 %v3289_v60 }
 0x577   :  { %3163 = vmatprep.subr.bf16.mxu1 %v3473_v1 }
 0x622   :  { %v1891_v24 = vpop.f32.mrb[20].mxu0  ;;  %v1934_v19 = vpop.f32.mrb[20].mxu1 }
 0x623   :  { %v1892_v38 = vadd.f32 %v1891_v24, %v1717_v51  ;;  %v1893_v33 = vpop.f32.mrb[21].mxu0  ;;  %v3141_v37 = vpop.f32.mrb[21].mxu1  ;;  %v1935_v53 = vadd.f32 %v1934_v19, %v1725_v43 }
 0x624   :  { %v1894_v29 = vadd.f32 %v1893_v33, %v1721_v47  ;;  %v1895_v50 = vpop.f32.mrb[22].mxu0  ;;  %v1937_v58 = vpop.f32.mrb[22].mxu1 }
 0x625   :  { %v1960_v9 = vadd.f32 %v1954_v20, %v1892_v38  ;;  %v1896_v15 = vadd.f32 %v1895_v50, %v1717_v51  ;;  %v1897_v21 = vpop.f32.mrb[23].mxu0  ;;  %v3142_v25 = vpop.f32.mrb[23].mxu1  ;;  %v1938_v63 = vadd.f32 %v1937_v58, %v1725_v43 }
 0x626   :  { %v1898_v4 = vadd.f32 %v1897_v21, %v1721_v47  ;;  %v1974_v10 = vadd.f32 %v1955_v56, %v1894_v29  ;;  %v3303_v21 = vld [vmem:[%s4534_s3 + $0x7c] ss:$12 sps:$4 sm:$0xff]   ;;  %v3301_v25 = vld [vmem:[%s4534_s3 + $0x78] ss:$12 sps:$4 sm:$0xff]  }
 0x627   :  { %v2873_v12 = vmul.f32 -1.442695, %v1960_v9  ;;  %v1961_v27 = vadd.f32 %v1957_v45, %v1896_v15  ;;  %v3297_v9 = vld [vmem:[%s4534_s3 + $0x60] ss:$12 sps:$4 sm:$0xff]   ;;  %v3300_v15 = vld [vmem:[%s4534_s3 + $0x68] ss:$12 sps:$4 sm:$0xff]  }
 0x628   :  { %v1975_v13 = vadd.f32 %v1958_v26, %v1898_v4  ;;  %v2875_v18 = vmul.f32 -1.442695, %v1974_v10  ;;  %v3304_v4 = vld [vmem:[%s4534_s3 + $0x80] ss:$12 sps:$4 sm:$0xff]  }
 0x629   :  { %3413 = vpow2.f32 %v2873_v12  ;;  %v2874_v11 = vmul.f32 -1.442695, %v1961_v27  ;;  %v3307_v26 = vld [vmem:[%s4534_s3 + $0x94] ss:$12 sps:$4 sm:$0xff]   ;;  %v3305_v12 = vld [vmem:[%s4534_s3 + $0x90] ss:$12 sps:$4 sm:$0xff]  }
 0x62a   :  { %v2876_v61 = vmul.f32 -1.442695, %v1975_v13  ;;  %v3308_v27 = vld [vmem:[%s4534_s3 + $0x98] ss:$12 sps:$4 sm:$0xff]   ;;  %v3312_v13 = vld [vmem:[%s4534_s3 + $0xb0] ss:$12 sps:$4 sm:$0xff]  }
 0x62b   :  { %3415 = vpow2.f32 %v2874_v11  ;;  %v3311_v10 = vld [vmem:[%s4534_s3 + $0xac] ss:$12 sps:$4 sm:$0xff]   ;;  %v3309_v11 = vld [vmem:[%s4534_s3 + $0xa8] ss:$12 sps:$4 sm:$0xff]  }
 0x62c   :  { %3417 = vpow2.f32 %v2875_v18  ;;  %v2042_v18 = vld [vmem:[%s4536_s4] sm:$0x7] }
 0x62d   :  { %3419 = vpow2.f32 %v2876_v61  ;;  %v2903_v61 = vld [vmem:[%s4537_s0 + $0x120] sm:$0xff] }
 0x633   :  { %v3414_v14 = vpop.eup %3413 }
 0x634   :  { %v1968_v46 = vadd.f32 1.0, %v3414_v14  ;;  %v2047_v14 = vrot.slane %v2042_v18, %v3702_v39 }
 0x635   :  { %v3416_v8 = vpop.eup %3415 }
 0x636   :  { %3421 = vrcp.f32 %v1968_v46  ;;  %v1969_v16 = vadd.f32 1.0, %v3416_v8  ;;  %v3418_v17 = vpop.eup %3417  ;;  %v2051_v46 = vrot.slane %v2042_v18, %v3707_v41  ;;  %v2906_v8 = vld [vmem:[%s4537_s0 + $0x138] sm:$0xff] }
 0x637   :  { %v3420_v40 = vpop.eup %3419  ;;  %v1982_v6 = vadd.f32 1.0, %v3418_v17  ;;  %v2287_v52 = vadd.f32 %v2906_v8, %v4230_v3 }
 0x638   :  { %3423 = vrcp.f32 %v1969_v16  ;;  %v1983_v57 = vadd.f32 1.0, %v3420_v40  ;;  %v2904_v16 = vld [vmem:[%s4537_s0 + $0x128] sm:$0xff] }
 0x639   :  { %3425 = vrcp.f32 %v1982_v6 }
 0x63a   :  { %3427 = vrcp.f32 %v1983_v57  ;;  %v2285_v57 = vadd.f32 %v2904_v16, %v4239_v54 }
 0x640   :  { %v3422_v59 = vpop.eup %3421 }
 0x641   :  { %v1988_v60 = vmul.f32 %v3422_v59, %v1935_v53  ;;  %v2907_v53 = vld [vmem:[%s4537_s0 + $0x140] sm:$0xff] }
 0x642   :  { %v3424_v51 = vpop.eup %3423 }
 0x643   :  { %v1990_v47 = vadd.f32 %v1988_v60, %v1956_v55  ;;  %v1989_v31 = vmul.f32 %v3424_v51, %v1938_v63  ;;  %v3426_v22 = vpop.eup %3425 }
 0x644   :  { %v3428_v24 = vpop.eup %3427  ;;  %v1994_v38 = vsub.f32 1.0, %v3426_v22  ;;  %v1998_v45 = vmul.f32 %v3426_v22, %v4268_v0 }
 0x645   :  { %3429 = vtanh.f32 %v1990_v47  ;;  %v1991_v20 = vadd.f32 %v1989_v31, %v1959_v62  ;;  %v1995_v33 = vsub.f32 1.0, %v3428_v24  ;;  %v1999_v56 = vmul.f32 %v3428_v24, %v4270_v30  ;;  %v3290_v30 = vld [vmem:[%s4534_s3 + $0x8] ss:$12 sps:$4 sm:$0xff]  }
 0x647   :  { %3431 = vtanh.f32 %v1991_v20  ;;  %v2288_v20 = vadd.f32 %v2907_v53, %v4131_v23  ;;  %v2055_v23 = vrot.slane %v2042_v18, %v3747_v35  ;;  %v2942_v53 = vld [vmem:[%s4537_s0 + $0x168] sm:$0xff] }
 0x64f   :  { %v3430_v19 = vpop.eup %3429 }
 0x650   :  { %v1996_v37 = vmul.f32 %v3430_v19, %v1994_v38 }
 0x651   :  { %v3432_v49 = vpop.eup %3431 }
 0x652   :  { %v1997_v29 = vmul.f32 %v3432_v49, %v1995_v33  ;;  %v4365_v50 = vadd.f32 %v1998_v45, %v1996_v37 }
 0x654   :  { %v4367_v58 = vadd.f32 %v1999_v56, %v1997_v29  ;;  %2877 = vst [vmem:[%s4539_s5 + $0x50] sm:$0xff] %v4365_v50 }
 0x656   :  { %2878 = vst [vmem:[%s4539_s5 + $0x58] sm:$0xff] %v4367_v58  ;;  %v2009_v0 = vpack.c.bf16 %v4367_v58, %v4365_v50 }
 0x658   :  { %2220 = vmatmul.mubr.bf16.vlgmr.msra.gmra.mrb[24].mxu0 %v2009_v0  ;;  %3160 = vmatmul.mubr.bf16.vlgmr.msra.gmra.mrb[24].mxu1 %v2009_v0 }
 0x659   :  { %2518 = vmatpush1.bf16.msra.mxu0 %v4038_v32  ;;  %2549 = vmatprep.mubr.bf16.mxu0 %v3474_v2  ;;  %v3291_v2 = vld [vmem:[%s4534_s3 + $0x20] ss:$12 sps:$4 sm:$0xff]   ;;  %v3292_v32 = vld [vmem:[%s4534_s3 + $0x38] ss:$12 sps:$4 sm:$0xff]  }
 0x65a   :  { %2519 = vmatprep.subr.bf16.mxu0 %v4048_v36  ;;  %3179 = vmatprep.mubr.msk.bf16.mxu1 %vm3475_vm0, %v3473_v1  ;;  %v3295_v36 = vld [vmem:[%s4534_s3 + $0x4c] ss:$12 sps:$4 sm:$0xff]  }
 0x65b   :  { %3164 = vmatpush3.bf16.msra.mxu1 %v3290_v30 }
 0x65c   :  { %3165 = vmatprep.subr.bf16.mxu1 %v3473_v1 }
 0x65d   :  { %2520 = vmatpush1.bf16.msra.mxu0 %v4054_v34  ;;  %v3293_v34 = vld [vmem:[%s4534_s3 + $0x48] ss:$12 sps:$4 sm:$0xff]  }
 0x65e   :  { %2521 = vmatprep.subr.bf16.mxu0 %v4064_v42  ;;  %v3296_v42 = vld [vmem:[%s4534_s3 + $0x50] ss:$12 sps:$4 sm:$0xff]  }
 0x65f   :  { %3166 = vmatpush3.bf16.msra.mxu1 %v3291_v2 }
 0x660   :  { %3167 = vmatprep.subr.bf16.mxu1 %v3473_v1 }
 0x661   :  { %2522 = vmatpush1.bf16.msra.mxu0 %v4070_v44  ;;  %v3299_v44 = vld [vmem:[%s4534_s3 + $0x64] ss:$12 sps:$4 sm:$0xff]  }
 0x662   :  { %2523 = vmatprep.subr.bf16.mxu0 %v3295_v36 }
 0x663   :  { %3168 = vmatpush3.bf16.msra.mxu1 %v3292_v32  ;;  %v2905_v32 = vld [vmem:[%s4537_s0 + $0x130] sm:$0xff] }
 0x664   :  { %3169 = vmatprep.subr.bf16.mxu1 %v3473_v1 }
 0x665   :  { %2524 = vmatpush1.bf16.msra.mxu0 %v3293_v34  ;;  %v2908_v34 = vld [vmem:[%s4537_s0 + $0x148] sm:$0xff] }
 0x666   :  { %2525 = vmatprep.subr.bf16.mxu0 %v3299_v44  ;;  %v2286_v44 = vadd.f32 %v2905_v32, %v4254_v28 }
 0x667   :  { %3170 = vmatpush3.bf16.msra.mxu1 %v3296_v42 }
 0x668   :  { %3171 = vmatprep.subr.bf16.mxu1 %v3473_v1 }
 0x669   :  { %2526 = vmatpush1.bf16.msra.mxu0 %v3297_v9 }
 0x66a   :  { %2527 = vmatprep.subr.bf16.mxu0 %v3303_v21 }
 0x66b   :  { %3172 = vmatpush3.bf16.msra.mxu1 %v3300_v15 }
 0x66c   :  { %3173 = vmatprep.subr.bf16.mxu1 %v3473_v1 }
 0x66d   :  { %2528 = vmatpush1.bf16.msra.mxu0 %v3301_v25 }
 0x66e   :  { %2529 = vmatprep.subr.bf16.mxu0 %v3307_v26 }
 0x66f   :  { %3174 = vmatpush3.bf16.msra.mxu1 %v3304_v4  ;;  %v2289_v4 = vadd.f32 %v2908_v34, %v4262_v7 }
 0x670   :  { %3175 = vmatprep.subr.bf16.mxu1 %v3473_v1 }
 0x671   :  { %2530 = vmatpush1.bf16.msra.mxu0 %v3305_v12 }
 0x672   :  { %2531 = vmatprep.subr.bf16.mxu0 %v3311_v10 }
 0x673   :  { %3176 = vmatpush3.bf16.msra.mxu1 %v3308_v27 }
 0x674   :  { %3177 = vmatprep.subr.bf16.mxu1 %v3473_v1  ;;  %v2284_v1 = vadd.f32 %v2903_v61, %v4220_v48 }
 0x675   :  { %2532 = vmatpush1.bf16.msra.mxu0 %v3309_v11 }
 0x677   :  { %3178 = vmatpush3.bf16.msra.mxu1 %v3312_v13 }
 0x72b   :  { %v2221_v17 = vpop.f32.mrb[24].mxu0  ;;  %v2264_v43 = vpop.f32.mrb[24].mxu1 }
 0x72c   :  { %v2222_v40 = vadd.f32 %v2221_v17, %v2047_v14  ;;  %v2223_v5 = vpop.f32.mrb[25].mxu0  ;;  %v3161_v6 = vpop.f32.mrb[25].mxu1  ;;  %v2265_v42 = vadd.f32 %v2264_v43, %v2055_v23 }
 0x72d   :  { %v2224_v55 = vadd.f32 %v2223_v5, %v2051_v46  ;;  %v2225_v59 = vpop.f32.mrb[26].mxu0  ;;  %v2267_v60 = vpop.f32.mrb[26].mxu1  ;;  %v2939_v5 = vld [vmem:[%s4537_s0 + $0x150] sm:$0xff] }
 0x72e   :  { %v2290_v63 = vadd.f32 %v2284_v1, %v2222_v40  ;;  %v2226_v62 = vadd.f32 %v2225_v59, %v2047_v14  ;;  %v2227_v51 = vpop.f32.mrb[27].mxu0  ;;  %v3162_v47 = vpop.f32.mrb[27].mxu1  ;;  %v2268_v25 = vadd.f32 %v2267_v60, %v2055_v23 }
 0x72f   :  { %v2228_v31 = vadd.f32 %v2227_v51, %v2051_v46  ;;  %v2304_v38 = vadd.f32 %v2285_v57, %v2224_v55  ;;  %v2614_v55 = vadd.f32 %v2939_v5, %v4220_v48  ;;  %v2940_v57 = vld [vmem:[%s4537_s0 + $0x158] sm:$0xff]  ;;  %v2617_v47 = vadd.f32 %v2942_v53, %v4230_v3 }
 0x730   :  { %v2909_v22 = vmul.f32 -1.442695, %v2290_v63  ;;  %v2291_v24 = vadd.f32 %v2287_v52, %v2226_v62 }
 0x731   :  { %v2305_v33 = vadd.f32 %v2288_v20, %v2228_v31  ;;  %v2911_v37 = vmul.f32 -1.442695, %v2304_v38  ;;  %v2615_v31 = vadd.f32 %v2940_v57, %v4239_v54 }
 0x732   :  { %3433 = vpow2.f32 %v2909_v22  ;;  %v2910_v19 = vmul.f32 -1.442695, %v2291_v24 }
 0x733   :  { %v2912_v45 = vmul.f32 -1.442695, %v2305_v33 }
 0x734   :  { %3435 = vpow2.f32 %v2910_v19 }
 0x735   :  { %3437 = vpow2.f32 %v2911_v37 }
 0x736   :  { %3439 = vpow2.f32 %v2912_v45 }
 0x73c   :  { %v3434_v49 = vpop.eup %3433 }
 0x73d   :  { %v2298_v29 = vadd.f32 1.0, %v3434_v49 }
 0x73e   :  { %v3436_v56 = vpop.eup %3435 }
 0x73f   :  { %3441 = vrcp.f32 %v2298_v29  ;;  %v2299_v0 = vadd.f32 1.0, %v3436_v56  ;;  %v3438_v30 = vpop.eup %3437 }
 0x740   :  { %v3440_v2 = vpop.eup %3439  ;;  %v2312_v36 = vadd.f32 1.0, %v3438_v30 }
 0x741   :  { %3443 = vrcp.f32 %v2299_v0  ;;  %v2313_v9 = vadd.f32 1.0, %v3440_v2 }
 0x742   :  { %3445 = vrcp.f32 %v2312_v36 }
 0x743   :  { %3447 = vrcp.f32 %v2313_v9  ;;  %v2941_v9 = vld [vmem:[%s4537_s0 + $0x160] sm:$0xff] }
 0x749   :  { %v3442_v15 = vpop.eup %3441 }
 0x74a   :  { %v2318_v21 = vmul.f32 %v3442_v15, %v2265_v42 }
 0x74b   :  { %v3444_v26 = vpop.eup %3443 }
 0x74c   :  { %v2320_v12 = vadd.f32 %v2318_v21, %v2286_v44  ;;  %v2319_v27 = vmul.f32 %v3444_v26, %v2268_v25  ;;  %v3446_v11 = vpop.eup %3445  ;;  %v2944_v21 = vld [vmem:[%s4537_s0 + $0x178] sm:$0xff] }
 0x74d   :  { %v3448_v13 = vpop.eup %3447  ;;  %v2324_v18 = vsub.f32 1.0, %v3446_v11  ;;  %v2328_v8 = vmul.f32 %v3446_v11, %v4365_v50 }
 0x74e   :  { %3449 = vtanh.f32 %v2320_v12  ;;  %v2321_v10 = vadd.f32 %v2319_v27, %v2289_v4  ;;  %v2325_v14 = vsub.f32 1.0, %v3448_v13  ;;  %v2329_v17 = vmul.f32 %v3448_v13, %v4367_v58  ;;  %v2372_v58 = vld [vmem:[%s4536_s4] sm:$0x7] }
 0x74f   :  { %v2377_v6 = vrot.slane %v2372_v58, %v3702_v39  ;;  %v2381_v52 = vrot.slane %v2372_v58, %v3707_v41  ;;  %v2943_v39 = vld [vmem:[%s4537_s0 + $0x170] sm:$0xff]  ;;  %v2612_v41 = vld [vmem:[%s4538_s1 + $0x20] sm:$0xff]  ;;  %v2385_v42 = vrot.slane %v2372_v58, %v3747_v35  ;;  %v2616_v4 = vadd.f32 %v2941_v9, %v4254_v28 }
 0x750   :  { %3451 = vtanh.f32 %v2321_v10  ;;  %v2618_v45 = vadd.f32 %v2943_v39, %v2612_v41  ;;  %v2619_v35 = vadd.f32 %v2944_v21, %v4262_v7 }
 0x758   :  { %v3450_v61 = vpop.eup %3449 }
 0x759   :  { %v2326_v46 = vmul.f32 %v3450_v61, %v2324_v18 }
 0x75a   :  { %v3452_v1 = vpop.eup %3451 }
 0x75b   :  { %v2327_v16 = vmul.f32 %v3452_v1, %v2325_v14  ;;  %v4480_v43 = vadd.f32 %v2328_v8, %v2326_v46 }
 0x75d   :  { %v4482_v40 = vadd.f32 %v2329_v17, %v2327_v16  ;;  %2913 = vst [vmem:[%s4539_s5 + $0x60] sm:$0xff] %v4480_v43 }
 0x75f   :  { %2914 = vst [vmem:[%s4539_s5 + $0x68] sm:$0xff] %v4482_v40  ;;  %v2339_v50 = vpack.c.bf16 %v4482_v40, %v4480_v43 }
 0x761   :  { %2550 = vmatmul.mubr.bf16.vlgmr.msra.gmra.mrb[28].mxu0 %v2339_v50  ;;  %3180 = vmatmul.mubr.bf16.vlgmr.msra.gmra.mrb[28].mxu1 %v2339_v50 }
 0x834   :  { %v2551_v59 = vpop.f32.mrb[28].mxu0  ;;  %v2594_v60 = vpop.f32.mrb[28].mxu1 }
 0x835   :  { %v2552_v63 = vadd.f32 %v2551_v59, %v2377_v6  ;;  %v2553_v62 = vpop.f32.mrb[29].mxu0  ;;  %v3181_v51 = vpop.f32.mrb[29].mxu1  ;;  %v2595_v25 = vadd.f32 %v2594_v60, %v2385_v42 }
 0x836   :  { %v2554_v48 = vadd.f32 %v2553_v62, %v2381_v52  ;;  %v2555_v20 = vpop.f32.mrb[30].mxu0  ;;  %v2597_v22 = vpop.f32.mrb[30].mxu1 }
 0x837   :  { %v2620_v24 = vadd.f32 %v2614_v55, %v2552_v63  ;;  %v2556_v38 = vadd.f32 %v2555_v20, %v2377_v6  ;;  %v2557_v19 = vpop.f32.mrb[31].mxu0  ;;  %v3182_v33 = vpop.f32.mrb[31].mxu1  ;;  %v2598_v10 = vadd.f32 %v2597_v22, %v2385_v42 }
 0x838   :  { %v2558_v37 = vadd.f32 %v2557_v19, %v2381_v52  ;;  %v2634_v29 = vadd.f32 %v2615_v31, %v2554_v48 }
 0x839   :  { %v2945_v3 = vmul.f32 -1.442695, %v2620_v24  ;;  %v2621_v49 = vadd.f32 %v2617_v47, %v2556_v38 }
 0x83a   :  { %v2635_v0 = vadd.f32 %v2618_v45, %v2558_v37  ;;  %v2947_v30 = vmul.f32 -1.442695, %v2634_v29 }
 0x83b   :  { %3453 = vpow2.f32 %v2945_v3  ;;  %v2946_v56 = vmul.f32 -1.442695, %v2621_v49 }
 0x83c   :  { %v2948_v23 = vmul.f32 -1.442695, %v2635_v0 }
 0x83d   :  { %3455 = vpow2.f32 %v2946_v56 }
 0x83e   :  { %3457 = vpow2.f32 %v2947_v30 }
 0x83f   :  { %3459 = vpow2.f32 %v2948_v23 }
 0x845   :  { %v3454_v54 = vpop.eup %3453 }
 0x846   :  { %v2628_v2 = vadd.f32 1.0, %v3454_v54 }
 0x847   :  { %v3456_v32 = vpop.eup %3455 }
 0x848   :  { %3461 = vrcp.f32 %v2628_v2  ;;  %v2629_v36 = vadd.f32 1.0, %v3456_v32  ;;  %v3458_v34 = vpop.eup %3457 }
 0x849   :  { %v3460_v44 = vpop.eup %3459  ;;  %v2642_v15 = vadd.f32 1.0, %v3458_v34 }
 0x84a   :  { %3463 = vrcp.f32 %v2629_v36  ;;  %v2643_v26 = vadd.f32 1.0, %v3460_v44 }
 0x84b   :  { %3465 = vrcp.f32 %v2642_v15 }
 0x84c   :  { %3467 = vrcp.f32 %v2643_v26 }
 0x852   :  { %v3462_v12 = vpop.eup %3461 }
 0x853   :  { %v2648_v27 = vmul.f32 %v3462_v12, %v2595_v25 }
 0x854   :  { %v3464_v11 = vpop.eup %3463 }
 0x855   :  { %v2650_v13 = vadd.f32 %v2648_v27, %v2616_v4  ;;  %v2649_v18 = vmul.f32 %v3464_v11, %v2598_v10  ;;  %v3466_v14 = vpop.eup %3465 }
 0x856   :  { %v3468_v46 = vpop.eup %3467  ;;  %v2654_v8 = vsub.f32 1.0, %v3466_v14  ;;  %v2658_v28 = vmul.f32 %v3466_v14, %v4480_v43 }
 0x857   :  { %3469 = vtanh.f32 %v2650_v13  ;;  %v2651_v61 = vadd.f32 %v2649_v18, %v2619_v35  ;;  %v2655_v17 = vsub.f32 1.0, %v3468_v46  ;;  %v2659_v7 = vmul.f32 %v3468_v46, %v4482_v40 }
 0x859   :  { %3471 = vtanh.f32 %v2651_v61 }
 0x861   :  { %v3470_v1 = vpop.eup %3469 }
 0x862   :  { %v2656_v16 = vmul.f32 %v3470_v1, %v2654_v8 }
 0x863   :  { %v3472_v50 = vpop.eup %3471 }
 0x864   :  { %v2660_v58 = vadd.f32 %v2658_v28, %v2656_v16  ;;  %v2657_v5 = vmul.f32 %v3472_v50, %v2655_v17 }
 0x866   :  { %2949 = vst [vmem:[%s4539_s5 + $0x70] sm:$0xff] %v2660_v58  ;;  %v2661_v6 = vadd.f32 %v2659_v7, %v2657_v5 }
 0x868   :  { %2950 = vst [vmem:[%s4539_s5 + $0x78] sm:$0xff] %v2661_v6 }

</bundles_post_ra>
